<compile_context>
chip_gen: v5e
topology: v5e:2x2
jax: 0.10.0
libtpu: 0.0.40
codegen_flags: <defaults>
</compile_context>

<pallas_src>
import functools

import jax
import jax.numpy as jnp
from jax import lax
from jax.experimental import pallas as pl
from jax.experimental.pallas import tpu as pltpu


def _round_up(x, m):
    return ((x + m - 1) // m) * m


def _reconstruct_kernel(h0_ref, wg_ref, bg_ref, wfc_ref, bfc_ref,
                        out_ref, xh_scr, *, seq_len, ip, hp, unroll):
    """Single invocation; runs the whole autoregressive GRU decode.

    xh_scr: (Bp, ip + hp) carried state, lanes [0:ip] = x (fc output fed back),
            lanes [ip:ip+hp] = GRU hidden state h.
    wg_ref: (ip + hp, 4*hp) stacked gate weight; columns (each hp wide):
            [r-sum | z-sum | gi_n | gh_n].
    out_ref: (seq_len, Bp, ip) output, written time-reversed.
    """
    bp = xh_scr.shape[0]
    # init carried state: x = 0, h = h0
    xh_scr[:, :ip] = jnp.zeros((bp, ip), jnp.float32)
    xh_scr[:, ip:] = h0_ref[...]

    def step(t, carry):
        xh = xh_scr[...]                                         # (Bp, ip+hp)

        # One fused gate matmul; every slice below is 128-lane aligned.
        g = jnp.dot(xh, wg_ref[...],
                    preferred_element_type=jnp.float32) + bg_ref[...]
        r = jax.nn.sigmoid(g[:, 0 * hp:1 * hp])                  # r gate
        z = jax.nn.sigmoid(g[:, 1 * hp:2 * hp])                  # z gate
        n = jnp.tanh(g[:, 2 * hp:3 * hp] + r * g[:, 3 * hp:4 * hp])
        h = xh[:, ip:]
        h_new = (1.0 - z) * n + z * h                            # (Bp, hp)

        # Linear head (feeds back as next GRU input).
        y = jnp.dot(h_new, wfc_ref[...],
                    preferred_element_type=jnp.float32) + bfc_ref[...]

        xh_scr[:, :ip] = y
        xh_scr[:, ip:] = h_new
        out_ref[seq_len - 1 - t] = y                             # time-reversed
        return carry

    lax.fori_loop(0, seq_len, step, 0, unroll=unroll)


def reconstruct_forward(hidden, params, *, seq_len):
    """hidden: (1, B, hid_dim) float32. Returns (B, seq_len, out_dim)."""
    h0 = hidden[0].astype(jnp.float32)                 # (B, hid)
    B, H = h0.shape
    w_ih = params["weight_ih"].astype(jnp.float32)     # (3H, in_dim)
    w_hh = params["weight_hh"].astype(jnp.float32)     # (3H, hid)
    b_ih = params["bias_ih"].astype(jnp.float32)       # (3H,)
    b_hh = params["bias_hh"].astype(jnp.float32)       # (3H,)
    w_fc = params["fc_weight"].astype(jnp.float32)     # (out_dim, hid)
    b_fc = params["fc_bias"].astype(jnp.float32)       # (out_dim,)

    in_dim = w_ih.shape[1]
    out_dim = w_fc.shape[0]
    assert in_dim == out_dim, "autoregressive feedback requires out_dim == in_dim"

    hp = _round_up(H, 128)        # padded gate / hidden lane width
    ip = _round_up(in_dim, 128)   # padded x / y lane width
    bp = _round_up(B, 8)          # padded batch (f32 sublane)

    # Per-gate pieces (PyTorch gate order: r, z, n).
    wih_r, wih_z, wih_n = w_ih[:H], w_ih[H:2 * H], w_ih[2 * H:]
    whh_r, whh_z, whh_n = w_hh[:H], w_hh[H:2 * H], w_hh[2 * H:]
    bih_r, bih_z, bih_n = b_ih[:H], b_ih[H:2 * H], b_ih[2 * H:]
    bhh_r, bhh_z, bhh_n = b_hh[:H], b_hh[H:2 * H], b_hh[2 * H:]

    # Stacked gate weight acting on [x | h]:
    #   rows [0:in_dim]   <- x contribution, rows [ip:ip+H] <- h contribution.
    #   cols [0:hp]       = r-sum     (W_ir^T stacked with W_hr^T)
    #   cols [hp:2hp]     = z-sum     (W_iz^T stacked with W_hz^T)
    #   cols [2hp:3hp]    = gi_n      (W_in^T only)
    #   cols [3hp:4hp]    = gh_n      (W_hn^T only)
    wg = jnp.zeros((ip + hp, 4 * hp), jnp.float32)
    wg = wg.at[:in_dim, 0 * hp:0 * hp + H].set(wih_r.T)
    wg = wg.at[ip:ip + H, 0 * hp:0 * hp + H].set(whh_r.T)
    wg = wg.at[:in_dim, 1 * hp:1 * hp + H].set(wih_z.T)
    wg = wg.at[ip:ip + H, 1 * hp:1 * hp + H].set(whh_z.T)
    wg = wg.at[:in_dim, 2 * hp:2 * hp + H].set(wih_n.T)
    wg = wg.at[ip:ip + H, 3 * hp:3 * hp + H].set(whh_n.T)

    bg = jnp.zeros((1, 4 * hp), jnp.float32)
    bg = bg.at[0, 0 * hp:0 * hp + H].set(bih_r + bhh_r)
    bg = bg.at[0, 1 * hp:1 * hp + H].set(bih_z + bhh_z)
    bg = bg.at[0, 2 * hp:2 * hp + H].set(bih_n)
    bg = bg.at[0, 3 * hp:3 * hp + H].set(bhh_n)

    wfc = jnp.zeros((hp, ip), jnp.float32).at[:H, :out_dim].set(w_fc.T)
    bfc = jnp.zeros((1, ip), jnp.float32).at[0, :out_dim].set(b_fc)

    h0p = jnp.zeros((bp, hp), jnp.float32).at[:B, :H].set(h0)

    vmem_spec = pl.BlockSpec(memory_space=pltpu.MemorySpace.VMEM)

    out_pad = pl.pallas_call(
        functools.partial(_reconstruct_kernel, seq_len=seq_len, ip=ip, hp=hp,
                          unroll=(seq_len <= 16)),
        out_shape=jax.ShapeDtypeStruct((seq_len, bp, ip), jnp.float32),
        in_specs=[vmem_spec] * 5,
        out_specs=vmem_spec,
        scratch_shapes=[pltpu.VMEM((bp, ip + hp), jnp.float32)],
    )(h0p, wg, bg, wfc, bfc)

    # (seq_len, Bp, ip) -> (B, seq_len, out_dim); time reversal already in-kernel.
    return jnp.transpose(out_pad[:, :B, :out_dim], (1, 0, 2))


def _reference_forward(hidden, params, *, seq_len):
    """Pure-JAX reference mirroring the PyTorch module."""
    h = hidden[0]
    B = h.shape[0]
    in_dim = params["weight_ih"].shape[1]
    H = h.shape[1]
    x = jnp.zeros((B, in_dim), jnp.float32)
    outs = []
    for _ in range(seq_len):
        gi = x @ params["weight_ih"].T + params["bias_ih"]
        gh = h @ params["weight_hh"].T + params["bias_hh"]
        r = jax.nn.sigmoid(gi[:, :H] + gh[:, :H])
        z = jax.nn.sigmoid(gi[:, H:2 * H] + gh[:, H:2 * H])
        n = jnp.tanh(gi[:, 2 * H:] + r * gh[:, 2 * H:])
        h = (1.0 - z) * n + z * h
        x = h @ params["fc_weight"].T + params["fc_bias"]
        outs.append(x[:, None, :])
    out = jnp.concatenate(outs, axis=1)
    return out[:, ::-1, :]


if __name__ == "__main__":
    # Small shapes consistent with the module: in_dim == out_dim (feedback loop).
    in_dim = out_dim = 4
    hid_dim = 32
    seq_len = 8
    batch = 2
    # dropout is a no-op for a single-layer PyTorch GRU (and in eval mode).

    key = jax.random.PRNGKey(0)
    ks = jax.random.split(key, 7)
    scale = 1.0 / jnp.sqrt(hid_dim)
    u = lambda k, shape: jax.random.uniform(k, shape, jnp.float32, -scale, scale)
    params = {
        "weight_ih": u(ks[0], (3 * hid_dim, in_dim)),
        "weight_hh": u(ks[1], (3 * hid_dim, hid_dim)),
        "bias_ih":   u(ks[2], (3 * hid_dim,)),
        "bias_hh":   u(ks[3], (3 * hid_dim,)),
        "fc_weight": u(ks[4], (out_dim, hid_dim)),
        "fc_bias":   u(ks[5], (out_dim,)),
    }
    hidden = jax.random.normal(ks[6], (1, batch, hid_dim), jnp.float32)

    out = reconstruct_forward(hidden, params, seq_len=seq_len)
    out = jax.block_until_ready(out)

    ref = _reference_forward(hidden, params, seq_len=seq_len)
    assert out.shape == (batch, seq_len, out_dim), out.shape
    assert jnp.allclose(out, ref, atol=1e-4, rtol=1e-4), "mismatch vs reference"

    print("KERNEL_OK")
</pallas_src>

<mosaic_0001>
module attributes {stable_mosaic.version = 11 : i64} {
  func.func @_reconstruct_kernel(%arg0: memref<8x128xf32, #tpu.memory_space<vmem>>, %arg1: memref<256x512xf32, #tpu.memory_space<vmem>>, %arg2: memref<1x512xf32, #tpu.memory_space<vmem>>, %arg3: memref<128x128xf32, #tpu.memory_space<vmem>>, %arg4: memref<1x128xf32, #tpu.memory_space<vmem>>, %arg5: memref<8x8x128xf32, #tpu.memory_space<vmem>>, %arg6: memref<8x256xf32, #tpu.memory_space<vmem>>) attributes {dimension_semantics = [], scalar_prefetch = 0 : i64, scratch_operands = 1 : i64, tpu.core_type = #tpu.core_type<tc>} {
    %cst = arith.constant 0.000000e+00 : f32
    %0 = vector.broadcast %cst : f32 to vector<8x128xf32>
    %c0 = arith.constant 0 : index
    %c0_0 = arith.constant 0 : index
    %1 = vector.load %arg6[%c0, %c0_0] : memref<8x256xf32, #tpu.memory_space<vmem>>, vector<8x128xf32>
    tpu.vector_store %arg6[%c0, %c0_0], %0 {strides = array<i32>} : memref<8x256xf32, #tpu.memory_space<vmem>>, vector<8x128xf32>,
    %c0_1 = arith.constant 0 : index
    %c0_2 = arith.constant 0 : index
    %2 = vector.load %arg0[%c0_1, %c0_2] : memref<8x128xf32, #tpu.memory_space<vmem>>, vector<8x128xf32>
    %c0_3 = arith.constant 0 : index
    %c128 = arith.constant 128 : index
    %3 = vector.load %arg6[%c0_3, %c128] : memref<8x256xf32, #tpu.memory_space<vmem>>, vector<8x128xf32>
    tpu.vector_store %arg6[%c0_3, %c128], %2 {strides = array<i32>} : memref<8x256xf32, #tpu.memory_space<vmem>>, vector<8x128xf32>,
    %c0_i32 = arith.constant 0 : i32
    %c0_4 = arith.constant 0 : index
    %c0_5 = arith.constant 0 : index
    %4 = vector.load %arg6[%c0_4, %c0_5] : memref<8x256xf32, #tpu.memory_space<vmem>>, vector<8x256xf32>
    %c0_6 = arith.constant 0 : index
    %c0_7 = arith.constant 0 : index
    %5 = vector.load %arg1[%c0_6, %c0_7] : memref<256x512xf32, #tpu.memory_space<vmem>>, vector<256x512xf32>
    %cst_8 = arith.constant dense<0.000000e+00> : vector<8x512xf32>
    %6 = tpu.matmul %4, %5, %cst_8 {dimension_numbers = #tpu.dot_dimension_numbers<[1], [0], [0], [1], [0, 0, 1, 1], [], []>} : vector<8x256xf32>, vector<256x512xf32>, vector<8x512xf32> -> vector<8x512xf32>
    %c0_9 = arith.constant 0 : index
    %c0_10 = arith.constant 0 : index
    %7 = vector.load %arg2[%c0_9, %c0_10] : memref<1x512xf32, #tpu.memory_space<vmem>>, vector<1x512xf32>
    %8 = vector.broadcast %7 : vector<1x512xf32> to vector<8x512xf32>
    %9 = arith.addf %6, %8 : vector<8x512xf32>
    %10 = vector.extract_strided_slice %9 {offsets = [0, 0], sizes = [8, 128], strides = [1, 1]} : vector<8x512xf32> to vector<8x128xf32>
    %11 = arith.negf %10 : vector<8x128xf32>
    %12 = math.exp %11 : vector<8x128xf32>
    %cst_11 = arith.constant 1.000000e+00 : f32
    %13 = vector.broadcast %cst_11 : f32 to vector<8x128xf32>
    %14 = arith.addf %13, %12 : vector<8x128xf32>
    %15 = arith.divf %13, %14 : vector<8x128xf32>
    %16 = vector.extract_strided_slice %9 {offsets = [0, 128], sizes = [8, 128], strides = [1, 1]} : vector<8x512xf32> to vector<8x128xf32>
    %17 = arith.negf %16 : vector<8x128xf32>
    %18 = math.exp %17 : vector<8x128xf32>
    %cst_12 = arith.constant 1.000000e+00 : f32
    %19 = vector.broadcast %cst_12 : f32 to vector<8x128xf32>
    %20 = arith.addf %19, %18 : vector<8x128xf32>
    %21 = arith.divf %19, %20 : vector<8x128xf32>
    %22 = vector.extract_strided_slice %9 {offsets = [0, 256], sizes = [8, 128], strides = [1, 1]} : vector<8x512xf32> to vector<8x128xf32>
    %23 = vector.extract_strided_slice %9 {offsets = [0, 384], sizes = [8, 128], strides = [1, 1]} : vector<8x512xf32> to vector<8x128xf32>
    %24 = arith.mulf %15, %23 : vector<8x128xf32>
    %25 = arith.addf %22, %24 : vector<8x128xf32>
    %26 = math.tanh %25 : vector<8x128xf32>
    %27 = vector.extract_strided_slice %4 {offsets = [0, 128], sizes = [8, 128], strides = [1, 1]} : vector<8x256xf32> to vector<8x128xf32>
    %cst_13 = arith.constant 1.000000e+00 : f32
    %28 = vector.broadcast %cst_13 : f32 to vector<8x128xf32>
    %29 = arith.subf %28, %21 : vector<8x128xf32>
    %30 = arith.mulf %29, %26 : vector<8x128xf32>
    %31 = arith.mulf %21, %27 : vector<8x128xf32>
    %32 = arith.addf %30, %31 : vector<8x128xf32>
    %c0_14 = arith.constant 0 : index
    %c0_15 = arith.constant 0 : index
    %33 = vector.load %arg3[%c0_14, %c0_15] : memref<128x128xf32, #tpu.memory_space<vmem>>, vector<128x128xf32>
    %cst_16 = arith.constant dense<0.000000e+00> : vector<8x128xf32>
    %34 = tpu.matmul %32, %33, %cst_16 {dimension_numbers = #tpu.dot_dimension_numbers<[1], [0], [0], [1], [0, 0, 1, 1], [], []>} : vector<8x128xf32>, vector<128x128xf32>, vector<8x128xf32> -> vector<8x128xf32>
    %c0_17 = arith.constant 0 : index
    %c0_18 = arith.constant 0 : index
    %35 = vector.load %arg4[%c0_17, %c0_18] : memref<1x128xf32, #tpu.memory_space<vmem>>, vector<1x128xf32>
    %36 = vector.broadcast %35 : vector<1x128xf32> to vector<8x128xf32>
    %37 = arith.addf %34, %36 : vector<8x128xf32>
    %c0_19 = arith.constant 0 : index
    %c0_20 = arith.constant 0 : index
    %38 = vector.load %arg6[%c0_19, %c0_20] : memref<8x256xf32, #tpu.memory_space<vmem>>, vector<8x128xf32>
    tpu.vector_store %arg6[%c0_19, %c0_20], %37 {strides = array<i32>} : memref<8x256xf32, #tpu.memory_space<vmem>>, vector<8x128xf32>,
    %c0_21 = arith.constant 0 : index
    %c128_22 = arith.constant 128 : index
    %39 = vector.load %arg6[%c0_21, %c128_22] : memref<8x256xf32, #tpu.memory_space<vmem>>, vector<8x128xf32>
    tpu.vector_store %arg6[%c0_21, %c128_22], %32 {strides = array<i32>} : memref<8x256xf32, #tpu.memory_space<vmem>>, vector<8x128xf32>,
    %c7_i32 = arith.constant 7 : i32
    %40 = arith.subi %c7_i32, %c0_i32 : i32
    %41 = arith.index_cast %40 : i32 to index
    %c0_23 = arith.constant 0 : index
    %c0_24 = arith.constant 0 : index
    %42 = vector.load %arg5[%41, %c0_23, %c0_24] : memref<8x8x128xf32, #tpu.memory_space<vmem>>, vector<1x8x128xf32>
    %43 = vector.shape_cast %42 : vector<1x8x128xf32> to vector<8x128xf32>
    %44 = vector.shape_cast %37 : vector<8x128xf32> to vector<1x8x128xf32>
    tpu.vector_store %arg5[%41, %c0_23, %c0_24], %44 {strides = array<i32>} : memref<8x8x128xf32, #tpu.memory_space<vmem>>, vector<1x8x128xf32>,
    %c1_i32 = arith.constant 1 : i32
    %c0_25 = arith.constant 0 : index
    %c0_26 = arith.constant 0 : index
    %45 = vector.load %arg6[%c0_25, %c0_26] : memref<8x256xf32, #tpu.memory_space<vmem>>, vector<8x256xf32>
    %c0_27 = arith.constant 0 : index
    %c0_28 = arith.constant 0 : index
    %46 = vector.load %arg1[%c0_27, %c0_28] : memref<256x512xf32, #tpu.memory_space<vmem>>, vector<256x512xf32>
    %cst_29 = arith.constant dense<0.000000e+00> : vector<8x512xf32>
    %47 = tpu.matmul %45, %46, %cst_29 {dimension_numbers = #tpu.dot_dimension_numbers<[1], [0], [0], [1], [0, 0, 1, 1], [], []>} : vector<8x256xf32>, vector<256x512xf32>, vector<8x512xf32> -> vector<8x512xf32>
    %c0_30 = arith.constant 0 : index
    %c0_31 = arith.constant 0 : index
    %48 = vector.load %arg2[%c0_30, %c0_31] : memref<1x512xf32, #tpu.memory_space<vmem>>, vector<1x512xf32>
    %49 = vector.broadcast %48 : vector<1x512xf32> to vector<8x512xf32>
    %50 = arith.addf %47, %49 : vector<8x512xf32>
    %51 = vector.extract_strided_slice %50 {offsets = [0, 0], sizes = [8, 128], strides = [1, 1]} : vector<8x512xf32> to vector<8x128xf32>
    %52 = arith.negf %51 : vector<8x128xf32>
    %53 = math.exp %52 : vector<8x128xf32>
    %cst_32 = arith.constant 1.000000e+00 : f32
    %54 = vector.broadcast %cst_32 : f32 to vector<8x128xf32>
    %55 = arith.addf %54, %53 : vector<8x128xf32>
    %56 = arith.divf %54, %55 : vector<8x128xf32>
    %57 = vector.extract_strided_slice %50 {offsets = [0, 128], sizes = [8, 128], strides = [1, 1]} : vector<8x512xf32> to vector<8x128xf32>
    %58 = arith.negf %57 : vector<8x128xf32>
    %59 = math.exp %58 : vector<8x128xf32>
    %cst_33 = arith.constant 1.000000e+00 : f32
    %60 = vector.broadcast %cst_33 : f32 to vector<8x128xf32>
    %61 = arith.addf %60, %59 : vector<8x128xf32>
    %62 = arith.divf %60, %61 : vector<8x128xf32>
    %63 = vector.extract_strided_slice %50 {offsets = [0, 256], sizes = [8, 128], strides = [1, 1]} : vector<8x512xf32> to vector<8x128xf32>
    %64 = vector.extract_strided_slice %50 {offsets = [0, 384], sizes = [8, 128], strides = [1, 1]} : vector<8x512xf32> to vector<8x128xf32>
    %65 = arith.mulf %56, %64 : vector<8x128xf32>
    %66 = arith.addf %63, %65 : vector<8x128xf32>
    %67 = math.tanh %66 : vector<8x128xf32>
    %68 = vector.extract_strided_slice %45 {offsets = [0, 128], sizes = [8, 128], strides = [1, 1]} : vector<8x256xf32> to vector<8x128xf32>
    %cst_34 = arith.constant 1.000000e+00 : f32
    %69 = vector.broadcast %cst_34 : f32 to vector<8x128xf32>
    %70 = arith.subf %69, %62 : vector<8x128xf32>
    %71 = arith.mulf %70, %67 : vector<8x128xf32>
    %72 = arith.mulf %62, %68 : vector<8x128xf32>
    %73 = arith.addf %71, %72 : vector<8x128xf32>
    %c0_35 = arith.constant 0 : index
    %c0_36 = arith.constant 0 : index
    %74 = vector.load %arg3[%c0_35, %c0_36] : memref<128x128xf32, #tpu.memory_space<vmem>>, vector<128x128xf32>
    %cst_37 = arith.constant dense<0.000000e+00> : vector<8x128xf32>
    %75 = tpu.matmul %73, %74, %cst_37 {dimension_numbers = #tpu.dot_dimension_numbers<[1], [0], [0], [1], [0, 0, 1, 1], [], []>} : vector<8x128xf32>, vector<128x128xf32>, vector<8x128xf32> -> vector<8x128xf32>
    %c0_38 = arith.constant 0 : index
    %c0_39 = arith.constant 0 : index
    %76 = vector.load %arg4[%c0_38, %c0_39] : memref<1x128xf32, #tpu.memory_space<vmem>>, vector<1x128xf32>
    %77 = vector.broadcast %76 : vector<1x128xf32> to vector<8x128xf32>
    %78 = arith.addf %75, %77 : vector<8x128xf32>
    %c0_40 = arith.constant 0 : index
    %c0_41 = arith.constant 0 : index
    %79 = vector.load %arg6[%c0_40, %c0_41] : memref<8x256xf32, #tpu.memory_space<vmem>>, vector<8x128xf32>
    tpu.vector_store %arg6[%c0_40, %c0_41], %78 {strides = array<i32>} : memref<8x256xf32, #tpu.memory_space<vmem>>, vector<8x128xf32>,
    %c0_42 = arith.constant 0 : index
    %c128_43 = arith.constant 128 : index
    %80 = vector.load %arg6[%c0_42, %c128_43] : memref<8x256xf32, #tpu.memory_space<vmem>>, vector<8x128xf32>
    tpu.vector_store %arg6[%c0_42, %c128_43], %73 {strides = array<i32>} : memref<8x256xf32, #tpu.memory_space<vmem>>, vector<8x128xf32>,
    %c7_i32_44 = arith.constant 7 : i32
    %81 = arith.subi %c7_i32_44, %c1_i32 : i32
    %82 = arith.index_cast %81 : i32 to index
    %c0_45 = arith.constant 0 : index
    %c0_46 = arith.constant 0 : index
    %83 = vector.load %arg5[%82, %c0_45, %c0_46] : memref<8x8x128xf32, #tpu.memory_space<vmem>>, vector<1x8x128xf32>
    %84 = vector.shape_cast %83 : vector<1x8x128xf32> to vector<8x128xf32>
    %85 = vector.shape_cast %78 : vector<8x128xf32> to vector<1x8x128xf32>
    tpu.vector_store %arg5[%82, %c0_45, %c0_46], %85 {strides = array<i32>} : memref<8x8x128xf32, #tpu.memory_space<vmem>>, vector<1x8x128xf32>,
    %c2_i32 = arith.constant 2 : i32
    %c0_47 = arith.constant 0 : index
    %c0_48 = arith.constant 0 : index
    %86 = vector.load %arg6[%c0_47, %c0_48] : memref<8x256xf32, #tpu.memory_space<vmem>>, vector<8x256xf32>
    %c0_49 = arith.constant 0 : index
    %c0_50 = arith.constant 0 : index
    %87 = vector.load %arg1[%c0_49, %c0_50] : memref<256x512xf32, #tpu.memory_space<vmem>>, vector<256x512xf32>
    %cst_51 = arith.constant dense<0.000000e+00> : vector<8x512xf32>
    %88 = tpu.matmul %86, %87, %cst_51 {dimension_numbers = #tpu.dot_dimension_numbers<[1], [0], [0], [1], [0, 0, 1, 1], [], []>} : vector<8x256xf32>, vector<256x512xf32>, vector<8x512xf32> -> vector<8x512xf32>
    %c0_52 = arith.constant 0 : index
    %c0_53 = arith.constant 0 : index
    %89 = vector.load %arg2[%c0_52, %c0_53] : memref<1x512xf32, #tpu.memory_space<vmem>>, vector<1x512xf32>
    %90 = vector.broadcast %89 : vector<1x512xf32> to vector<8x512xf32>
    %91 = arith.addf %88, %90 : vector<8x512xf32>
    %92 = vector.extract_strided_slice %91 {offsets = [0, 0], sizes = [8, 128], strides = [1, 1]} : vector<8x512xf32> to vector<8x128xf32>
    %93 = arith.negf %92 : vector<8x128xf32>
    %94 = math.exp %93 : vector<8x128xf32>
    %cst_54 = arith.constant 1.000000e+00 : f32
    %95 = vector.broadcast %cst_54 : f32 to vector<8x128xf32>
    %96 = arith.addf %95, %94 : vector<8x128xf32>
    %97 = arith.divf %95, %96 : vector<8x128xf32>
    %98 = vector.extract_strided_slice %91 {offsets = [0, 128], sizes = [8, 128], strides = [1, 1]} : vector<8x512xf32> to vector<8x128xf32>
    %99 = arith.negf %98 : vector<8x128xf32>
    %100 = math.exp %99 : vector<8x128xf32>
    %cst_55 = arith.constant 1.000000e+00 : f32
    %101 = vector.broadcast %cst_55 : f32 to vector<8x128xf32>
    %102 = arith.addf %101, %100 : vector<8x128xf32>
    %103 = arith.divf %101, %102 : vector<8x128xf32>
    %104 = vector.extract_strided_slice %91 {offsets = [0, 256], sizes = [8, 128], strides = [1, 1]} : vector<8x512xf32> to vector<8x128xf32>
    %105 = vector.extract_strided_slice %91 {offsets = [0, 384], sizes = [8, 128], strides = [1, 1]} : vector<8x512xf32> to vector<8x128xf32>
    %106 = arith.mulf %97, %105 : vector<8x128xf32>
    %107 = arith.addf %104, %106 : vector<8x128xf32>
    %108 = math.tanh %107 : vector<8x128xf32>
    %109 = vector.extract_strided_slice %86 {offsets = [0, 128], sizes = [8, 128], strides = [1, 1]} : vector<8x256xf32> to vector<8x128xf32>
    %cst_56 = arith.constant 1.000000e+00 : f32
    %110 = vector.broadcast %cst_56 : f32 to vector<8x128xf32>
    %111 = arith.subf %110, %103 : vector<8x128xf32>
    %112 = arith.mulf %111, %108 : vector<8x128xf32>
    %113 = arith.mulf %103, %109 : vector<8x128xf32>
    %114 = arith.addf %112, %113 : vector<8x128xf32>
    %c0_57 = arith.constant 0 : index
    %c0_58 = arith.constant 0 : index
    %115 = vector.load %arg3[%c0_57, %c0_58] : memref<128x128xf32, #tpu.memory_space<vmem>>, vector<128x128xf32>
    %cst_59 = arith.constant dense<0.000000e+00> : vector<8x128xf32>
    %116 = tpu.matmul %114, %115, %cst_59 {dimension_numbers = #tpu.dot_dimension_numbers<[1], [0], [0], [1], [0, 0, 1, 1], [], []>} : vector<8x128xf32>, vector<128x128xf32>, vector<8x128xf32> -> vector<8x128xf32>
    %c0_60 = arith.constant 0 : index
    %c0_61 = arith.constant 0 : index
    %117 = vector.load %arg4[%c0_60, %c0_61] : memref<1x128xf32, #tpu.memory_space<vmem>>, vector<1x128xf32>
    %118 = vector.broadcast %117 : vector<1x128xf32> to vector<8x128xf32>
    %119 = arith.addf %116, %118 : vector<8x128xf32>
    %c0_62 = arith.constant 0 : index
    %c0_63 = arith.constant 0 : index
    %120 = vector.load %arg6[%c0_62, %c0_63] : memref<8x256xf32, #tpu.memory_space<vmem>>, vector<8x128xf32>
    tpu.vector_store %arg6[%c0_62, %c0_63], %119 {strides = array<i32>} : memref<8x256xf32, #tpu.memory_space<vmem>>, vector<8x128xf32>,
    %c0_64 = arith.constant 0 : index
    %c128_65 = arith.constant 128 : index
    %121 = vector.load %arg6[%c0_64, %c128_65] : memref<8x256xf32, #tpu.memory_space<vmem>>, vector<8x128xf32>
    tpu.vector_store %arg6[%c0_64, %c128_65], %114 {strides = array<i32>} : memref<8x256xf32, #tpu.memory_space<vmem>>, vector<8x128xf32>,
    %c7_i32_66 = arith.constant 7 : i32
    %122 = arith.subi %c7_i32_66, %c2_i32 : i32
    %123 = arith.index_cast %122 : i32 to index
    %c0_67 = arith.constant 0 : index
    %c0_68 = arith.constant 0 : index
    %124 = vector.load %arg5[%123, %c0_67, %c0_68] : memref<8x8x128xf32, #tpu.memory_space<vmem>>, vector<1x8x128xf32>
    %125 = vector.shape_cast %124 : vector<1x8x128xf32> to vector<8x128xf32>
    %126 = vector.shape_cast %119 : vector<8x128xf32> to vector<1x8x128xf32>
    tpu.vector_store %arg5[%123, %c0_67, %c0_68], %126 {strides = array<i32>} : memref<8x8x128xf32, #tpu.memory_space<vmem>>, vector<1x8x128xf32>,
    %c3_i32 = arith.constant 3 : i32
    %c0_69 = arith.constant 0 : index
    %c0_70 = arith.constant 0 : index
    %127 = vector.load %arg6[%c0_69, %c0_70] : memref<8x256xf32, #tpu.memory_space<vmem>>, vector<8x256xf32>
    %c0_71 = arith.constant 0 : index
    %c0_72 = arith.constant 0 : index
    %128 = vector.load %arg1[%c0_71, %c0_72] : memref<256x512xf32, #tpu.memory_space<vmem>>, vector<256x512xf32>
    %cst_73 = arith.constant dense<0.000000e+00> : vector<8x512xf32>
    %129 = tpu.matmul %127, %128, %cst_73 {dimension_numbers = #tpu.dot_dimension_numbers<[1], [0], [0], [1], [0, 0, 1, 1], [], []>} : vector<8x256xf32>, vector<256x512xf32>, vector<8x512xf32> -> vector<8x512xf32>
    %c0_74 = arith.constant 0 : index
    %c0_75 = arith.constant 0 : index
    %130 = vector.load %arg2[%c0_74, %c0_75] : memref<1x512xf32, #tpu.memory_space<vmem>>, vector<1x512xf32>
    %131 = vector.broadcast %130 : vector<1x512xf32> to vector<8x512xf32>
    %132 = arith.addf %129, %131 : vector<8x512xf32>
    %133 = vector.extract_strided_slice %132 {offsets = [0, 0], sizes = [8, 128], strides = [1, 1]} : vector<8x512xf32> to vector<8x128xf32>
    %134 = arith.negf %133 : vector<8x128xf32>
    %135 = math.exp %134 : vector<8x128xf32>
    %cst_76 = arith.constant 1.000000e+00 : f32
    %136 = vector.broadcast %cst_76 : f32 to vector<8x128xf32>
    %137 = arith.addf %136, %135 : vector<8x128xf32>
    %138 = arith.divf %136, %137 : vector<8x128xf32>
    %139 = vector.extract_strided_slice %132 {offsets = [0, 128], sizes = [8, 128], strides = [1, 1]} : vector<8x512xf32> to vector<8x128xf32>
    %140 = arith.negf %139 : vector<8x128xf32>
    %141 = math.exp %140 : vector<8x128xf32>
    %cst_77 = arith.constant 1.000000e+00 : f32
    %142 = vector.broadcast %cst_77 : f32 to vector<8x128xf32>
    %143 = arith.addf %142, %141 : vector<8x128xf32>
    %144 = arith.divf %142, %143 : vector<8x128xf32>
    %145 = vector.extract_strided_slice %132 {offsets = [0, 256], sizes = [8, 128], strides = [1, 1]} : vector<8x512xf32> to vector<8x128xf32>
    %146 = vector.extract_strided_slice %132 {offsets = [0, 384], sizes = [8, 128], strides = [1, 1]} : vector<8x512xf32> to vector<8x128xf32>
    %147 = arith.mulf %138, %146 : vector<8x128xf32>
    %148 = arith.addf %145, %147 : vector<8x128xf32>
    %149 = math.tanh %148 : vector<8x128xf32>
    %150 = vector.extract_strided_slice %127 {offsets = [0, 128], sizes = [8, 128], strides = [1, 1]} : vector<8x256xf32> to vector<8x128xf32>
    %cst_78 = arith.constant 1.000000e+00 : f32
    %151 = vector.broadcast %cst_78 : f32 to vector<8x128xf32>
    %152 = arith.subf %151, %144 : vector<8x128xf32>
    %153 = arith.mulf %152, %149 : vector<8x128xf32>
    %154 = arith.mulf %144, %150 : vector<8x128xf32>
    %155 = arith.addf %153, %154 : vector<8x128xf32>
    %c0_79 = arith.constant 0 : index
    %c0_80 = arith.constant 0 : index
    %156 = vector.load %arg3[%c0_79, %c0_80] : memref<128x128xf32, #tpu.memory_space<vmem>>, vector<128x128xf32>
    %cst_81 = arith.constant dense<0.000000e+00> : vector<8x128xf32>
    %157 = tpu.matmul %155, %156, %cst_81 {dimension_numbers = #tpu.dot_dimension_numbers<[1], [0], [0], [1], [0, 0, 1, 1], [], []>} : vector<8x128xf32>, vector<128x128xf32>, vector<8x128xf32> -> vector<8x128xf32>
    %c0_82 = arith.constant 0 : index
    %c0_83 = arith.constant 0 : index
    %158 = vector.load %arg4[%c0_82, %c0_83] : memref<1x128xf32, #tpu.memory_space<vmem>>, vector<1x128xf32>
    %159 = vector.broadcast %158 : vector<1x128xf32> to vector<8x128xf32>
    %160 = arith.addf %157, %159 : vector<8x128xf32>
    %c0_84 = arith.constant 0 : index
    %c0_85 = arith.constant 0 : index
    %161 = vector.load %arg6[%c0_84, %c0_85] : memref<8x256xf32, #tpu.memory_space<vmem>>, vector<8x128xf32>
    tpu.vector_store %arg6[%c0_84, %c0_85], %160 {strides = array<i32>} : memref<8x256xf32, #tpu.memory_space<vmem>>, vector<8x128xf32>,
    %c0_86 = arith.constant 0 : index
    %c128_87 = arith.constant 128 : index
    %162 = vector.load %arg6[%c0_86, %c128_87] : memref<8x256xf32, #tpu.memory_space<vmem>>, vector<8x128xf32>
    tpu.vector_store %arg6[%c0_86, %c128_87], %155 {strides = array<i32>} : memref<8x256xf32, #tpu.memory_space<vmem>>, vector<8x128xf32>,
    %c7_i32_88 = arith.constant 7 : i32
    %163 = arith.subi %c7_i32_88, %c3_i32 : i32
    %164 = arith.index_cast %163 : i32 to index
    %c0_89 = arith.constant 0 : index
    %c0_90 = arith.constant 0 : index
    %165 = vector.load %arg5[%164, %c0_89, %c0_90] : memref<8x8x128xf32, #tpu.memory_space<vmem>>, vector<1x8x128xf32>
    %166 = vector.shape_cast %165 : vector<1x8x128xf32> to vector<8x128xf32>
    %167 = vector.shape_cast %160 : vector<8x128xf32> to vector<1x8x128xf32>
    tpu.vector_store %arg5[%164, %c0_89, %c0_90], %167 {strides = array<i32>} : memref<8x8x128xf32, #tpu.memory_space<vmem>>, vector<1x8x128xf32>,
    %c4_i32 = arith.constant 4 : i32
    %c0_91 = arith.constant 0 : index
    %c0_92 = arith.constant 0 : index
    %168 = vector.load %arg6[%c0_91, %c0_92] : memref<8x256xf32, #tpu.memory_space<vmem>>, vector<8x256xf32>
    %c0_93 = arith.constant 0 : index
    %c0_94 = arith.constant 0 : index
    %169 = vector.load %arg1[%c0_93, %c0_94] : memref<256x512xf32, #tpu.memory_space<vmem>>, vector<256x512xf32>
    %cst_95 = arith.constant dense<0.000000e+00> : vector<8x512xf32>
    %170 = tpu.matmul %168, %169, %cst_95 {dimension_numbers = #tpu.dot_dimension_numbers<[1], [0], [0], [1], [0, 0, 1, 1], [], []>} : vector<8x256xf32>, vector<256x512xf32>, vector<8x512xf32> -> vector<8x512xf32>
    %c0_96 = arith.constant 0 : index
    %c0_97 = arith.constant 0 : index
    %171 = vector.load %arg2[%c0_96, %c0_97] : memref<1x512xf32, #tpu.memory_space<vmem>>, vector<1x512xf32>
    %172 = vector.broadcast %171 : vector<1x512xf32> to vector<8x512xf32>
    %173 = arith.addf %170, %172 : vector<8x512xf32>
    %174 = vector.extract_strided_slice %173 {offsets = [0, 0], sizes = [8, 128], strides = [1, 1]} : vector<8x512xf32> to vector<8x128xf32>
    %175 = arith.negf %174 : vector<8x128xf32>
    %176 = math.exp %175 : vector<8x128xf32>
    %cst_98 = arith.constant 1.000000e+00 : f32
    %177 = vector.broadcast %cst_98 : f32 to vector<8x128xf32>
    %178 = arith.addf %177, %176 : vector<8x128xf32>
    %179 = arith.divf %177, %178 : vector<8x128xf32>
    %180 = vector.extract_strided_slice %173 {offsets = [0, 128], sizes = [8, 128], strides = [1, 1]} : vector<8x512xf32> to vector<8x128xf32>
    %181 = arith.negf %180 : vector<8x128xf32>
    %182 = math.exp %181 : vector<8x128xf32>
    %cst_99 = arith.constant 1.000000e+00 : f32
    %183 = vector.broadcast %cst_99 : f32 to vector<8x128xf32>
    %184 = arith.addf %183, %182 : vector<8x128xf32>
    %185 = arith.divf %183, %184 : vector<8x128xf32>
    %186 = vector.extract_strided_slice %173 {offsets = [0, 256], sizes = [8, 128], strides = [1, 1]} : vector<8x512xf32> to vector<8x128xf32>
    %187 = vector.extract_strided_slice %173 {offsets = [0, 384], sizes = [8, 128], strides = [1, 1]} : vector<8x512xf32> to vector<8x128xf32>
    %188 = arith.mulf %179, %187 : vector<8x128xf32>
    %189 = arith.addf %186, %188 : vector<8x128xf32>
    %190 = math.tanh %189 : vector<8x128xf32>
    %191 = vector.extract_strided_slice %168 {offsets = [0, 128], sizes = [8, 128], strides = [1, 1]} : vector<8x256xf32> to vector<8x128xf32>
    %cst_100 = arith.constant 1.000000e+00 : f32
    %192 = vector.broadcast %cst_100 : f32 to vector<8x128xf32>
    %193 = arith.subf %192, %185 : vector<8x128xf32>
    %194 = arith.mulf %193, %190 : vector<8x128xf32>
    %195 = arith.mulf %185, %191 : vector<8x128xf32>
    %196 = arith.addf %194, %195 : vector<8x128xf32>
    %c0_101 = arith.constant 0 : index
    %c0_102 = arith.constant 0 : index
    %197 = vector.load %arg3[%c0_101, %c0_102] : memref<128x128xf32, #tpu.memory_space<vmem>>, vector<128x128xf32>
    %cst_103 = arith.constant dense<0.000000e+00> : vector<8x128xf32>
    %198 = tpu.matmul %196, %197, %cst_103 {dimension_numbers = #tpu.dot_dimension_numbers<[1], [0], [0], [1], [0, 0, 1, 1], [], []>} : vector<8x128xf32>, vector<128x128xf32>, vector<8x128xf32> -> vector<8x128xf32>
    %c0_104 = arith.constant 0 : index
    %c0_105 = arith.constant 0 : index
    %199 = vector.load %arg4[%c0_104, %c0_105] : memref<1x128xf32, #tpu.memory_space<vmem>>, vector<1x128xf32>
    %200 = vector.broadcast %199 : vector<1x128xf32> to vector<8x128xf32>
    %201 = arith.addf %198, %200 : vector<8x128xf32>
    %c0_106 = arith.constant 0 : index
    %c0_107 = arith.constant 0 : index
    %202 = vector.load %arg6[%c0_106, %c0_107] : memref<8x256xf32, #tpu.memory_space<vmem>>, vector<8x128xf32>
    tpu.vector_store %arg6[%c0_106, %c0_107], %201 {strides = array<i32>} : memref<8x256xf32, #tpu.memory_space<vmem>>, vector<8x128xf32>,
    %c0_108 = arith.constant 0 : index
    %c128_109 = arith.constant 128 : index
    %203 = vector.load %arg6[%c0_108, %c128_109] : memref<8x256xf32, #tpu.memory_space<vmem>>, vector<8x128xf32>
    tpu.vector_store %arg6[%c0_108, %c128_109], %196 {strides = array<i32>} : memref<8x256xf32, #tpu.memory_space<vmem>>, vector<8x128xf32>,
    %c7_i32_110 = arith.constant 7 : i32
    %204 = arith.subi %c7_i32_110, %c4_i32 : i32
    %205 = arith.index_cast %204 : i32 to index
    %c0_111 = arith.constant 0 : index
    %c0_112 = arith.constant 0 : index
    %206 = vector.load %arg5[%205, %c0_111, %c0_112] : memref<8x8x128xf32, #tpu.memory_space<vmem>>, vector<1x8x128xf32>
    %207 = vector.shape_cast %206 : vector<1x8x128xf32> to vector<8x128xf32>
    %208 = vector.shape_cast %201 : vector<8x128xf32> to vector<1x8x128xf32>
    tpu.vector_store %arg5[%205, %c0_111, %c0_112], %208 {strides = array<i32>} : memref<8x8x128xf32, #tpu.memory_space<vmem>>, vector<1x8x128xf32>,
    %c5_i32 = arith.constant 5 : i32
    %c0_113 = arith.constant 0 : index
    %c0_114 = arith.constant 0 : index
    %209 = vector.load %arg6[%c0_113, %c0_114] : memref<8x256xf32, #tpu.memory_space<vmem>>, vector<8x256xf32>
    %c0_115 = arith.constant 0 : index
    %c0_116 = arith.constant 0 : index
    %210 = vector.load %arg1[%c0_115, %c0_116] : memref<256x512xf32, #tpu.memory_space<vmem>>, vector<256x512xf32>
    %cst_117 = arith.constant dense<0.000000e+00> : vector<8x512xf32>
    %211 = tpu.matmul %209, %210, %cst_117 {dimension_numbers = #tpu.dot_dimension_numbers<[1], [0], [0], [1], [0, 0, 1, 1], [], []>} : vector<8x256xf32>, vector<256x512xf32>, vector<8x512xf32> -> vector<8x512xf32>
    %c0_118 = arith.constant 0 : index
    %c0_119 = arith.constant 0 : index
    %212 = vector.load %arg2[%c0_118, %c0_119] : memref<1x512xf32, #tpu.memory_space<vmem>>, vector<1x512xf32>
    %213 = vector.broadcast %212 : vector<1x512xf32> to vector<8x512xf32>
    %214 = arith.addf %211, %213 : vector<8x512xf32>
    %215 = vector.extract_strided_slice %214 {offsets = [0, 0], sizes = [8, 128], strides = [1, 1]} : vector<8x512xf32> to vector<8x128xf32>
    %216 = arith.negf %215 : vector<8x128xf32>
    %217 = math.exp %216 : vector<8x128xf32>
    %cst_120 = arith.constant 1.000000e+00 : f32
    %218 = vector.broadcast %cst_120 : f32 to vector<8x128xf32>
    %219 = arith.addf %218, %217 : vector<8x128xf32>
    %220 = arith.divf %218, %219 : vector<8x128xf32>
    %221 = vector.extract_strided_slice %214 {offsets = [0, 128], sizes = [8, 128], strides = [1, 1]} : vector<8x512xf32> to vector<8x128xf32>
    %222 = arith.negf %221 : vector<8x128xf32>
    %223 = math.exp %222 : vector<8x128xf32>
    %cst_121 = arith.constant 1.000000e+00 : f32
    %224 = vector.broadcast %cst_121 : f32 to vector<8x128xf32>
    %225 = arith.addf %224, %223 : vector<8x128xf32>
    %226 = arith.divf %224, %225 : vector<8x128xf32>
    %227 = vector.extract_strided_slice %214 {offsets = [0, 256], sizes = [8, 128], strides = [1, 1]} : vector<8x512xf32> to vector<8x128xf32>
    %228 = vector.extract_strided_slice %214 {offsets = [0, 384], sizes = [8, 128], strides = [1, 1]} : vector<8x512xf32> to vector<8x128xf32>
    %229 = arith.mulf %220, %228 : vector<8x128xf32>
    %230 = arith.addf %227, %229 : vector<8x128xf32>
    %231 = math.tanh %230 : vector<8x128xf32>
    %232 = vector.extract_strided_slice %209 {offsets = [0, 128], sizes = [8, 128], strides = [1, 1]} : vector<8x256xf32> to vector<8x128xf32>
    %cst_122 = arith.constant 1.000000e+00 : f32
    %233 = vector.broadcast %cst_122 : f32 to vector<8x128xf32>
    %234 = arith.subf %233, %226 : vector<8x128xf32>
    %235 = arith.mulf %234, %231 : vector<8x128xf32>
    %236 = arith.mulf %226, %232 : vector<8x128xf32>
    %237 = arith.addf %235, %236 : vector<8x128xf32>
    %c0_123 = arith.constant 0 : index
    %c0_124 = arith.constant 0 : index
    %238 = vector.load %arg3[%c0_123, %c0_124] : memref<128x128xf32, #tpu.memory_space<vmem>>, vector<128x128xf32>
    %cst_125 = arith.constant dense<0.000000e+00> : vector<8x128xf32>
    %239 = tpu.matmul %237, %238, %cst_125 {dimension_numbers = #tpu.dot_dimension_numbers<[1], [0], [0], [1], [0, 0, 1, 1], [], []>} : vector<8x128xf32>, vector<128x128xf32>, vector<8x128xf32> -> vector<8x128xf32>
    %c0_126 = arith.constant 0 : index
    %c0_127 = arith.constant 0 : index
    %240 = vector.load %arg4[%c0_126, %c0_127] : memref<1x128xf32, #tpu.memory_space<vmem>>, vector<1x128xf32>
    %241 = vector.broadcast %240 : vector<1x128xf32> to vector<8x128xf32>
    %242 = arith.addf %239, %241 : vector<8x128xf32>
    %c0_128 = arith.constant 0 : index
    %c0_129 = arith.constant 0 : index
    %243 = vector.load %arg6[%c0_128, %c0_129] : memref<8x256xf32, #tpu.memory_space<vmem>>, vector<8x128xf32>
    tpu.vector_store %arg6[%c0_128, %c0_129], %242 {strides = array<i32>} : memref<8x256xf32, #tpu.memory_space<vmem>>, vector<8x128xf32>,
    %c0_130 = arith.constant 0 : index
    %c128_131 = arith.constant 128 : index
    %244 = vector.load %arg6[%c0_130, %c128_131] : memref<8x256xf32, #tpu.memory_space<vmem>>, vector<8x128xf32>
    tpu.vector_store %arg6[%c0_130, %c128_131], %237 {strides = array<i32>} : memref<8x256xf32, #tpu.memory_space<vmem>>, vector<8x128xf32>,
    %c7_i32_132 = arith.constant 7 : i32
    %245 = arith.subi %c7_i32_132, %c5_i32 : i32
    %246 = arith.index_cast %245 : i32 to index
    %c0_133 = arith.constant 0 : index
    %c0_134 = arith.constant 0 : index
    %247 = vector.load %arg5[%246, %c0_133, %c0_134] : memref<8x8x128xf32, #tpu.memory_space<vmem>>, vector<1x8x128xf32>
    %248 = vector.shape_cast %247 : vector<1x8x128xf32> to vector<8x128xf32>
    %249 = vector.shape_cast %242 : vector<8x128xf32> to vector<1x8x128xf32>
    tpu.vector_store %arg5[%246, %c0_133, %c0_134], %249 {strides = array<i32>} : memref<8x8x128xf32, #tpu.memory_space<vmem>>, vector<1x8x128xf32>,
    %c6_i32 = arith.constant 6 : i32
    %c0_135 = arith.constant 0 : index
    %c0_136 = arith.constant 0 : index
    %250 = vector.load %arg6[%c0_135, %c0_136] : memref<8x256xf32, #tpu.memory_space<vmem>>, vector<8x256xf32>
    %c0_137 = arith.constant 0 : index
    %c0_138 = arith.constant 0 : index
    %251 = vector.load %arg1[%c0_137, %c0_138] : memref<256x512xf32, #tpu.memory_space<vmem>>, vector<256x512xf32>
    %cst_139 = arith.constant dense<0.000000e+00> : vector<8x512xf32>
    %252 = tpu.matmul %250, %251, %cst_139 {dimension_numbers = #tpu.dot_dimension_numbers<[1], [0], [0], [1], [0, 0, 1, 1], [], []>} : vector<8x256xf32>, vector<256x512xf32>, vector<8x512xf32> -> vector<8x512xf32>
    %c0_140 = arith.constant 0 : index
    %c0_141 = arith.constant 0 : index
    %253 = vector.load %arg2[%c0_140, %c0_141] : memref<1x512xf32, #tpu.memory_space<vmem>>, vector<1x512xf32>
    %254 = vector.broadcast %253 : vector<1x512xf32> to vector<8x512xf32>
    %255 = arith.addf %252, %254 : vector<8x512xf32>
    %256 = vector.extract_strided_slice %255 {offsets = [0, 0], sizes = [8, 128], strides = [1, 1]} : vector<8x512xf32> to vector<8x128xf32>
    %257 = arith.negf %256 : vector<8x128xf32>
    %258 = math.exp %257 : vector<8x128xf32>
    %cst_142 = arith.constant 1.000000e+00 : f32
    %259 = vector.broadcast %cst_142 : f32 to vector<8x128xf32>
    %260 = arith.addf %259, %258 : vector<8x128xf32>
    %261 = arith.divf %259, %260 : vector<8x128xf32>
    %262 = vector.extract_strided_slice %255 {offsets = [0, 128], sizes = [8, 128], strides = [1, 1]} : vector<8x512xf32> to vector<8x128xf32>
    %263 = arith.negf %262 : vector<8x128xf32>
    %264 = math.exp %263 : vector<8x128xf32>
    %cst_143 = arith.constant 1.000000e+00 : f32
    %265 = vector.broadcast %cst_143 : f32 to vector<8x128xf32>
    %266 = arith.addf %265, %264 : vector<8x128xf32>
    %267 = arith.divf %265, %266 : vector<8x128xf32>
    %268 = vector.extract_strided_slice %255 {offsets = [0, 256], sizes = [8, 128], strides = [1, 1]} : vector<8x512xf32> to vector<8x128xf32>
    %269 = vector.extract_strided_slice %255 {offsets = [0, 384], sizes = [8, 128], strides = [1, 1]} : vector<8x512xf32> to vector<8x128xf32>
    %270 = arith.mulf %261, %269 : vector<8x128xf32>
    %271 = arith.addf %268, %270 : vector<8x128xf32>
    %272 = math.tanh %271 : vector<8x128xf32>
    %273 = vector.extract_strided_slice %250 {offsets = [0, 128], sizes = [8, 128], strides = [1, 1]} : vector<8x256xf32> to vector<8x128xf32>
    %cst_144 = arith.constant 1.000000e+00 : f32
    %274 = vector.broadcast %cst_144 : f32 to vector<8x128xf32>
    %275 = arith.subf %274, %267 : vector<8x128xf32>
    %276 = arith.mulf %275, %272 : vector<8x128xf32>
    %277 = arith.mulf %267, %273 : vector<8x128xf32>
    %278 = arith.addf %276, %277 : vector<8x128xf32>
    %c0_145 = arith.constant 0 : index
    %c0_146 = arith.constant 0 : index
    %279 = vector.load %arg3[%c0_145, %c0_146] : memref<128x128xf32, #tpu.memory_space<vmem>>, vector<128x128xf32>
    %cst_147 = arith.constant dense<0.000000e+00> : vector<8x128xf32>
    %280 = tpu.matmul %278, %279, %cst_147 {dimension_numbers = #tpu.dot_dimension_numbers<[1], [0], [0], [1], [0, 0, 1, 1], [], []>} : vector<8x128xf32>, vector<128x128xf32>, vector<8x128xf32> -> vector<8x128xf32>
    %c0_148 = arith.constant 0 : index
    %c0_149 = arith.constant 0 : index
    %281 = vector.load %arg4[%c0_148, %c0_149] : memref<1x128xf32, #tpu.memory_space<vmem>>, vector<1x128xf32>
    %282 = vector.broadcast %281 : vector<1x128xf32> to vector<8x128xf32>
    %283 = arith.addf %280, %282 : vector<8x128xf32>
    %c0_150 = arith.constant 0 : index
    %c0_151 = arith.constant 0 : index
    %284 = vector.load %arg6[%c0_150, %c0_151] : memref<8x256xf32, #tpu.memory_space<vmem>>, vector<8x128xf32>
    tpu.vector_store %arg6[%c0_150, %c0_151], %283 {strides = array<i32>} : memref<8x256xf32, #tpu.memory_space<vmem>>, vector<8x128xf32>,
    %c0_152 = arith.constant 0 : index
    %c128_153 = arith.constant 128 : index
    %285 = vector.load %arg6[%c0_152, %c128_153] : memref<8x256xf32, #tpu.memory_space<vmem>>, vector<8x128xf32>
    tpu.vector_store %arg6[%c0_152, %c128_153], %278 {strides = array<i32>} : memref<8x256xf32, #tpu.memory_space<vmem>>, vector<8x128xf32>,
    %c7_i32_154 = arith.constant 7 : i32
    %286 = arith.subi %c7_i32_154, %c6_i32 : i32
    %287 = arith.index_cast %286 : i32 to index
    %c0_155 = arith.constant 0 : index
    %c0_156 = arith.constant 0 : index
    %288 = vector.load %arg5[%287, %c0_155, %c0_156] : memref<8x8x128xf32, #tpu.memory_space<vmem>>, vector<1x8x128xf32>
    %289 = vector.shape_cast %288 : vector<1x8x128xf32> to vector<8x128xf32>
    %290 = vector.shape_cast %283 : vector<8x128xf32> to vector<1x8x128xf32>
    tpu.vector_store %arg5[%287, %c0_155, %c0_156], %290 {strides = array<i32>} : memref<8x8x128xf32, #tpu.memory_space<vmem>>, vector<1x8x128xf32>,
    %c7_i32_157 = arith.constant 7 : i32
    %c0_158 = arith.constant 0 : index
    %c0_159 = arith.constant 0 : index
    %291 = vector.load %arg6[%c0_158, %c0_159] : memref<8x256xf32, #tpu.memory_space<vmem>>, vector<8x256xf32>
    %c0_160 = arith.constant 0 : index
    %c0_161 = arith.constant 0 : index
    %292 = vector.load %arg1[%c0_160, %c0_161] : memref<256x512xf32, #tpu.memory_space<vmem>>, vector<256x512xf32>
    %cst_162 = arith.constant dense<0.000000e+00> : vector<8x512xf32>
    %293 = tpu.matmul %291, %292, %cst_162 {dimension_numbers = #tpu.dot_dimension_numbers<[1], [0], [0], [1], [0, 0, 1, 1], [], []>} : vector<8x256xf32>, vector<256x512xf32>, vector<8x512xf32> -> vector<8x512xf32>
    %c0_163 = arith.constant 0 : index
    %c0_164 = arith.constant 0 : index
    %294 = vector.load %arg2[%c0_163, %c0_164] : memref<1x512xf32, #tpu.memory_space<vmem>>, vector<1x512xf32>
    %295 = vector.broadcast %294 : vector<1x512xf32> to vector<8x512xf32>
    %296 = arith.addf %293, %295 : vector<8x512xf32>
    %297 = vector.extract_strided_slice %296 {offsets = [0, 0], sizes = [8, 128], strides = [1, 1]} : vector<8x512xf32> to vector<8x128xf32>
    %298 = arith.negf %297 : vector<8x128xf32>
    %299 = math.exp %298 : vector<8x128xf32>
    %cst_165 = arith.constant 1.000000e+00 : f32
    %300 = vector.broadcast %cst_165 : f32 to vector<8x128xf32>
    %301 = arith.addf %300, %299 : vector<8x128xf32>
    %302 = arith.divf %300, %301 : vector<8x128xf32>
    %303 = vector.extract_strided_slice %296 {offsets = [0, 128], sizes = [8, 128], strides = [1, 1]} : vector<8x512xf32> to vector<8x128xf32>
    %304 = arith.negf %303 : vector<8x128xf32>
    %305 = math.exp %304 : vector<8x128xf32>
    %cst_166 = arith.constant 1.000000e+00 : f32
    %306 = vector.broadcast %cst_166 : f32 to vector<8x128xf32>
    %307 = arith.addf %306, %305 : vector<8x128xf32>
    %308 = arith.divf %306, %307 : vector<8x128xf32>
    %309 = vector.extract_strided_slice %296 {offsets = [0, 256], sizes = [8, 128], strides = [1, 1]} : vector<8x512xf32> to vector<8x128xf32>
    %310 = vector.extract_strided_slice %296 {offsets = [0, 384], sizes = [8, 128], strides = [1, 1]} : vector<8x512xf32> to vector<8x128xf32>
    %311 = arith.mulf %302, %310 : vector<8x128xf32>
    %312 = arith.addf %309, %311 : vector<8x128xf32>
    %313 = math.tanh %312 : vector<8x128xf32>
    %314 = vector.extract_strided_slice %291 {offsets = [0, 128], sizes = [8, 128], strides = [1, 1]} : vector<8x256xf32> to vector<8x128xf32>
    %cst_167 = arith.constant 1.000000e+00 : f32
    %315 = vector.broadcast %cst_167 : f32 to vector<8x128xf32>
    %316 = arith.subf %315, %308 : vector<8x128xf32>
    %317 = arith.mulf %316, %313 : vector<8x128xf32>
    %318 = arith.mulf %308, %314 : vector<8x128xf32>
    %319 = arith.addf %317, %318 : vector<8x128xf32>
    %c0_168 = arith.constant 0 : index
    %c0_169 = arith.constant 0 : index
    %320 = vector.load %arg3[%c0_168, %c0_169] : memref<128x128xf32, #tpu.memory_space<vmem>>, vector<128x128xf32>
    %cst_170 = arith.constant dense<0.000000e+00> : vector<8x128xf32>
    %321 = tpu.matmul %319, %320, %cst_170 {dimension_numbers = #tpu.dot_dimension_numbers<[1], [0], [0], [1], [0, 0, 1, 1], [], []>} : vector<8x128xf32>, vector<128x128xf32>, vector<8x128xf32> -> vector<8x128xf32>
    %c0_171 = arith.constant 0 : index
    %c0_172 = arith.constant 0 : index
    %322 = vector.load %arg4[%c0_171, %c0_172] : memref<1x128xf32, #tpu.memory_space<vmem>>, vector<1x128xf32>
    %323 = vector.broadcast %322 : vector<1x128xf32> to vector<8x128xf32>
    %324 = arith.addf %321, %323 : vector<8x128xf32>
    %c0_173 = arith.constant 0 : index
    %c0_174 = arith.constant 0 : index
    %325 = vector.load %arg6[%c0_173, %c0_174] : memref<8x256xf32, #tpu.memory_space<vmem>>, vector<8x128xf32>
    tpu.vector_store %arg6[%c0_173, %c0_174], %324 {strides = array<i32>} : memref<8x256xf32, #tpu.memory_space<vmem>>, vector<8x128xf32>,
    %c0_175 = arith.constant 0 : index
    %c128_176 = arith.constant 128 : index
    %326 = vector.load %arg6[%c0_175, %c128_176] : memref<8x256xf32, #tpu.memory_space<vmem>>, vector<8x128xf32>
    tpu.vector_store %arg6[%c0_175, %c128_176], %319 {strides = array<i32>} : memref<8x256xf32, #tpu.memory_space<vmem>>, vector<8x128xf32>,
    %c7_i32_177 = arith.constant 7 : i32
    %327 = arith.subi %c7_i32_177, %c7_i32_157 : i32
    %328 = arith.index_cast %327 : i32 to index
    %c0_178 = arith.constant 0 : index
    %c0_179 = arith.constant 0 : index
    %329 = vector.load %arg5[%328, %c0_178, %c0_179] : memref<8x8x128xf32, #tpu.memory_space<vmem>>, vector<1x8x128xf32>
    %330 = vector.shape_cast %329 : vector<1x8x128xf32> to vector<8x128xf32>
    %331 = vector.shape_cast %324 : vector<8x128xf32> to vector<1x8x128xf32>
    tpu.vector_store %arg5[%328, %c0_178, %c0_179], %331 {strides = array<i32>} : memref<8x8x128xf32, #tpu.memory_space<vmem>>, vector<1x8x128xf32>,
    %c8_i32 = arith.constant 8 : i32
    return
  }
}

</mosaic_0001>

<bundles_post_ra>
// kernel: tpu_custom_call.1
= control target key start
LH: loop header
LB: loop body
LE: loop exit
PB: predicated region body
PF: predicated region fallthrough
CT: control target
= control target key end

     0   :  { %10 = vsyncpa [#allocation4], 0  ;;  %s5374_s0 = inlined_call_operand.hbm [shape: f32[8,128], index: 0, kind: input, shape index: {}]   ;;  %s5375_s1 = inlined_call_operand.hbm [shape: f32[256,512], index: 1, kind: input, shape index: {}]   ;;  %s5376_s2 = inlined_call_operand.hbm [shape: f32[1,512], index: 2, kind: input, shape index: {}]   ;;  %s5377_s3 = inlined_call_operand.hbm [shape: f32[128,128], index: 3, kind: input, shape index: {}]   ;;  %s5378_s4 = inlined_call_operand.vmem [shape: f32[1,128], index: 4, kind: input, shape index: {}]   ;;  %s5379_s5 = inlined_call_operand.hbm [shape: f32[8,8,128], index: 5, kind: output, shape index: {}]  }
   0x1   :  { %11 = vsyncpa [#allocation7], 0 }
   0x2   :  { %12 = vsyncpa [#allocation10], 0  ;;  %s29_s20 = sshll.u32 %s5375_s1, 4  ;;  %s30_s20 = int_to_ptr.hbm [resolvable:$true] %s29_s20 }
   0x3   :  { %13 = vsyncpa [#allocation5], 0  ;;  %s3457_s21 = smov [#allocation6]   ;;  %s19_s25 = sshll.u32 %s5374_s0, 4  ;;  %s20_s25 = int_to_ptr.hbm [resolvable:$true] %s19_s25 }
   0x4   :  { %s31_s22 = sshll.u32 %s3457_s21, 4  ;;  %s3458_s26 = smov 512   ;;  %s32_s22 = int_to_ptr.vmem [resolvable:$true] %s31_s22 }
   0x5   :  { %s3459_s27 = smov 32   ;;  %s3460_s28 = smov [#allocation3]  }
   0x6   :  { %37 = dma.hbm_to_vmem [thread:$0]  %s30_s20, 16384, %s32_s22, [#allocation7], %s3458_s26, %s3458_s26, %s3459_s27  }
   0x7   :  { %s21_s29 = sshll.u32 %s3460_s28, 4  ;;  %s43_s7 = sshll.u32 %s5376_s2, 4  ;;  %s22_s29 = int_to_ptr.vmem [resolvable:$true] %s21_s29  ;;  %s44_s7 = int_to_ptr.hbm [resolvable:$true] %s43_s7 }
   0x8   :  { %24 = dma.hbm_to_vmem [thread:$0]  %s20_s25, 128, %s22_s29, [#allocation4]  }
   0x9   :  { %s53_s9 = sshll.u32 %s5377_s3, 4  ;;  %s3461_s10 = smov [#allocation8]   ;;  %s54_s9 = int_to_ptr.hbm [resolvable:$true] %s53_s9 }
   0xa   :  { %s45_s11 = sshll.u32 %s3461_s10, 4  ;;  %s3462_s0 = smov [#allocation9]   ;;  %s46_s11 = int_to_ptr.vmem [resolvable:$true] %s45_s11 }
   0xb   :  { %48 = dma.hbm_to_vmem [thread:$0]  %s44_s7, 64, %s46_s11, [#allocation7]  }
   0xc   :  { %s55_s12 = sshll.u32 %s3462_s0, 4  ;;  %s3463_s13 = smov 128   ;;  %s56_s12 = int_to_ptr.vmem [resolvable:$true] %s55_s12 }
   0xd   :  { %s3464_s14 = smov 8  }
   0xe   :  { %61 = dma.hbm_to_vmem [thread:$0]  %s54_s9, 2048, %s56_s12, [#allocation10], %s3463_s13, %s3463_s13, %s3464_s14  }
   0xf   :  { %3449 = dma.done.wait [#allocation4], 128  }
  0x10   :  { %3450 = vsyncadd [#allocation4], 4294967168 }
  0x11   :  { %3451 = dma.done.wait [#allocation7], 16448  }
  0x12   :  { %3452 = vsyncadd [#allocation7], 4294950848 }
  0x13   :  { %3453 = dma.done.wait [#allocation10], 2048  }
  0x14   :  { %3454 = vsyncadd [#allocation10], 4294965248  ;;  %v3512_v0 = vld [vmem:[#allocation6 + $0x1e0] sm:$0xff]  ;;  %v3514_v1 = vld [vmem:[#allocation6 + $0x1e8] sm:$0xff]  ;;  %s3466_s29 = smov [#allocation11]   ;;  %s3200_s1 = sshll.u32 %s5379_s5, 4  ;;  %s3201_s1 = int_to_ptr.hbm [resolvable:$true] %s3200_s1 }
  0x15   :  { %v3516_v2 = vld [vmem:[#allocation6 + $0x1c0] sm:$0xff]  ;;  %223 = vmatpush.msra.mxu0 %v3512_v0  ;;  %263 = vmatpush.msra.mxu2 %v3514_v1  ;;  %v3522_v4 = vld [vmem:[#allocation6 + $0x1c8] sm:$0xff]  ;;  %v3696_v62 = vld [vmem:[#allocation6 + $0x1f8] sm:$0xff]  ;;  %s3198_s30 = sshll.u32 %s3466_s29, 4  ;;  %s3199_s30 = int_to_ptr.vmem [resolvable:$true] %s3198_s30 }
  0x16   :  { %v3520_v3 = vld [vmem:[#allocation6 + $0x3e0] sm:$0xff]  ;;  %v3524_v5 = vld [vmem:[#allocation6 + $0x3e8] sm:$0xff]  ;;  %5556 = vst [vmem:[#allocation31_spill] sm:$0xff] %v3696_v62 }
  0x17   :  { %5541 = vst [vmem:[#allocation16_spill] sm:$0xff] %v3524_v5  ;;  %243 = vmatpush.msra.mxu1 %v3520_v3  ;;  %283 = vmatpush.msra.mxu3 %v3524_v5  ;;  %v3528_v6 = vld [vmem:[#allocation6 + $0x1a0] sm:$0xff]  ;;  %v3532_v8 = vld [vmem:[#allocation6 + $0x1a8] sm:$0xff]  ;;  %v3750_v5 = vld [vmem:[#allocation6 + $0x190] sm:$0xff] }
  0x18   :  { %v3530_v7 = vld [vmem:[#allocation6 + $0x3c0] sm:$0xff]  ;;  %224 = vmatpush.msra.mxu0 %v3516_v2  ;;  %264 = vmatpush.msra.mxu2 %v3522_v4  ;;  %v3536_v9 = vld [vmem:[#allocation6 + $0x3c8] sm:$0xff]  ;;  %5570 = vst [vmem:[#allocation45_spill] sm:$0xff] %v3750_v5 }
  0x19   :  { %5542 = vst [vmem:[#allocation17_spill] sm:$0xff] %v3536_v9  ;;  %v3538_v10 = vld [vmem:[#allocation6 + $0x3a0] sm:$0xff]  ;;  %244 = vmatpush.msra.mxu1 %v3530_v7  ;;  %284 = vmatpush.msra.mxu3 %v3536_v9  ;;  %v3544_v12 = vld [vmem:[#allocation6 + $0x188] sm:$0xff]  ;;  %v3747_v9 = vld [vmem:[#allocation6 + $0x398] sm:$0xff] }
  0x1a   :  { %v3542_v11 = vld [vmem:[#allocation6 + $0x180] sm:$0xff]  ;;  %v3546_v13 = vld [vmem:[#allocation6 + $0x3a8] sm:$0xff]  ;;  %225 = vmatpush.msra.mxu0 %v3528_v6  ;;  %265 = vmatpush.msra.mxu2 %v3532_v8  ;;  %5569 = vst [vmem:[#allocation44_spill] sm:$0xff] %v3747_v9 }
  0x1b   :  { %5543 = vst [vmem:[#allocation18_spill] sm:$0xff] %v3546_v13  ;;  %v3550_v14 = vld [vmem:[#allocation6 + $0x380] sm:$0xff]  ;;  %v3552_v15 = vld [vmem:[#allocation6 + $0x388] sm:$0xff]  ;;  %245 = vmatpush.msra.mxu1 %v3538_v10  ;;  %285 = vmatpush.msra.mxu3 %v3546_v13  ;;  %v3741_v13 = vld [vmem:[#allocation6 + $0x178] sm:$0xff] }
  0x1c   :  { %5544 = vst [vmem:[#allocation19_spill] sm:$0xff] %v3552_v15  ;;  %v3556_v16 = vld [vmem:[#allocation6 + $0x160] sm:$0xff]  ;;  %v3558_v17 = vld [vmem:[#allocation6 + $0x168] sm:$0xff]  ;;  %226 = vmatpush.msra.mxu0 %v3542_v11  ;;  %266 = vmatpush.msra.mxu2 %v3544_v12 }
  0x1d   :  { %v3562_v18 = vld [vmem:[#allocation6 + $0x360] sm:$0xff]  ;;  %v3564_v19 = vld [vmem:[#allocation6 + $0x368] sm:$0xff]  ;;  %246 = vmatpush.msra.mxu1 %v3550_v14  ;;  %286 = vmatpush.msra.mxu3 %v3552_v15  ;;  %v3738_v15 = vld [vmem:[#allocation6 + $0x1b0] sm:$0xff]  ;;  %5567 = vst [vmem:[#allocation42_spill] sm:$0xff] %v3741_v13 }
  0x1e   :  { %5545 = vst [vmem:[#allocation20_spill] sm:$0xff] %v3564_v19  ;;  %v3568_v20 = vld [vmem:[#allocation6 + $0x140] sm:$0xff]  ;;  %v3570_v21 = vld [vmem:[#allocation6 + $0x148] sm:$0xff]  ;;  %227 = vmatpush.msra.mxu0 %v3556_v16  ;;  %267 = vmatpush.msra.mxu2 %v3558_v17 }
  0x1f   :  { %v3574_v22 = vld [vmem:[#allocation6 + $0x340] sm:$0xff]  ;;  %v3576_v23 = vld [vmem:[#allocation6 + $0x348] sm:$0xff]  ;;  %247 = vmatpush.msra.mxu1 %v3562_v18  ;;  %287 = vmatpush.msra.mxu3 %v3564_v19  ;;  %v3735_v19 = vld [vmem:[#allocation6 + $0x3b8] sm:$0xff]  ;;  %5566 = vst [vmem:[#allocation41_spill] sm:$0xff] %v3738_v15 }
  0x20   :  { %5546 = vst [vmem:[#allocation21_spill] sm:$0xff] %v3576_v23  ;;  %v3580_v24 = vld [vmem:[#allocation6 + $0x120] sm:$0xff]  ;;  %v3582_v25 = vld [vmem:[#allocation6 + $0x128] sm:$0xff]  ;;  %228 = vmatpush.msra.mxu0 %v3568_v20  ;;  %268 = vmatpush.msra.mxu2 %v3570_v21 }
  0x21   :  { %v3586_v26 = vld [vmem:[#allocation6 + $0x320] sm:$0xff]  ;;  %v3588_v27 = vld [vmem:[#allocation6 + $0x328] sm:$0xff]  ;;  %248 = vmatpush.msra.mxu1 %v3574_v22  ;;  %288 = vmatpush.msra.mxu3 %v3576_v23  ;;  %v3729_v23 = vld [vmem:[#allocation6 + $0x198] sm:$0xff]  ;;  %5565 = vst [vmem:[#allocation40_spill] sm:$0xff] %v3735_v19 }
  0x22   :  { %5547 = vst [vmem:[#allocation22_spill] sm:$0xff] %v3588_v27  ;;  %v3592_v28 = vld [vmem:[#allocation6 + $0x100] sm:$0xff]  ;;  %v3594_v29 = vld [vmem:[#allocation6 + $0x108] sm:$0xff]  ;;  %229 = vmatpush.msra.mxu0 %v3580_v24  ;;  %269 = vmatpush.msra.mxu2 %v3582_v25 }
  0x23   :  { %v3598_v30 = vld [vmem:[#allocation6 + $0x300] sm:$0xff]  ;;  %v3600_v31 = vld [vmem:[#allocation6 + $0x308] sm:$0xff]  ;;  %249 = vmatpush.msra.mxu1 %v3586_v26  ;;  %289 = vmatpush.msra.mxu3 %v3588_v27  ;;  %v3726_v27 = vld [vmem:[#allocation6 + $0x1d0] sm:$0xff]  ;;  %5564 = vst [vmem:[#allocation39_spill] sm:$0xff] %v3729_v23 }
  0x24   :  { %5548 = vst [vmem:[#allocation23_spill] sm:$0xff] %v3600_v31  ;;  %v3604_v32 = vld [vmem:[#allocation6 + $0xe0] sm:$0xff]  ;;  %v3606_v33 = vld [vmem:[#allocation6 + $0xe8] sm:$0xff]  ;;  %230 = vmatpush.msra.mxu0 %v3592_v28  ;;  %270 = vmatpush.msra.mxu2 %v3594_v29 }
  0x25   :  { %v3610_v34 = vld [vmem:[#allocation6 + $0x2e0] sm:$0xff]  ;;  %v3612_v35 = vld [vmem:[#allocation6 + $0x2e8] sm:$0xff]  ;;  %250 = vmatpush.msra.mxu1 %v3598_v30  ;;  %290 = vmatpush.msra.mxu3 %v3600_v31  ;;  %v3720_v31 = vld [vmem:[#allocation6 + $0x3f0] sm:$0xff]  ;;  %5563 = vst [vmem:[#allocation38_spill] sm:$0xff] %v3726_v27 }
  0x26   :  { %5549 = vst [vmem:[#allocation24_spill] sm:$0xff] %v3612_v35  ;;  %v3616_v36 = vld [vmem:[#allocation6 + $0xc0] sm:$0xff]  ;;  %v3618_v37 = vld [vmem:[#allocation6 + $0xc8] sm:$0xff]  ;;  %231 = vmatpush.msra.mxu0 %v3604_v32  ;;  %271 = vmatpush.msra.mxu2 %v3606_v33 }
  0x27   :  { %v3622_v38 = vld [vmem:[#allocation6 + $0x2c0] sm:$0xff]  ;;  %v3624_v39 = vld [vmem:[#allocation6 + $0x2c8] sm:$0xff]  ;;  %251 = vmatpush.msra.mxu1 %v3610_v34  ;;  %291 = vmatpush.msra.mxu3 %v3612_v35  ;;  %v3718_v35 = vld [vmem:[#allocation6 + $0x1b8] sm:$0xff] }
  0x28   :  { %5550 = vst [vmem:[#allocation25_spill] sm:$0xff] %v3624_v39  ;;  %v3628_v40 = vld [vmem:[#allocation6 + $0xa0] sm:$0xff]  ;;  %v3630_v41 = vld [vmem:[#allocation6 + $0xa8] sm:$0xff]  ;;  %232 = vmatpush.msra.mxu0 %v3616_v36  ;;  %272 = vmatpush.msra.mxu2 %v3618_v37 }
  0x29   :  { %v3634_v42 = vld [vmem:[#allocation6 + $0x2a0] sm:$0xff]  ;;  %v3636_v43 = vld [vmem:[#allocation6 + $0x2a8] sm:$0xff]  ;;  %252 = vmatpush.msra.mxu1 %v3622_v38  ;;  %292 = vmatpush.msra.mxu3 %v3624_v39  ;;  %v3714_v39 = vld [vmem:[#allocation6 + $0x1f0] sm:$0xff]  ;;  %5561 = vst [vmem:[#allocation36_spill] sm:$0xff] %v3718_v35 }
  0x2a   :  { %5551 = vst [vmem:[#allocation26_spill] sm:$0xff] %v3636_v43  ;;  %v3640_v44 = vld [vmem:[#allocation6 + $0x80] sm:$0xff]  ;;  %v3642_v45 = vld [vmem:[#allocation6 + $0x88] sm:$0xff]  ;;  %233 = vmatpush.msra.mxu0 %v3628_v40  ;;  %273 = vmatpush.msra.mxu2 %v3630_v41 }
  0x2b   :  { %v3646_v46 = vld [vmem:[#allocation6 + $0x280] sm:$0xff]  ;;  %v3648_v47 = vld [vmem:[#allocation6 + $0x288] sm:$0xff]  ;;  %253 = vmatpush.msra.mxu1 %v3634_v42  ;;  %293 = vmatpush.msra.mxu3 %v3636_v43  ;;  %v3708_v43 = vld [vmem:[#allocation6 + $0x1d8] sm:$0xff]  ;;  %5560 = vst [vmem:[#allocation35_spill] sm:$0xff] %v3714_v39 }
  0x2c   :  { %5552 = vst [vmem:[#allocation27_spill] sm:$0xff] %v3648_v47  ;;  %v3652_v48 = vld [vmem:[#allocation6 + $0x60] sm:$0xff]  ;;  %v3654_v49 = vld [vmem:[#allocation6 + $0x68] sm:$0xff]  ;;  %234 = vmatpush.msra.mxu0 %v3640_v44  ;;  %274 = vmatpush.msra.mxu2 %v3642_v45 }
  0x2d   :  { %v3658_v50 = vld [vmem:[#allocation6 + $0x260] sm:$0xff]  ;;  %v3660_v51 = vld [vmem:[#allocation6 + $0x268] sm:$0xff]  ;;  %254 = vmatpush.msra.mxu1 %v3646_v46  ;;  %294 = vmatpush.msra.mxu3 %v3648_v47  ;;  %v5388_v47 = vmov 0.0   ;;  %5558 = vst [vmem:[#allocation33_spill] sm:$0xff] %v3708_v43 }
  0x2e   :  { %5553 = vst [vmem:[#allocation28_spill] sm:$0xff] %v3660_v51  ;;  %v3664_v52 = vld [vmem:[#allocation6 + $0x40] sm:$0xff]  ;;  %v3666_v53 = vld [vmem:[#allocation6 + $0x48] sm:$0xff]  ;;  %235 = vmatpush.msra.mxu0 %v3652_v48  ;;  %275 = vmatpush.msra.mxu2 %v3654_v49 }
  0x2f   :  { %v3670_v54 = vld [vmem:[#allocation6 + $0x240] sm:$0xff]  ;;  %v3672_v55 = vld [vmem:[#allocation6 + $0x248] sm:$0xff]  ;;  %255 = vmatpush.msra.mxu1 %v3658_v50  ;;  %295 = vmatpush.msra.mxu3 %v3660_v51  ;;  %v3704_v51 = vld [vmem:[#allocation3] sm:$0xff] }
  0x30   :  { %5554 = vst [vmem:[#allocation29_spill] sm:$0xff] %v3672_v55  ;;  %v3676_v56 = vld [vmem:[#allocation6 + $0x20] sm:$0xff]  ;;  %v3678_v57 = vld [vmem:[#allocation6 + $0x28] sm:$0xff]  ;;  %236 = vmatpush.msra.mxu0 %v3664_v52  ;;  %276 = vmatpush.msra.mxu2 %v3666_v53 }
  0x31   :  { %v3682_v58 = vld [vmem:[#allocation6 + $0x220] sm:$0xff]  ;;  %v3684_v59 = vld [vmem:[#allocation6 + $0x228] sm:$0xff]  ;;  %256 = vmatpush.msra.mxu1 %v3670_v54  ;;  %296 = vmatpush.msra.mxu3 %v3672_v55 }
  0x32   :  { %5555 = vst [vmem:[#allocation30_spill] sm:$0xff] %v3684_v59  ;;  %v3688_v60 = vld [vmem:[#allocation6] sm:$0xff]  ;;  %v3690_v61 = vld [vmem:[#allocation6 + $0x8] sm:$0xff]  ;;  %237 = vmatpush.msra.mxu0 %v3676_v56  ;;  %277 = vmatpush.msra.mxu2 %v3678_v57 }
  0x33   :  { %257 = vmatpush.msra.mxu1 %v3682_v58  ;;  %297 = vmatpush.msra.mxu3 %v3684_v59  ;;  %v3698_v63 = vld [vmem:[#allocation6 + $0x200] sm:$0xff]  ;;  %v3702_v55 = vld [vmem:[#allocation6 + $0x208] sm:$0xff]  ;;  %v3712_v59 = vld [vmem:[#allocation6 + $0x3f8] sm:$0xff] }
  0x34   :  { %238 = vmatpush.msra.mxu0 %v3688_v60  ;;  %278 = vmatpush.msra.mxu2 %v3690_v61  ;;  %5557 = vst [vmem:[#allocation32_spill] sm:$0xff] %v3702_v55 }
  0x35   :  { %239 = vmatmul.f32.vlgmr.msra.gmra.mxu0 %v5388_v47  ;;  %279 = vmatmul.f32.vlgmr.msra.gmra.mxu2 %v5388_v47  ;;  %5559 = vst [vmem:[#allocation34_spill] sm:$0xff] %v3712_v59  ;;  %v3724_v47 = vld [vmem:[#allocation6 + $0x3d8] sm:$0xff] }
  0x36   :  { %343 = vmatpush.msrb.mxu2 %v3696_v62  ;;  %258 = vmatpush.msra.mxu1 %v3698_v63  ;;  %5562 = vst [vmem:[#allocation37_spill] sm:$0xff] %v3724_v47  ;;  %v3767_v62 = vld [vmem:[#allocation6 + $0x358] sm:$0xff] }
  0x37   :  { %298 = vmatpush.msra.mxu3 %v3702_v55  ;;  %259 = vmatmul.f32.vlgmr.msra.gmra.mxu1 %v3704_v51  ;;  %v3732_v55 = vld [vmem:[#allocation6 + $0x3d0] sm:$0xff]  ;;  %5576 = vst [vmem:[#allocation51_spill] sm:$0xff] %v3767_v62 }
  0x38   :  { %299 = vmatmul.f32.vlgmr.msra.gmra.mxu3 %v3704_v51  ;;  %344 = vmatpush.msrb.mxu2 %v3708_v43  ;;  %v3759_v43 = vld [vmem:[#allocation6 + $0x378] sm:$0xff] }
  0x39   :  { %363 = vmatpush.msrb.mxu3 %v3712_v59  ;;  %303 = vmatpush.msrb.mxu0 %v3714_v39  ;;  %v3744_v59 = vld [vmem:[#allocation6 + $0x3b0] sm:$0xff]  ;;  %5573 = vst [vmem:[#allocation48_spill] sm:$0xff] %v3759_v43 }
  0x3a   :  { %345 = vmatpush.msrb.mxu2 %v3718_v35  ;;  %323 = vmatpush.msrb.mxu1 %v3720_v31  ;;  %5568 = vst [vmem:[#allocation43_spill] sm:$0xff] %v3744_v59  ;;  %v3753_v35 = vld [vmem:[#allocation6 + $0x158] sm:$0xff]  ;;  %v3778_v39 = vld [vmem:[#allocation6 + $0x150] sm:$0xff] }
  0x3b   :  { %364 = vmatpush.msrb.mxu3 %v3724_v47  ;;  %304 = vmatpush.msrb.mxu0 %v3726_v27  ;;  %5571 = vst [vmem:[#allocation46_spill] sm:$0xff] %v3753_v35  ;;  %v3756_v47 = vld [vmem:[#allocation6 + $0x390] sm:$0xff]  ;;  %v3761_v27 = vld [vmem:[#allocation6 + $0x138] sm:$0xff] }
  0x3c   :  { %346 = vmatpush.msrb.mxu2 %v3729_v23  ;;  %324 = vmatpush.msrb.mxu1 %v3732_v55  ;;  %5572 = vst [vmem:[#allocation47_spill] sm:$0xff] %v3756_v47  ;;  %v3764_v23 = vld [vmem:[#allocation6 + $0x170] sm:$0xff] }
  0x3d   :  { %365 = vmatpush.msrb.mxu3 %v3735_v19  ;;  %305 = vmatpush.msrb.mxu0 %v3738_v15  ;;  %5574 = vst [vmem:[#allocation49_spill] sm:$0xff] %v3761_v27  ;;  %v3770_v19 = vld [vmem:[#allocation6 + $0x118] sm:$0xff]  ;;  %v3772_v15 = vld [vmem:[#allocation6 + $0x370] sm:$0xff] }
  0x3e   :  { %347 = vmatpush.msrb.mxu2 %v3741_v13  ;;  %325 = vmatpush.msrb.mxu1 %v3744_v59  ;;  %5575 = vst [vmem:[#allocation50_spill] sm:$0xff] %v3764_v23  ;;  %v3775_v13 = vld [vmem:[#allocation6 + $0x338] sm:$0xff]  ;;  %v3780_v59 = vld [vmem:[#allocation6 + $0x130] sm:$0xff] }
  0x3f   :  { %366 = vmatpush.msrb.mxu3 %v3747_v9  ;;  %306 = vmatpush.msrb.mxu0 %v3750_v5  ;;  %5577 = vst [vmem:[#allocation52_spill] sm:$0xff] %v3770_v19  ;;  %v3784_v9 = vld [vmem:[#allocation6 + $0xf8] sm:$0xff]  ;;  %v3786_v5 = vld [vmem:[#allocation6 + $0x350] sm:$0xff] }
  0x40   :  { %348 = vmatpush.msrb.mxu2 %v3753_v35  ;;  %5578 = vst [vmem:[#allocation53_spill] sm:$0xff] %v3775_v13  ;;  %326 = vmatpush.msrb.mxu1 %v3756_v47  ;;  %v3790_v35 = vld [vmem:[#allocation6 + $0x330] sm:$0xff]  ;;  %v3795_v47 = vld [vmem:[#allocation6 + $0x318] sm:$0xff] }
  0x41   :  { %5579 = vst [vmem:[#allocation54_spill] sm:$0xff] %v3778_v39  ;;  %367 = vmatpush.msrb.mxu3 %v3759_v43  ;;  %307 = vmatpush.msrb.mxu0 %v3764_v23  ;;  %v3798_v43 = vld [vmem:[#allocation6 + $0x110] sm:$0xff]  ;;  %v3801_v23 = vld [vmem:[#allocation6 + $0xd8] sm:$0xff] }
  0x42   :  { %5580 = vst [vmem:[#allocation55_spill] sm:$0xff] %v3780_v59  ;;  %349 = vmatpush.msrb.mxu2 %v3761_v27  ;;  %327 = vmatpush.msrb.mxu1 %v3772_v15  ;;  %v3804_v27 = vld [vmem:[#allocation6 + $0x310] sm:$0xff] }
  0x43   :  { %5581 = vst [vmem:[#allocation56_spill] sm:$0xff] %v3784_v9  ;;  %368 = vmatpush.msrb.mxu3 %v3767_v62  ;;  %308 = vmatpush.msrb.mxu0 %v3778_v39  ;;  %v3807_v62 = vld [vmem:[#allocation6 + $0x2f8] sm:$0xff] }
  0x44   :  { %5582 = vst [vmem:[#allocation57_spill] sm:$0xff] %v3790_v35  ;;  %350 = vmatpush.msrb.mxu2 %v3770_v19  ;;  %328 = vmatpush.msrb.mxu1 %v3786_v5  ;;  %v3810_v19 = vld [vmem:[#allocation6 + $0xf0] sm:$0xff]  ;;  %v3813_v39 = vld [vmem:[#allocation6 + $0xb8] sm:$0xff] }
  0x45   :  { %5583 = vst [vmem:[#allocation58_spill] sm:$0xff] %v3795_v47  ;;  %369 = vmatpush.msrb.mxu3 %v3775_v13  ;;  %309 = vmatpush.msrb.mxu0 %v3780_v59  ;;  %v3816_v13 = vld [vmem:[#allocation6 + $0x2f0] sm:$0xff]  ;;  %v3819_v59 = vld [vmem:[#allocation6 + $0x2d8] sm:$0xff] }
  0x46   :  { %5584 = vst [vmem:[#allocation59_spill] sm:$0xff] %v3798_v43  ;;  %351 = vmatpush.msrb.mxu2 %v3784_v9  ;;  %329 = vmatpush.msrb.mxu1 %v3790_v35  ;;  %v3822_v9 = vld [vmem:[#allocation6 + $0xd0] sm:$0xff]  ;;  %v3825_v35 = vld [vmem:[#allocation6 + $0x98] sm:$0xff] }
  0x47   :  { %5585 = vst [vmem:[#allocation60_spill] sm:$0xff] %v3801_v23  ;;  %370 = vmatpush.msrb.mxu3 %v3795_v47  ;;  %310 = vmatpush.msrb.mxu0 %v3798_v43  ;;  %v3828_v47 = vld [vmem:[#allocation6 + $0x2d0] sm:$0xff]  ;;  %v3831_v43 = vld [vmem:[#allocation6 + $0x2b8] sm:$0xff] }
  0x48   :  { %5586 = vst [vmem:[#allocation61_spill] sm:$0xff] %v3804_v27  ;;  %352 = vmatpush.msrb.mxu2 %v3801_v23  ;;  %330 = vmatpush.msrb.mxu1 %v3804_v27  ;;  %v3834_v23 = vld [vmem:[#allocation6 + $0xb0] sm:$0xff]  ;;  %v3837_v27 = vld [vmem:[#allocation6 + $0x78] sm:$0xff] }
  0x49   :  { %5587 = vst [vmem:[#allocation62_spill] sm:$0xff] %v3807_v62  ;;  %371 = vmatpush.msrb.mxu3 %v3807_v62  ;;  %311 = vmatpush.msrb.mxu0 %v3810_v19  ;;  %v3840_v62 = vld [vmem:[#allocation6 + $0x2b0] sm:$0xff] }
  0x4a   :  { %5588 = vst [vmem:[#allocation63_spill] sm:$0xff] %v3810_v19  ;;  %353 = vmatpush.msrb.mxu2 %v3813_v39  ;;  %331 = vmatpush.msrb.mxu1 %v3816_v13  ;;  %v3843_v19 = vld [vmem:[#allocation6 + $0x298] sm:$0xff] }
  0x4b   :  { %5589 = vst [vmem:[#allocation64_spill] sm:$0xff] %v3813_v39  ;;  %372 = vmatpush.msrb.mxu3 %v3819_v59  ;;  %312 = vmatpush.msrb.mxu0 %v3822_v9  ;;  %v3846_v39 = vld [vmem:[#allocation6 + $0x90] sm:$0xff] }
  0x4c   :  { %5590 = vst [vmem:[#allocation65_spill] sm:$0xff] %v3816_v13  ;;  %354 = vmatpush.msrb.mxu2 %v3825_v35  ;;  %332 = vmatpush.msrb.mxu1 %v3828_v47  ;;  %v3849_v13 = vld [vmem:[#allocation6 + $0x58] sm:$0xff] }
  0x4d   :  { %5591 = vst [vmem:[#allocation66_spill] sm:$0xff] %v3819_v59  ;;  %373 = vmatpush.msrb.mxu3 %v3831_v43  ;;  %313 = vmatpush.msrb.mxu0 %v3834_v23  ;;  %v3852_v59 = vld [vmem:[#allocation6 + $0x290] sm:$0xff] }
  0x4e   :  { %5592 = vst [vmem:[#allocation67_spill] sm:$0xff] %v3822_v9  ;;  %355 = vmatpush.msrb.mxu2 %v3837_v27  ;;  %v3855_v9 = vld [vmem:[#allocation6 + $0x278] sm:$0xff]  ;;  %333 = vmatpush.msrb.mxu1 %v3840_v62 }
  0x4f   :  { %5593 = vst [vmem:[#allocation68_spill] sm:$0xff] %v3825_v35  ;;  %v3858_v35 = vld [vmem:[#allocation6 + $0x70] sm:$0xff]  ;;  %374 = vmatpush.msrb.mxu3 %v3843_v19  ;;  %314 = vmatpush.msrb.mxu0 %v3846_v39 }
  0x50   :  { %5594 = vst [vmem:[#allocation69_spill] sm:$0xff] %v3828_v47  ;;  %v3861_v47 = vld [vmem:[#allocation6 + $0x38] sm:$0xff]  ;;  %356 = vmatpush.msrb.mxu2 %v3849_v13  ;;  %334 = vmatpush.msrb.mxu1 %v3852_v59 }
  0x51   :  { %5595 = vst [vmem:[#allocation70_spill] sm:$0xff] %v3831_v43  ;;  %v3864_v43 = vld [vmem:[#allocation6 + $0x270] sm:$0xff]  ;;  %375 = vmatpush.msrb.mxu3 %v3855_v9  ;;  %315 = vmatpush.msrb.mxu0 %v3858_v35 }
  0x52   :  { %5596 = vst [vmem:[#allocation71_spill] sm:$0xff] %v3834_v23  ;;  %v3867_v23 = vld [vmem:[#allocation6 + $0x258] sm:$0xff]  ;;  %357 = vmatpush.msrb.mxu2 %v3861_v47  ;;  %335 = vmatpush.msrb.mxu1 %v3864_v43 }
  0x53   :  { %5597 = vst [vmem:[#allocation72_spill] sm:$0xff] %v3837_v27  ;;  %v3870_v27 = vld [vmem:[#allocation6 + $0x50] sm:$0xff]  ;;  %376 = vmatpush.msrb.mxu3 %v3867_v23 }
  0x54   :  { %5598 = vst [vmem:[#allocation73_spill] sm:$0xff] %v3840_v62  ;;  %v3873_v62 = vld [vmem:[#allocation6 + $0x18] sm:$0xff]  ;;  %316 = vmatpush.msrb.mxu0 %v3870_v27 }
  0x55   :  { %5599 = vst [vmem:[#allocation74_spill] sm:$0xff] %v3843_v19  ;;  %v3876_v19 = vld [vmem:[#allocation6 + $0x250] sm:$0xff]  ;;  %358 = vmatpush.msrb.mxu2 %v3873_v62 }
  0x56   :  { %5600 = vst [vmem:[#allocation75_spill] sm:$0xff] %v3846_v39  ;;  %v3879_v39 = vld [vmem:[#allocation6 + $0x238] sm:$0xff]  ;;  %336 = vmatpush.msrb.mxu1 %v3876_v19 }
  0x57   :  { %5601 = vst [vmem:[#allocation76_spill] sm:$0xff] %v3849_v13  ;;  %v3884_v13 = vld [vmem:[#allocation6 + $0x30] sm:$0xff]  ;;  %377 = vmatpush.msrb.mxu3 %v3879_v39  ;;  %632 = vmatpush.msra.mxu2 %v3520_v3 }
  0x58   :  { %5602 = vst [vmem:[#allocation77_spill] sm:$0xff] %v3852_v59  ;;  %v3886_v59 = vld [vmem:[#allocation6 + $0x230] sm:$0xff]  ;;  %317 = vmatpush.msrb.mxu0 %v3884_v13 }
  0x59   :  { %5603 = vst [vmem:[#allocation78_spill] sm:$0xff] %v3855_v9  ;;  %v3889_v9 = vld [vmem:[#allocation6 + $0x218] sm:$0xff]  ;;  %337 = vmatpush.msrb.mxu1 %v3886_v59  ;;  %633 = vmatpush.msra.mxu2 %v3530_v7  ;;  %v5617_v7 = vld [vmem:[#allocation41_spill] sm:$0xff] }
  0x5a   :  { %5604 = vst [vmem:[#allocation79_spill] sm:$0xff] %v3858_v35  ;;  %v3894_v35 = vld [vmem:[#allocation6 + $0x10] sm:$0xff]  ;;  %378 = vmatpush.msrb.mxu3 %v3889_v9 }
  0x5b   :  { %5605 = vst [vmem:[#allocation80_spill] sm:$0xff] %v3861_v47  ;;  %v5610_v47 = vmov 0.0   ;;  %379 = vmatmul.f32.vlgmr.msrb.gmra.mxu3 %v3704_v51  ;;  %318 = vmatpush.msrb.mxu0 %v3894_v35  ;;  %v5614_v3 = vld [vmem:[#allocation38_spill] sm:$0xff] }
  0x5c   :  { %5606 = vst [vmem:[#allocation81_spill] sm:$0xff] %v3867_v23  ;;  %359 = vmatmul.f32.vlgmr.msrb.gmra.mxu2 %v5610_v47  ;;  %v3898_v23 = vld [vmem:[#allocation6 + $0x210] sm:$0xff]  ;;  %319 = vmatmul.f32.vlgmr.msrb.gmra.mxu0 %v5610_v47 }
  0x5d   :  { %5607 = vst [vmem:[#allocation82_spill] sm:$0xff] %v3870_v27  ;;  %v3901_v27 = vld [vmem:[#allocation9 + $0x78] sm:$0xff]  ;;  %338 = vmatpush.msrb.mxu1 %v3898_v23  ;;  %652 = vmatpush.msra.mxu3 %v3514_v1 }
  0x5e   :  { %5608 = vst [vmem:[#allocation83_spill] sm:$0xff] %v3873_v62  ;;  %339 = vmatmul.f32.vlgmr.msrb.gmra.mxu1 %v3704_v51  ;;  %448 = vmatpush.msra.mxu0 %v3901_v27  ;;  %v3912_v62 = vld [vmem:[#allocation9 + $0x68] sm:$0xff]  ;;  %v5612_v1 = vld [vmem:[#allocation31_spill] sm:$0xff] }
  0x5f   :  { %5609 = vst [vmem:[#allocation84_spill] sm:$0xff] %v3879_v39  ;;  %v3908_v39 = vld [vmem:[#allocation9 + $0x70] sm:$0xff]  ;;  %612 = vmatpush.msra.mxu1 %v3512_v0  ;;  %634 = vmatpush.msra.mxu2 %v3538_v10  ;;  %v5611_v0 = vld [vmem:[#allocation35_spill] sm:$0xff]  ;;  %v5619_v10 = vld [vmem:[#allocation45_spill] sm:$0xff] }
  0x60   :  { %449 = vmatpush.msra.mxu0 %v3908_v39  ;;  %653 = vmatpush.msra.mxu3 %v3522_v4  ;;  %v5615_v4 = vld [vmem:[#allocation33_spill] sm:$0xff] }
  0x61   :  { %613 = vmatpush.msra.mxu1 %v3516_v2  ;;  %635 = vmatpush.msra.mxu2 %v3550_v14  ;;  %v5613_v2 = vld [vmem:[#allocation43_spill] sm:$0xff]  ;;  %v5622_v14 = vld [vmem:[#allocation42_spill] sm:$0xff] }
  0x62   :  { %450 = vmatpush.msra.mxu0 %v3912_v62  ;;  %654 = vmatpush.msra.mxu3 %v3532_v8  ;;  %v5618_v8 = vld [vmem:[#allocation36_spill] sm:$0xff] }
  0x63   :  { %614 = vmatpush.msra.mxu1 %v3528_v6  ;;  %636 = vmatpush.msra.mxu2 %v3562_v18  ;;  %v5616_v6 = vld [vmem:[#allocation47_spill] sm:$0xff]  ;;  %v5625_v18 = vld [vmem:[#allocation46_spill] sm:$0xff] }
  0x64   :  { %655 = vmatpush.msra.mxu3 %v3544_v12  ;;  %v5621_v12 = vld [vmem:[#allocation50_spill] sm:$0xff] }
  0x65   :  { %615 = vmatpush.msra.mxu1 %v3542_v11  ;;  %637 = vmatpush.msra.mxu2 %v3574_v22  ;;  %v5620_v11 = vld [vmem:[#allocation39_spill] sm:$0xff]  ;;  %v5629_v22 = vld [vmem:[#allocation65_spill] sm:$0xff] }
  0x66   :  { %656 = vmatpush.msra.mxu3 %v3558_v17  ;;  %v5624_v17 = vld [vmem:[#allocation54_spill] sm:$0xff]  ;;  %v5648_v47 = vld [vmem:[#allocation83_spill] sm:$0xff] }
  0x67   :  { %616 = vmatpush.msra.mxu1 %v3556_v16  ;;  %638 = vmatpush.msra.mxu2 %v3586_v26  ;;  %v5623_v16 = vld [vmem:[#allocation57_spill] sm:$0xff]  ;;  %v5633_v26 = vld [vmem:[#allocation63_spill] sm:$0xff] }
  0x68   :  { %657 = vmatpush.msra.mxu3 %v3570_v21  ;;  %v5627_v21 = vld [vmem:[#allocation55_spill] sm:$0xff] }
  0x69   :  { %617 = vmatpush.msra.mxu1 %v3568_v20  ;;  %639 = vmatpush.msra.mxu2 %v3598_v30  ;;  %v5626_v20 = vld [vmem:[#allocation61_spill] sm:$0xff]  ;;  %v5636_v30 = vld [vmem:[#allocation67_spill] sm:$0xff] }
  0x6a   :  { %658 = vmatpush.msra.mxu3 %v3582_v25  ;;  %v5632_v25 = vld [vmem:[#allocation69_spill] sm:$0xff] }
  0x6b   :  { %618 = vmatpush.msra.mxu1 %v3580_v24  ;;  %640 = vmatpush.msra.mxu2 %v3610_v34  ;;  %v5630_v24 = vld [vmem:[#allocation59_spill] sm:$0xff]  ;;  %v5640_v34 = vld [vmem:[#allocation64_spill] sm:$0xff] }
  0x6c   :  { %659 = vmatpush.msra.mxu3 %v3594_v29  ;;  %v5635_v29 = vld [vmem:[#allocation73_spill] sm:$0xff] }
  0x6d   :  { %619 = vmatpush.msra.mxu1 %v3592_v28  ;;  %641 = vmatpush.msra.mxu2 %v3622_v38  ;;  %v5634_v28 = vld [vmem:[#allocation56_spill] sm:$0xff] }
  0x6e   :  { %660 = vmatpush.msra.mxu3 %v3606_v33  ;;  %v5639_v33 = vld [vmem:[#allocation71_spill] sm:$0xff]  ;;  %v4001_v38 = vld [vmem:[#allocation9 + $0x60] sm:$0xff] }
  0x6f   :  { %620 = vmatpush.msra.mxu1 %v3604_v32  ;;  %642 = vmatpush.msra.mxu2 %v3634_v42  ;;  %v5638_v32 = vld [vmem:[#allocation77_spill] sm:$0xff]  ;;  %v5645_v42 = vld [vmem:[#allocation82_spill] sm:$0xff] }
  0x70   :  { %661 = vmatpush.msra.mxu3 %v3618_v37  ;;  %v5642_v37 = vld [vmem:[#allocation68_spill] sm:$0xff]  ;;  %451 = vmatpush.msra.mxu0 %v4001_v38 }
  0x71   :  { %621 = vmatpush.msra.mxu1 %v3616_v36  ;;  %643 = vmatpush.msra.mxu2 %v3646_v46  ;;  %v5641_v36 = vld [vmem:[#allocation75_spill] sm:$0xff]  ;;  %v4019_v46 = vld [vmem:[#allocation9 + $0x48] sm:$0xff] }
  0x72   :  { %662 = vmatpush.msra.mxu3 %v3630_v41  ;;  %v5644_v41 = vld [vmem:[#allocation72_spill] sm:$0xff] }
  0x73   :  { %622 = vmatpush.msra.mxu1 %v3628_v40  ;;  %644 = vmatpush.msra.mxu2 %v3658_v50  ;;  %v5643_v40 = vld [vmem:[#allocation79_spill] sm:$0xff] }
  0x74   :  { %663 = vmatpush.msra.mxu3 %v3642_v45  ;;  %v5647_v45 = vld [vmem:[#allocation80_spill] sm:$0xff]  ;;  %v4038_v50 = vld [vmem:[#allocation9 + $0x18] sm:$0xff] }
  0x75   :  { %623 = vmatpush.msra.mxu1 %v3640_v44  ;;  %645 = vmatpush.msra.mxu2 %v3670_v54  ;;  %v5646_v44 = vld [vmem:[#allocation76_spill] sm:$0xff]  ;;  %v213_v54 = vld [vmem:[#allocation8] sm:$0xf] }
  0x76   :  { %664 = vmatpush.msra.mxu3 %v3654_v49  ;;  %v4032_v49 = vld [vmem:[#allocation9 + $0x28] sm:$0xff] }
  0x77   :  { %624 = vmatpush.msra.mxu1 %v3652_v48  ;;  %646 = vmatpush.msra.mxu2 %v3682_v58  ;;  %v4023_v48 = vld [vmem:[#allocation9 + $0x40] sm:$0xff]  ;;  %v5650_v58 = vld [vmem:[#allocation17_spill] sm:$0xff] }
  0x78   :  { %665 = vmatpush.msra.mxu3 %v3666_v53  ;;  %v4044_v53 = vld [vmem:[#allocation9 + $0x8] sm:$0xff] }
  0x79   :  { %625 = vmatpush.msra.mxu1 %v3664_v52  ;;  %647 = vmatpush.msra.mxu2 %v3698_v63  ;;  %v4041_v52 = vld [vmem:[#allocation9 + $0x10] sm:$0xff] }
  0x7a   :  { %666 = vmatpush.msra.mxu3 %v3678_v57  ;;  %v215_v57 = vperm.slane %v213_v54, 0 }
  0x7b   :  { %626 = vmatpush.msra.mxu1 %v3676_v56  ;;  %712 = vmatpush.msrb.mxu2 %v3720_v31  ;;  %v5637_v31 = vld [vmem:[#allocation60_spill] sm:$0xff] }
  0x7c   :  { %667 = vmatpush.msra.mxu3 %v3690_v61  ;;  %v5649_v56 = vld [vmem:[#allocation16_spill] sm:$0xff] }
  0x7d   :  { %627 = vmatpush.msra.mxu1 %v3688_v60  ;;  %713 = vmatpush.msrb.mxu2 %v3732_v55  ;;  %v4047_v55 = vld [vmem:[#allocation9] sm:$0xff]  ;;  %v5651_v60 = vld [vmem:[#allocation18_spill] sm:$0xff] }
  0x7e   :  { %732 = vmatpush.msrb.mxu3 %v5612_v1 }
  0x7f   :  { %692 = vmatpush.msrb.mxu1 %v5611_v0  ;;  %714 = vmatpush.msrb.mxu2 %v5613_v2  ;;  %v5652_v0 = vld [vmem:[#allocation19_spill] sm:$0xff]  ;;  %v216_v2 = vperm.slane %v213_v54, 1 }
  0x80   :  { %733 = vmatpush.msrb.mxu3 %v5615_v4 }
  0x81   :  { %693 = vmatpush.msrb.mxu1 %v5614_v3  ;;  %715 = vmatpush.msrb.mxu2 %v5616_v6  ;;  %v5653_v3 = vld [vmem:[#allocation20_spill] sm:$0xff] }
  0x82   :  { %734 = vmatpush.msrb.mxu3 %v5618_v8 }
  0x83   :  { %694 = vmatpush.msrb.mxu1 %v5617_v7  ;;  %716 = vmatpush.msrb.mxu2 %v3772_v15  ;;  %v5628_v15 = vld [vmem:[#allocation49_spill] sm:$0xff] }
  0x84   :  { %735 = vmatpush.msrb.mxu3 %v5620_v11  ;;  %v5654_v7 = vld [vmem:[#allocation21_spill] sm:$0xff] }
  0x85   :  { %695 = vmatpush.msrb.mxu1 %v5619_v10  ;;  %717 = vmatpush.msrb.mxu2 %v3786_v5  ;;  %v5631_v5 = vld [vmem:[#allocation52_spill] sm:$0xff]  ;;  %v5655_v10 = vld [vmem:[#allocation22_spill] sm:$0xff] }
  0x86   :  { %736 = vmatpush.msrb.mxu3 %v5622_v14  ;;  %v5656_v14 = vld [vmem:[#allocation23_spill] sm:$0xff] }
  0x87   :  { %696 = vmatpush.msrb.mxu1 %v5621_v12  ;;  %718 = vmatpush.msrb.mxu2 %v5623_v16 }
  0x88   :  { %737 = vmatpush.msrb.mxu3 %v5625_v18 }
  0x89   :  { %697 = vmatpush.msrb.mxu1 %v5624_v17  ;;  %719 = vmatpush.msrb.mxu2 %v5626_v20  ;;  %v5657_v17 = vld [vmem:[#allocation24_spill] sm:$0xff] }
  0x8a   :  { %738 = vmatpush.msrb.mxu3 %v5628_v15  ;;  %v5659_v15 = vld [vmem:[#allocation26_spill] sm:$0xff] }
  0x8b   :  { %698 = vmatpush.msrb.mxu1 %v5627_v21  ;;  %720 = vmatpush.msrb.mxu2 %v5629_v22  ;;  %v5658_v21 = vld [vmem:[#allocation25_spill] sm:$0xff]  ;;  %v5660_v22 = vld [vmem:[#allocation27_spill] sm:$0xff] }
  0x8c   :  { %739 = vmatpush.msrb.mxu3 %v5631_v5  ;;  %v5661_v5 = vld [vmem:[#allocation28_spill] sm:$0xff] }
  0x8d   :  { %699 = vmatpush.msrb.mxu1 %v5630_v24  ;;  %721 = vmatpush.msrb.mxu2 %v5632_v25 }
  0x8e   :  { %740 = vmatpush.msrb.mxu3 %v5634_v28  ;;  %v5662_v28 = vld [vmem:[#allocation29_spill] sm:$0xff] }
  0x8f   :  { %700 = vmatpush.msrb.mxu1 %v5633_v26  ;;  %722 = vmatpush.msrb.mxu2 %v5635_v29 }
  0x90   :  { %741 = vmatpush.msrb.mxu3 %v5637_v31  ;;  %v5664_v31 = vld [vmem:[#allocation32_spill] sm:$0xff] }
  0x91   :  { %701 = vmatpush.msrb.mxu1 %v5636_v30  ;;  %723 = vmatpush.msrb.mxu2 %v5638_v32  ;;  %v5663_v30 = vld [vmem:[#allocation30_spill] sm:$0xff] }
  0x92   :  { %742 = vmatpush.msrb.mxu3 %v5640_v34 }
  0x93   :  { %702 = vmatpush.msrb.mxu1 %v5639_v33  ;;  %724 = vmatpush.msrb.mxu2 %v3864_v43  ;;  %v4009_v43 = vld [vmem:[#allocation9 + $0x58] sm:$0xff] }
  0x94   :  { %743 = vmatpush.msrb.mxu3 %v5642_v37  ;;  %452 = vmatpush.msra.mxu0 %v4009_v43  ;;  %v217_v37 = vperm.slane %v213_v54, 2 }
  0x95   :  { %703 = vmatpush.msrb.mxu1 %v5641_v36  ;;  %725 = vmatpush.msrb.mxu2 %v3876_v19  ;;  %v4014_v19 = vld [vmem:[#allocation9 + $0x50] sm:$0xff] }
  0x96   :  { %744 = vmatpush.msrb.mxu3 %v5644_v41  ;;  %453 = vmatpush.msra.mxu0 %v4014_v19  ;;  %v218_v41 = vperm.slane %v213_v54, 3 }
  0x97   :  { %704 = vmatpush.msrb.mxu1 %v5643_v40  ;;  %726 = vmatpush.msrb.mxu2 %v3886_v59 }
  0x98   :  { %745 = vmatpush.msrb.mxu3 %v5646_v44  ;;  %454 = vmatpush.msra.mxu0 %v4019_v46 }
  0x99   :  { %705 = vmatpush.msrb.mxu1 %v5645_v42  ;;  %727 = vmatpush.msrb.mxu2 %v3898_v23  ;;  %v4026_v23 = vld [vmem:[#allocation9 + $0x38] sm:$0xff] }
  0x9a   :  { %746 = vmatpush.msrb.mxu3 %v5647_v45  ;;  %455 = vmatpush.msra.mxu0 %v4023_v48 }
  0x9b   :  { %706 = vmatpush.msrb.mxu1 %v3884_v13  ;;  %v4029_v13 = vld [vmem:[#allocation9 + $0x30] sm:$0xff] }
  0x9c   :  { %747 = vmatpush.msrb.mxu3 %v5648_v47  ;;  %456 = vmatpush.msra.mxu0 %v4026_v23 }
  0x9d   :  { %707 = vmatpush.msrb.mxu1 %v3894_v35  ;;  %v4035_v35 = vld [vmem:[#allocation9 + $0x20] sm:$0xff] }
  0x9e   :  { %457 = vmatpush.msra.mxu0 %v4029_v13 }
  0xa0   :  { %458 = vmatpush.msra.mxu0 %v4032_v49 }
  0xa2   :  { %459 = vmatpush.msra.mxu0 %v4035_v35 }
  0xa4   :  { %460 = vmatpush.msra.mxu0 %v4038_v50 }
  0xa6   :  { %461 = vmatpush.msra.mxu0 %v4041_v52 }
  0xa8   :  { %462 = vmatpush.msra.mxu0 %v4044_v53 }
  0xaa   :  { %463 = vmatpush.msra.mxu0 %v4047_v55 }
  0xac   :  { %672 = vmatpush.msrb.mxu0 %v5649_v56 }
  0xae   :  { %673 = vmatpush.msrb.mxu0 %v5650_v58 }
  0xb0   :  { %674 = vmatpush.msrb.mxu0 %v5651_v60 }
  0xb2   :  { %v240_v59 = vpop.f32.mrf.mxu0  ;;  %675 = vmatpush.msrb.mxu0 %v5652_v0 }
  0xb3   :  { %v241_v61 = vadd.f32 %v240_v59, %v215_v57 }
  0xb4   :  { %v260_v63 = vpop.f32.mrf.mxu1  ;;  %676 = vmatpush.msrb.mxu0 %v5653_v3 }
  0xb5   :  { %v261_v1 = vadd.f32 %v260_v63, %v241_v61 }
  0xb6   :  { %677 = vmatpush.msrb.mxu0 %v5654_v7 }
  0xb7   :  { %v3215_v4 = vmul.f32 -1.442695, %v261_v1 }
  0xb8   :  { %v280_v6 = vpop.f32.mrf.mxu2  ;;  %678 = vmatpush.msrb.mxu0 %v5655_v10 }
  0xb9   :  { %3249 = vpow2.f32 %v3215_v4  ;;  %v281_v8 = vadd.f32 %v280_v6, %v216_v2 }
  0xba   :  { %679 = vmatpush.msrb.mxu0 %v5656_v14 }
  0xbb   :  { %v300_v11 = vpop.f32.mrf.mxu3 }
  0xbc   :  { %v301_v12 = vadd.f32 %v300_v11, %v281_v8  ;;  %680 = vmatpush.msrb.mxu0 %v5657_v17 }
  0xbe   :  { %v3216_v16 = vmul.f32 -1.442695, %v301_v12  ;;  %681 = vmatpush.msrb.mxu0 %v5658_v21  ;;  %v5665_v21 = vld [vmem:[#allocation34_spill] sm:$0xff] }
  0xbf   :  { %v3250_v18 = vpop.eup %3249 }
  0xc0   :  { %v386_v20 = vadd.f32 1.0, %v3250_v18  ;;  %3251 = vpow2.f32 %v3216_v16  ;;  %682 = vmatpush.msrb.mxu0 %v5659_v15  ;;  %v5666_v15 = vld [vmem:[#allocation37_spill] sm:$0xff] }
  0xc2   :  { %3253 = vrcp.f32 %v386_v20  ;;  %683 = vmatpush.msrb.mxu0 %v5660_v22  ;;  %vm392_vm0 = vweird.f32 %v386_v20  ;;  %v398_v45 = vand.u32 2147483648, %v386_v20  ;;  %v396_v57 = vand.u32 2147483647, %v386_v20  ;;  %v5667_v22 = vld [vmem:[#allocation40_spill] sm:$0xff] }
  0xc4   :  { %684 = vmatpush.msrb.mxu0 %v5661_v5  ;;  %v399_v0 = vor.u32 1.1754944e-38, %v398_v45  ;;  %vm397_vm5 = vcmp.eq.f32.partialorder %v396_v57, 8.507059e+37  ;;  %v5669_v5 = vld [vmem:[#allocation48_spill] sm:$0xff] }
  0xc5   :  { %v4169_v45 = vld [vmem:[#allocation6 + $0x368] sm:$0xff] }
  0xc6   :  { %v3252_v24 = vpop.eup %3251  ;;  %685 = vmatpush.msrb.mxu0 %v5662_v28  ;;  %v5673_v28 = vld [vmem:[#allocation62_spill] sm:$0xff]  ;;  %5681 = vst [vmem:[#allocation31_spill] sm:$0xff] %v4169_v45  ;;  %v4177_v57 = vld [vmem:[#allocation6 + $0x348] sm:$0xff] }
  0xc7   :  { %v405_v25 = vadd.f32 1.0, %v3252_v24  ;;  %v5668_v24 = vld [vmem:[#allocation44_spill] sm:$0xff]  ;;  %5682 = vst [vmem:[#allocation43_spill] sm:$0xff] %v4177_v57 }
  0xc8   :  { %v3254_v26 = vpop.eup %3253  ;;  %686 = vmatpush.msrb.mxu0 %v5663_v30  ;;  %v5675_v30 = vld [vmem:[#allocation70_spill] sm:$0xff] }
  0xc9   :  { %3255 = vrcp.f32 %v405_v25  ;;  %v388_v29 = vmul.f32 %v3254_v26, %v386_v20  ;;  %vm393_vm1 = vweird.f32 %v3254_v26  ;;  %vm411_vm3 = vweird.f32 %v405_v25 }
  0xca   :  { %687 = vmatpush.msrb.mxu0 %v5664_v31  ;;  %vm394_vm2 = vmor %vm392_vm0, %vm393_vm1  ;;  %v417_v1 = vand.u32 2147483648, %v405_v25  ;;  %v415_v6 = vand.u32 2147483647, %v405_v25  ;;  %v5676_v31 = vld [vmem:[#allocation74_spill] sm:$0xff] }
  0xcb   :  { %v389_v32 = vsub.f32 1.0, %v388_v29  ;;  %v5674_v29 = vld [vmem:[#allocation66_spill] sm:$0xff] }
  0xcc   :  { %v418_v8 = vor.u32 1.1754944e-38, %v417_v1  ;;  %vm416_vm7 = vcmp.eq.f32.partialorder %v415_v6, 8.507059e+37 }
  0xcd   :  { %v390_v36 = vmul.f32 %v3254_v26, %v389_v32  ;;  %v5677_v32 = vld [vmem:[#allocation78_spill] sm:$0xff] }
  0xcf   :  { %v3256_v33 = vpop.eup %3255  ;;  %v391_v44 = vadd.f32 %v3254_v26, %v390_v36  ;;  %v3241_v36 = vld [vmem:[%s5378_s4] ss:$0 sm:$0xff] }
  0xd0   :  { %v407_v34 = vmul.f32 %v3256_v33, %v405_v25  ;;  %vm412_vm4 = vweird.f32 %v3256_v33  ;;  %v5671_v25 = vld [vmem:[#allocation53_spill] sm:$0xff] }
  0xd1   :  { %v395_v61 = vsel %vm394_vm2, %v3254_v26, %v391_v44  ;;  %vm413_vm6 = vmor %vm411_vm3, %vm412_vm4  ;;  %v5672_v26 = vld [vmem:[#allocation58_spill] sm:$0xff]  ;;  %v4166_v44 = vld [vmem:[#allocation6 + $0x200] sm:$0xff] }
  0xd2   :  { %v408_v40 = vsub.f32 1.0, %v407_v34  ;;  %v400_v3 = vsel %vm397_vm5, %v399_v0, %v395_v61  ;;  %v5679_v34 = vld [vmem:[#allocation84_spill] sm:$0xff]  ;;  %v4186_v61 = vld [vmem:[#allocation6 + $0x3b0] sm:$0xff] }
  0xd3   :  { %v4192_v0 = vld [vmem:[#allocation6 + $0x390] sm:$0xff] }
  0xd4   :  { %v409_v58 = vmul.f32 %v3256_v33, %v408_v40 }
  0xd6   :  { %v410_v4 = vadd.f32 %v3256_v33, %v409_v58  ;;  %v4179_v58 = vld [vmem:[#allocation6 + $0x3d0] sm:$0xff] }
  0xd8   :  { %v414_v11 = vsel %vm413_vm6, %v3256_v33, %v410_v4  ;;  %v5678_v33 = vld [vmem:[#allocation81_spill] sm:$0xff] }
  0xd9   :  { %v320_v42 = vpop.f32.mrf.mxu0  ;;  %v419_v12 = vsel %vm416_vm7, %v418_v8, %v414_v11  ;;  %v4203_v8 = vld [vmem:[#allocation6 + $0x2c8] sm:$0xff] }
  0xda   :  { %v321_v56 = vadd.f32 %v320_v42, %v217_v37  ;;  %v424_v14 = vsub.f32 1.0, %v419_v12  ;;  %v426_v18 = vmul.f32 %v419_v12, %v3704_v51  ;;  %v5670_v51 = vld [vmem:[#allocation51_spill] sm:$0xff]  ;;  %5686 = vst [vmem:[#allocation41_spill] sm:$0xff] %v4203_v8  ;;  %v4209_v12 = vld [vmem:[#allocation6 + $0x2a8] sm:$0xff] }
  0xdb   :  { %v340_v60 = vpop.f32.mrf.mxu1  ;;  %v4095_v42 = vld [vmem:[#allocation6 + $0x3c0] sm:$0xff]  ;;  %5687 = vst [vmem:[#allocation36_spill] sm:$0xff] %v4209_v12 }
  0xdc   :  { %v341_v54 = vadd.f32 %v340_v60, %v321_v56  ;;  %v4173_v56 = vld [vmem:[#allocation8] sm:$0xf]  ;;  %v4184_v60 = vld [vmem:[#allocation6 + $0x328] sm:$0xff] }
  0xdd   :  { %5683 = vst [vmem:[#allocation38_spill] sm:$0xff] %v4184_v60 }
  0xde   :  { %v380_v63 = vpop.f32.mrf.mxu3 }
  0xdf   :  { %v360_v47 = vpop.f32.mrf.mxu2 }
  0xe0   :  { %v361_v59 = vadd.f32 %v360_v47, %v218_v41  ;;  %v4093_v41 = vld [vmem:[#allocation6 + $0x3e0] sm:$0xff]  ;;  %v4171_v47 = vld [vmem:[#allocation6 + $0x3f0] sm:$0xff] }
  0xe2   :  { %v381_v2 = vadd.f32 %v380_v63, %v361_v59  ;;  %v604_v59 = vperm.slane %v4173_v56, 0  ;;  %v4190_v63 = vld [vmem:[#allocation6 + $0x308] sm:$0xff] }
  0xe3   :  { %5684 = vst [vmem:[#allocation33_spill] sm:$0xff] %v4190_v63 }
  0xe4   :  { %v421_v7 = vmul.f32 %v400_v3, %v381_v2  ;;  %v4198_v3 = vld [vmem:[#allocation6 + $0x370] sm:$0xff] }
  0xe6   :  { %v422_v10 = vadd.f32 %v421_v7, %v341_v54  ;;  %v4196_v54 = vld [vmem:[#allocation6 + $0x2e8] sm:$0xff]  ;;  %v605_v7 = vperm.slane %v4173_v56, 1 }
  0xe7   :  { %5685 = vst [vmem:[#allocation47_spill] sm:$0xff] %v4196_v54 }
  0xe8   :  { %3257 = vtanh.f32 %v422_v10  ;;  %v4205_v10 = vld [vmem:[#allocation6 + $0x350] sm:$0xff] }
  0xee   :  { %v3258_v16 = vpop.eup %3257 }
  0xef   :  { %v425_v17 = vmul.f32 %v3258_v16, %v424_v14  ;;  %v4211_v14 = vld [vmem:[#allocation6 + $0x330] sm:$0xff] }
  0xf1   :  { %v4067_v20 = vadd.f32 %v426_v18, %v425_v17  ;;  %v4215_v18 = vld [vmem:[#allocation6 + $0x288] sm:$0xff] }
  0xf2   :  { %5688 = vst [vmem:[#allocation45_spill] sm:$0xff] %v4215_v18 }
  0xf3   :  { %464 = vmatmul.f32.vlgmr.msra.gmra.mxu0 %v4067_v20  ;;  %648 = vmatmul.f32.vlgmr.msra.gmra.mxu2 %v4067_v20 }
  0xf4   :  { %752 = vmatpush.msra.mxu0 %v5665_v21  ;;  %v4217_v21 = vld [vmem:[#allocation6 + $0x310] sm:$0xff] }
  0xf6   :  { %753 = vmatpush.msra.mxu0 %v5666_v15 }
  0xf8   :  { %754 = vmatpush.msra.mxu0 %v5667_v22 }
  0xfa   :  { %755 = vmatpush.msra.mxu0 %v5668_v24  ;;  %v4221_v24 = vld [vmem:[#allocation6 + $0x268] sm:$0xff] }
  0xfb   :  { %688 = vmatmul.f32.vlgmr.msrb.gmra.mxu0 %v4067_v20  ;;  %728 = vmatmul.f32.vlgmr.msrb.gmra.mxu2 %v4067_v20  ;;  %5689 = vst [vmem:[#allocation39_spill] sm:$0xff] %v4221_v24 }
  0xfc   :  { %756 = vmatpush.msra.mxu0 %v5669_v5  ;;  %v4223_v5 = vld [vmem:[#allocation6 + $0x2f0] sm:$0xff] }
  0xfe   :  { %757 = vmatpush.msra.mxu0 %v5670_v51 }
 0x100   :  { %758 = vmatpush.msra.mxu0 %v5671_v25  ;;  %v4227_v25 = vld [vmem:[#allocation6 + $0x248] sm:$0xff] }
 0x101   :  { %5690 = vst [vmem:[#allocation50_spill] sm:$0xff] %v4227_v25 }
 0x102   :  { %759 = vmatpush.msra.mxu0 %v5672_v26  ;;  %v4229_v26 = vld [vmem:[#allocation6 + $0x2d0] sm:$0xff] }
 0x104   :  { %760 = vmatpush.msra.mxu0 %v5673_v28 }
 0x106   :  { %761 = vmatpush.msra.mxu0 %v5674_v29  ;;  %v4233_v29 = vld [vmem:[#allocation6 + $0x228] sm:$0xff] }
 0x107   :  { %5691 = vst [vmem:[#allocation42_spill] sm:$0xff] %v4233_v29 }
 0x108   :  { %762 = vmatpush.msra.mxu0 %v5675_v30  ;;  %v4235_v30 = vld [vmem:[#allocation6 + $0x2b0] sm:$0xff] }
 0x10a   :  { %763 = vmatpush.msra.mxu0 %v5676_v31 }
 0x10c   :  { %764 = vmatpush.msra.mxu0 %v5677_v32  ;;  %v4239_v32 = vld [vmem:[#allocation6 + $0x208] sm:$0xff] }
 0x10d   :  { %5692 = vst [vmem:[#allocation57_spill] sm:$0xff] %v4239_v32 }
 0x10e   :  { %765 = vmatpush.msra.mxu0 %v5678_v33  ;;  %v4241_v33 = vld [vmem:[#allocation6 + $0x290] sm:$0xff] }
 0x110   :  { %766 = vmatpush.msra.mxu0 %v5679_v34  ;;  %v4245_v34 = vld [vmem:[#allocation6 + $0x270] sm:$0xff] }
 0x112   :  { %767 = vmatpush.msra.mxu0 %v3889_v9  ;;  %v4099_v9 = vld [vmem:[#allocation6 + $0x3a0] sm:$0xff] }
 0x113   :  { %768 = vmatmul.f32.vlgmr.msra.gmra.mxu0 %v4067_v20 }
 0x170   :  { %v465_v37 = vpop.f32.mrf.mxu0 }
 0x171   :  { %v466_v40 = vadd.f32 %v3241_v36, %v465_v37  ;;  %v4248_v37 = vld [vmem:[#allocation6 + $0x250] sm:$0xff] }
 0x173   :  { %471 = vst [vmem:[#allocation11 + $0x38] sm:$0xff] %v466_v40  ;;  %628 = vmatmul.f32.vlgmr.msra.gmra.mxu1 %v466_v40  ;;  %668 = vmatmul.f32.vlgmr.msra.gmra.mxu3 %v466_v40 }
 0x174   :  { %837 = vmatpush.msra.mxu1 %v3901_v27  ;;  %1021 = vmatpush.msra.mxu3 %v4093_v41  ;;  %v4118_v27 = vld [vmem:[#allocation6 + $0x380] sm:$0xff] }
 0x176   :  { %838 = vmatpush.msra.mxu1 %v3908_v39  ;;  %1022 = vmatpush.msra.mxu3 %v4095_v42  ;;  %v4121_v39 = vld [vmem:[#allocation6 + $0x360] sm:$0xff]  ;;  %v649_v4 = vpop.f32.mrf.mxu2 }
 0x178   :  { %839 = vmatpush.msra.mxu1 %v3912_v62  ;;  %1023 = vmatpush.msra.mxu3 %v4099_v9  ;;  %v4124_v62 = vld [vmem:[#allocation6 + $0x340] sm:$0xff]  ;;  %v689_v15 = vpop.f32.mrf.mxu0 }
 0x17a   :  { %840 = vmatpush.msra.mxu1 %v4001_v38  ;;  %1024 = vmatpush.msra.mxu3 %v4118_v27  ;;  %v4127_v38 = vld [vmem:[#allocation6 + $0x320] sm:$0xff] }
 0x17b   :  { %708 = vmatmul.f32.vlgmr.msrb.gmra.mxu1 %v466_v40  ;;  %748 = vmatmul.f32.vlgmr.msrb.gmra.mxu3 %v466_v40 }
 0x17c   :  { %841 = vmatpush.msra.mxu1 %v4009_v43  ;;  %1025 = vmatpush.msra.mxu3 %v4121_v39  ;;  %v4130_v43 = vld [vmem:[#allocation6 + $0x300] sm:$0xff] }
 0x17e   :  { %842 = vmatpush.msra.mxu1 %v4014_v19  ;;  %1026 = vmatpush.msra.mxu3 %v4124_v62  ;;  %v4133_v19 = vld [vmem:[#allocation6 + $0x2e0] sm:$0xff] }
 0x180   :  { %843 = vmatpush.msra.mxu1 %v4019_v46  ;;  %1027 = vmatpush.msra.mxu3 %v4127_v38  ;;  %v4136_v46 = vld [vmem:[#allocation6 + $0x2c0] sm:$0xff] }
 0x182   :  { %844 = vmatpush.msra.mxu1 %v4023_v48  ;;  %1028 = vmatpush.msra.mxu3 %v4130_v43  ;;  %v4139_v48 = vld [vmem:[#allocation6 + $0x2a0] sm:$0xff] }
 0x184   :  { %845 = vmatpush.msra.mxu1 %v4026_v23  ;;  %1029 = vmatpush.msra.mxu3 %v4133_v19  ;;  %v4142_v23 = vld [vmem:[#allocation6 + $0x280] sm:$0xff] }
 0x186   :  { %846 = vmatpush.msra.mxu1 %v4029_v13  ;;  %1030 = vmatpush.msra.mxu3 %v4136_v46  ;;  %v4145_v13 = vld [vmem:[#allocation6 + $0x3e8] sm:$0xff] }
 0x188   :  { %847 = vmatpush.msra.mxu1 %v4032_v49  ;;  %1031 = vmatpush.msra.mxu3 %v4139_v48  ;;  %v4148_v49 = vld [vmem:[#allocation6 + $0x260] sm:$0xff] }
 0x18a   :  { %848 = vmatpush.msra.mxu1 %v4035_v35  ;;  %1032 = vmatpush.msra.mxu3 %v4142_v23  ;;  %v4151_v35 = vld [vmem:[#allocation6 + $0x3c8] sm:$0xff] }
 0x18c   :  { %849 = vmatpush.msra.mxu1 %v4038_v50  ;;  %1033 = vmatpush.msra.mxu3 %v4148_v49  ;;  %v4154_v50 = vld [vmem:[#allocation6 + $0x240] sm:$0xff] }
 0x18e   :  { %850 = vmatpush.msra.mxu1 %v4041_v52  ;;  %1034 = vmatpush.msra.mxu3 %v4154_v50  ;;  %v4157_v52 = vld [vmem:[#allocation6 + $0x3a8] sm:$0xff] }
 0x190   :  { %851 = vmatpush.msra.mxu1 %v4044_v53  ;;  %v4160_v53 = vld [vmem:[#allocation6 + $0x220] sm:$0xff] }
 0x191   :  { %1035 = vmatpush.msra.mxu3 %v4160_v53 }
 0x192   :  { %852 = vmatpush.msra.mxu1 %v4047_v55  ;;  %v4163_v55 = vld [vmem:[#allocation6 + $0x388] sm:$0xff] }
 0x193   :  { %5680 = vst [vmem:[#allocation35_spill] sm:$0xff] %v4163_v55  ;;  %1036 = vmatpush.msra.mxu3 %v4166_v44 }
 0x194   :  { %1061 = vmatpush.msrb.mxu1 %v4145_v13 }
 0x195   :  { %1101 = vmatpush.msrb.mxu3 %v4171_v47 }
 0x196   :  { %1062 = vmatpush.msrb.mxu1 %v4151_v35 }
 0x197   :  { %1102 = vmatpush.msrb.mxu3 %v4179_v58 }
 0x198   :  { %1063 = vmatpush.msrb.mxu1 %v4157_v52 }
 0x199   :  { %1103 = vmatpush.msrb.mxu3 %v4186_v61 }
 0x19a   :  { %1064 = vmatpush.msrb.mxu1 %v4163_v55  ;;  %v901_v55 = vld [vmem:[#allocation6 + $0x130] sm:$0xff] }
 0x19b   :  { %1104 = vmatpush.msrb.mxu3 %v4192_v0 }
 0x19c   :  { %1065 = vmatpush.msrb.mxu1 %v4169_v45  ;;  %v910_v45 = vld [vmem:[#allocation6 + $0x178] sm:$0xff] }
 0x19d   :  { %1105 = vmatpush.msrb.mxu3 %v4198_v3 }
 0x19e   :  { %1066 = vmatpush.msrb.mxu1 %v4177_v57 }
 0x19f   :  { %1106 = vmatpush.msrb.mxu3 %v4205_v10 }
 0x1a0   :  { %1067 = vmatpush.msrb.mxu1 %v4184_v60 }
 0x1a1   :  { %1107 = vmatpush.msrb.mxu3 %v4211_v14 }
 0x1a2   :  { %1068 = vmatpush.msrb.mxu1 %v4190_v63 }
 0x1a3   :  { %1108 = vmatpush.msrb.mxu3 %v4217_v21 }
 0x1a4   :  { %1069 = vmatpush.msrb.mxu1 %v4196_v54 }
 0x1a5   :  { %1109 = vmatpush.msrb.mxu3 %v4223_v5 }
 0x1a6   :  { %1070 = vmatpush.msrb.mxu1 %v4203_v8 }
 0x1a7   :  { %1110 = vmatpush.msrb.mxu3 %v4229_v26 }
 0x1a8   :  { %1071 = vmatpush.msrb.mxu1 %v4209_v12  ;;  %v729_v12 = vpop.f32.mrf.mxu2 }
 0x1a9   :  { %1111 = vmatpush.msrb.mxu3 %v4235_v30 }
 0x1aa   :  { %1072 = vmatpush.msrb.mxu1 %v4215_v18 }
 0x1ab   :  { %1112 = vmatpush.msrb.mxu3 %v4241_v33 }
 0x1ac   :  { %1073 = vmatpush.msrb.mxu1 %v4221_v24  ;;  %v769_v24 = vpop.f32.mrf.mxu0 }
 0x1ad   :  { %1113 = vmatpush.msrb.mxu3 %v4245_v34 }
 0x1ae   :  { %1074 = vmatpush.msrb.mxu1 %v4227_v25 }
 0x1af   :  { %1114 = vmatpush.msrb.mxu3 %v4248_v37 }
 0x1b0   :  { %1075 = vmatpush.msrb.mxu1 %v4233_v29 }
 0x1b2   :  { %1076 = vmatpush.msrb.mxu1 %v4239_v32 }
 0x1f0   :  { %v629_v1 = vpop.f32.mrf.mxu1 }
 0x1f1   :  { %v630_v2 = vadd.f32 %v629_v1, %v604_v59  ;;  %v4251_v59 = vld [vmem:[#allocation6 + $0x230] sm:$0xff] }
 0x1f2   :  { %1115 = vmatpush.msrb.mxu3 %v4251_v59 }
 0x1f3   :  { %v650_v6 = vadd.f32 %v649_v4, %v630_v2  ;;  %v607_v2 = vperm.slane %v4173_v56, 3 }
 0x1f5   :  { %v3217_v11 = vmul.f32 -1.442695, %v650_v6  ;;  %v4255_v6 = vld [vmem:[#allocation6 + $0x210] sm:$0xff] }
 0x1f6   :  { %v669_v16 = vpop.f32.mrf.mxu3  ;;  %1116 = vmatpush.msrb.mxu3 %v4255_v6 }
 0x1f7   :  { %3259 = vpow2.f32 %v3217_v11  ;;  %v670_v17 = vadd.f32 %v669_v16, %v605_v7  ;;  %v606_v7 = vperm.slane %v4173_v56, 2 }
 0x1f8   :  { %v709_v16 = vpop.f32.mrf.mxu1 }
 0x1f9   :  { %v690_v22 = vadd.f32 %v689_v15, %v670_v17  ;;  %v710_v32 = vadd.f32 %v709_v16, %v606_v7 }
 0x1fb   :  { %v3218_v51 = vmul.f32 -1.442695, %v690_v22  ;;  %v730_v63 = vadd.f32 %v729_v12, %v710_v32  ;;  %v4271_v32 = vld [vmem:[#allocation6 + $0x1c8] sm:$0xff] }
 0x1fd   :  { %v3260_v28 = vpop.eup %3259  ;;  %3261 = vpow2.f32 %v3218_v51 }
 0x1fe   :  { %v775_v31 = vadd.f32 1.0, %v3260_v28  ;;  %v749_v11 = vpop.f32.mrf.mxu3 }
 0x1ff   :  { %v750_v22 = vadd.f32 %v749_v11, %v607_v2 }
 0x200   :  { %3263 = vrcp.f32 %v775_v31  ;;  %v787_v15 = vand.u32 2147483648, %v775_v31  ;;  %v785_v28 = vand.u32 2147483647, %v775_v31  ;;  %vm781_vm9 = vweird.f32 %v775_v31 }
 0x201   :  { %v770_v8 = vadd.f32 %v769_v24, %v750_v22  ;;  %v4279_v22 = vld [vmem:[#allocation6 + $0x398] sm:$0xff] }
 0x202   :  { %v788_v18 = vor.u32 1.1754944e-38, %v787_v15  ;;  %vm786_vm11 = vcmp.eq.f32.partialorder %v785_v28, 8.507059e+37  ;;  %5697 = vst [vmem:[#allocation49_spill] sm:$0xff] %v4279_v22  ;;  %v4283_v28 = vld [vmem:[#allocation6 + $0x378] sm:$0xff] }
 0x203   :  { %v3262_v36 = vpop.eup %3261  ;;  %5698 = vst [vmem:[#allocation65_spill] sm:$0xff] %v4283_v28 }
 0x204   :  { %v794_v40 = vadd.f32 1.0, %v3262_v36 }
 0x206   :  { %v3264_v1 = vpop.eup %3263  ;;  %3265 = vrcp.f32 %v794_v40  ;;  %v806_v2 = vand.u32 2147483648, %v794_v40  ;;  %vm800_vm13 = vweird.f32 %v794_v40 }
 0x207   :  { %v777_v4 = vmul.f32 %v3264_v1, %v775_v31  ;;  %vm782_vm8 = vweird.f32 %v3264_v1 }
 0x208   :  { %vm783_vm10 = vmor %vm781_vm9, %vm782_vm8  ;;  %v807_v31 = vor.u32 1.1754944e-38, %v806_v2  ;;  %v4293_v2 = vld [vmem:[#allocation6 + $0x168] sm:$0xff] }
 0x209   :  { %v778_v17 = vsub.f32 1.0, %v777_v4 }
 0x20b   :  { %v779_v51 = vmul.f32 %v3264_v1, %v778_v17  ;;  %v804_v17 = vand.u32 2147483647, %v794_v40 }
 0x20c   :  { %v3266_v36 = vpop.eup %3265 }
 0x20d   :  { %v796_v29 = vmul.f32 %v3266_v36, %v794_v40  ;;  %v780_v25 = vadd.f32 %v3264_v1, %v779_v51  ;;  %vm801_vm12 = vweird.f32 %v3266_v36  ;;  %vm805_vm15 = vcmp.eq.f32.partialorder %v804_v17, 8.507059e+37  ;;  %v915_v40 = vld [vmem:[#allocation6 + $0x1a0] sm:$0xff]  ;;  %v4297_v17 = vld [vmem:[#allocation6 + $0x338] sm:$0xff] }
 0x20e   :  { %vm802_vm14 = vmor %vm800_vm13, %vm801_vm12  ;;  %v911_v51 = vld [vmem:[#allocation6 + $0x180] sm:$0xff]  ;;  %5700 = vst [vmem:[#allocation52_spill] sm:$0xff] %v4297_v17 }
 0x20f   :  { %v797_v56 = vsub.f32 1.0, %v796_v29  ;;  %v784_v54 = vsel %vm783_vm10, %v3264_v1, %v780_v25  ;;  %v4277_v1 = vld [vmem:[#allocation6 + $0x1a8] sm:$0xff] }
 0x210   :  { %v789_v4 = vsel %vm786_vm11, %v788_v18, %v784_v54  ;;  %v4262_v18 = vld [vmem:[#allocation6 + $0x3f8] sm:$0xff] }
 0x211   :  { %v798_v60 = vmul.f32 %v3266_v36, %v797_v56  ;;  %v810_v11 = vmul.f32 %v789_v4, %v770_v8  ;;  %5694 = vst [vmem:[#allocation46_spill] sm:$0xff] %v4262_v18  ;;  %v4264_v8 = vld [vmem:[#allocation6 + $0x3d8] sm:$0xff]  ;;  %v907_v56 = vld [vmem:[#allocation6 + $0x160] sm:$0xff] }
 0x212   :  { %5695 = vst [vmem:[#allocation61_spill] sm:$0xff] %v4264_v8  ;;  %v4291_v4 = vld [vmem:[#allocation6 + $0x358] sm:$0xff] }
 0x213   :  { %v799_v57 = vadd.f32 %v3266_v36, %v798_v60  ;;  %v811_v7 = vadd.f32 %v810_v11, %v730_v63  ;;  %v923_v60 = vld [vmem:[#allocation6 + $0x1e0] sm:$0xff]  ;;  %5699 = vst [vmem:[#allocation59_spill] sm:$0xff] %v4291_v4 }
 0x214   :  { %v919_v63 = vld [vmem:[#allocation6 + $0x1c0] sm:$0xff]  ;;  %1001 = vmatpush.msra.mxu2 %v923_v60 }
 0x215   :  { %v803_v16 = vsel %vm802_vm14, %v3266_v36, %v799_v57  ;;  %3267 = vtanh.f32 %v811_v7  ;;  %v4268_v57 = vld [vmem:[#allocation6 + $0x1e8] sm:$0xff]  ;;  %v903_v11 = vld [vmem:[#allocation6 + $0x140] sm:$0xff] }
 0x216   :  { %v808_v15 = vsel %vm805_vm15, %v807_v31, %v803_v16  ;;  %1041 = vmatpush.msrb.mxu0 %v4268_v57  ;;  %1002 = vmatpush.msra.mxu2 %v919_v63  ;;  %v4286_v36 = vld [vmem:[#allocation6 + $0x188] sm:$0xff]  ;;  %v899_v31 = vld [vmem:[#allocation6 + $0x120] sm:$0xff]  ;;  %v4303_v16 = vld [vmem:[#allocation6 + $0x318] sm:$0xff] }
 0x217   :  { %v813_v29 = vsub.f32 1.0, %v808_v15  ;;  %v815_v12 = vmul.f32 %v808_v15, %v4067_v20  ;;  %v4273_v20 = vld [vmem:[#allocation6 + $0x3b8] sm:$0xff]  ;;  %v4299_v7 = vld [vmem:[#allocation6 + $0x148] sm:$0xff]  ;;  %5701 = vst [vmem:[#allocation69_spill] sm:$0xff] %v4303_v16 }
 0x218   :  { %5696 = vst [vmem:[#allocation55_spill] sm:$0xff] %v4273_v20  ;;  %1042 = vmatpush.msrb.mxu0 %v4271_v32  ;;  %1003 = vmatpush.msra.mxu2 %v915_v40  ;;  %v4305_v15 = vld [vmem:[#allocation6 + $0x128] sm:$0xff] }
 0x21a   :  { %1043 = vmatpush.msrb.mxu0 %v4277_v1  ;;  %1004 = vmatpush.msra.mxu2 %v911_v51 }
 0x21b   :  { %v3268_v24 = vpop.eup %3267 }
 0x21c   :  { %v814_v25 = vmul.f32 %v3268_v24, %v813_v29  ;;  %1044 = vmatpush.msrb.mxu0 %v4286_v36  ;;  %1005 = vmatpush.msra.mxu2 %v907_v56  ;;  %v895_v29 = vld [vmem:[#allocation6 + $0x100] sm:$0xff]  ;;  %v4309_v24 = vld [vmem:[#allocation6 + $0x2f8] sm:$0xff] }
 0x21d   :  { %5702 = vst [vmem:[#allocation63_spill] sm:$0xff] %v4309_v24 }
 0x21e   :  { %v4260_v54 = vadd.f32 %v815_v12, %v814_v25  ;;  %1045 = vmatpush.msrb.mxu0 %v4293_v2  ;;  %1006 = vmatpush.msra.mxu2 %v903_v11  ;;  %v4311_v25 = vld [vmem:[#allocation6 + $0x108] sm:$0xff]  ;;  %v891_v12 = vld [vmem:[#allocation6 + $0xe0] sm:$0xff] }
 0x220   :  { %5693 = vst [vmem:[#allocation54_spill] sm:$0xff] %v4260_v54  ;;  %853 = vmatmul.f32.vlgmr.msra.gmra.mxu1 %v4260_v54  ;;  %1037 = vmatmul.f32.vlgmr.msra.gmra.mxu3 %v4260_v54 }
 0x221   :  { %1141 = vmatpush.msra.mxu1 %v4262_v18  ;;  %1390 = vmatpush.msra.mxu3 %v923_v60  ;;  %v4315_v60 = vld [vmem:[#allocation6 + $0x2d8] sm:$0xff] }
 0x222   :  { %1046 = vmatpush.msrb.mxu0 %v4299_v7  ;;  %1007 = vmatpush.msra.mxu2 %v899_v31  ;;  %5703 = vst [vmem:[#allocation56_spill] sm:$0xff] %v4315_v60  ;;  %v914_v18 = vld [vmem:[#allocation6 + $0x198] sm:$0xff] }
 0x223   :  { %1142 = vmatpush.msra.mxu1 %v4264_v8  ;;  %1391 = vmatpush.msra.mxu3 %v919_v63  ;;  %v4317_v63 = vld [vmem:[#allocation6 + $0xe8] sm:$0xff]  ;;  %v917_v8 = vld [vmem:[#allocation6 + $0x1b0] sm:$0xff] }
 0x224   :  { %1047 = vmatpush.msrb.mxu0 %v4305_v15  ;;  %1008 = vmatpush.msra.mxu2 %v895_v29 }
 0x225   :  { %1143 = vmatpush.msra.mxu1 %v4273_v20  ;;  %1392 = vmatpush.msra.mxu3 %v915_v40  ;;  %v887_v40 = vld [vmem:[#allocation6 + $0xc0] sm:$0xff]  ;;  %v4357_v20 = vld [vmem:[#allocation6 + $0x8] sm:$0xff] }
 0x226   :  { %1048 = vmatpush.msrb.mxu0 %v4311_v25  ;;  %1009 = vmatpush.msra.mxu2 %v891_v12 }
 0x227   :  { %1144 = vmatpush.msra.mxu1 %v4279_v22  ;;  %1393 = vmatpush.msra.mxu3 %v911_v51  ;;  %v4321_v51 = vld [vmem:[#allocation6 + $0x2b8] sm:$0xff] }
 0x228   :  { %1077 = vmatmul.f32.vlgmr.msrb.gmra.mxu1 %v4260_v54  ;;  %1117 = vmatmul.f32.vlgmr.msrb.gmra.mxu3 %v4260_v54  ;;  %5704 = vst [vmem:[#allocation73_spill] sm:$0xff] %v4321_v51  ;;  %v4351_v22 = vld [vmem:[#allocation6 + $0x218] sm:$0xff] }
 0x229   :  { %1145 = vmatpush.msra.mxu1 %v4283_v28  ;;  %1394 = vmatpush.msra.mxu3 %v907_v56  ;;  %v4323_v56 = vld [vmem:[#allocation6 + $0xc8] sm:$0xff]  ;;  %v4345_v28 = vld [vmem:[#allocation6 + $0x238] sm:$0xff]  ;;  %5709 = vst [vmem:[#allocation64_spill] sm:$0xff] %v4351_v22 }
 0x22a   :  { %1049 = vmatpush.msrb.mxu0 %v4317_v63  ;;  %1010 = vmatpush.msra.mxu2 %v887_v40  ;;  %5708 = vst [vmem:[#allocation71_spill] sm:$0xff] %v4345_v28 }
 0x22b   :  { %1146 = vmatpush.msra.mxu1 %v4291_v4  ;;  %1395 = vmatpush.msra.mxu3 %v903_v11  ;;  %v883_v11 = vld [vmem:[#allocation6 + $0xa0] sm:$0xff]  ;;  %v4339_v4 = vld [vmem:[#allocation6 + $0x258] sm:$0xff] }
 0x22c   :  { %1050 = vmatpush.msrb.mxu0 %v4323_v56  ;;  %1011 = vmatpush.msra.mxu2 %v883_v11  ;;  %5707 = vst [vmem:[#allocation77_spill] sm:$0xff] %v4339_v4 }
 0x22d   :  { %1147 = vmatpush.msra.mxu1 %v4297_v17  ;;  %1396 = vmatpush.msra.mxu3 %v899_v31  ;;  %v4329_v31 = vld [vmem:[#allocation6 + $0xa8] sm:$0xff]  ;;  %v4333_v17 = vld [vmem:[#allocation6 + $0x278] sm:$0xff] }
 0x22e   :  { %5706 = vst [vmem:[#allocation60_spill] sm:$0xff] %v4333_v17  ;;  %1051 = vmatpush.msrb.mxu0 %v4329_v31 }
 0x22f   :  { %1148 = vmatpush.msra.mxu1 %v4303_v16  ;;  %1397 = vmatpush.msra.mxu3 %v895_v29  ;;  %v4327_v16 = vld [vmem:[#allocation6 + $0x298] sm:$0xff]  ;;  %v4335_v29 = vld [vmem:[#allocation6 + $0x88] sm:$0xff] }
 0x230   :  { %5705 = vst [vmem:[#allocation67_spill] sm:$0xff] %v4327_v16  ;;  %1052 = vmatpush.msrb.mxu0 %v4335_v29 }
 0x231   :  { %1149 = vmatpush.msra.mxu1 %v4309_v24  ;;  %1398 = vmatpush.msra.mxu3 %v891_v12  ;;  %v879_v24 = vld [vmem:[#allocation6 + $0x80] sm:$0xff]  ;;  %v4341_v12 = vld [vmem:[#allocation6 + $0x68] sm:$0xff] }
 0x232   :  { %1012 = vmatpush.msra.mxu2 %v879_v24  ;;  %1053 = vmatpush.msrb.mxu0 %v4341_v12 }
 0x233   :  { %1150 = vmatpush.msra.mxu1 %v4315_v60  ;;  %1399 = vmatpush.msra.mxu3 %v887_v40  ;;  %v875_v60 = vld [vmem:[#allocation6 + $0x60] sm:$0xff]  ;;  %v4347_v40 = vld [vmem:[#allocation6 + $0x48] sm:$0xff] }
 0x234   :  { %1013 = vmatpush.msra.mxu2 %v875_v60  ;;  %1054 = vmatpush.msrb.mxu0 %v4347_v40 }
 0x235   :  { %1151 = vmatpush.msra.mxu1 %v4321_v51  ;;  %1400 = vmatpush.msra.mxu3 %v883_v11  ;;  %v871_v51 = vld [vmem:[#allocation6 + $0x40] sm:$0xff]  ;;  %v4353_v11 = vld [vmem:[#allocation6 + $0x28] sm:$0xff] }
 0x236   :  { %1014 = vmatpush.msra.mxu2 %v871_v51  ;;  %1055 = vmatpush.msrb.mxu0 %v4353_v11 }
 0x237   :  { %1152 = vmatpush.msra.mxu1 %v4327_v16  ;;  %1401 = vmatpush.msra.mxu3 %v879_v24  ;;  %v867_v16 = vld [vmem:[#allocation6 + $0x20] sm:$0xff]  ;;  %v925_v24 = vld [vmem:[#allocation6 + $0x1f0] sm:$0xff] }
 0x238   :  { %1015 = vmatpush.msra.mxu2 %v867_v16  ;;  %1056 = vmatpush.msrb.mxu0 %v4357_v20 }
 0x239   :  { %1153 = vmatpush.msra.mxu1 %v4333_v17  ;;  %1402 = vmatpush.msra.mxu3 %v875_v60  ;;  %v863_v17 = vld [vmem:[#allocation6] sm:$0xff]  ;;  %v921_v60 = vld [vmem:[#allocation6 + $0x1d0] sm:$0xff] }
 0x23a   :  { %1016 = vmatpush.msra.mxu2 %v863_v17 }
 0x23b   :  { %1154 = vmatpush.msra.mxu1 %v4339_v4  ;;  %1403 = vmatpush.msra.mxu3 %v871_v51  ;;  %v4361_v4 = vld [vmem:[#allocation6 + $0x1f8] sm:$0xff] }
 0x23c   :  { %1081 = vmatpush.msrb.mxu2 %v925_v24  ;;  %1121 = vmatpush.msra.mxu0 %v4361_v4  ;;  %v918_v51 = vld [vmem:[#allocation6 + $0x1b8] sm:$0xff] }
 0x23d   :  { %1155 = vmatpush.msra.mxu1 %v4345_v28  ;;  %v4365_v28 = vld [vmem:[#allocation6 + $0x1d8] sm:$0xff]  ;;  %1404 = vmatpush.msra.mxu3 %v867_v16 }
 0x23e   :  { %1082 = vmatpush.msrb.mxu2 %v921_v60  ;;  %1122 = vmatpush.msra.mxu0 %v4365_v28  ;;  %v906_v16 = vld [vmem:[#allocation6 + $0x158] sm:$0xff] }
 0x23f   :  { %1156 = vmatpush.msra.mxu1 %v4351_v22  ;;  %v913_v22 = vld [vmem:[#allocation6 + $0x190] sm:$0xff]  ;;  %1405 = vmatpush.msra.mxu3 %v863_v17 }
 0x240   :  { %1157 = vmatmul.f32.vlgmr.msra.gmra.mxu1 %v4260_v54  ;;  %1083 = vmatpush.msrb.mxu2 %v917_v8  ;;  %v909_v54 = vld [vmem:[#allocation6 + $0x170] sm:$0xff] }
 0x241   :  { %1430 = vmatpush.msrb.mxu1 %v4268_v57  ;;  %1123 = vmatpush.msra.mxu0 %v918_v51  ;;  %v905_v57 = vld [vmem:[#allocation6 + $0x150] sm:$0xff] }
 0x242   :  { %1084 = vmatpush.msrb.mxu2 %v913_v22  ;;  %1470 = vmatpush.msrb.mxu3 %v925_v24  ;;  %v897_v17 = vld [vmem:[#allocation6 + $0x110] sm:$0xff] }
 0x243   :  { %1431 = vmatpush.msrb.mxu1 %v4271_v32  ;;  %1124 = vmatpush.msra.mxu0 %v914_v18  ;;  %v902_v32 = vld [vmem:[#allocation6 + $0x138] sm:$0xff]  ;;  %v893_v24 = vld [vmem:[#allocation6 + $0xf0] sm:$0xff] }
 0x244   :  { %1085 = vmatpush.msrb.mxu2 %v909_v54  ;;  %1471 = vmatpush.msrb.mxu3 %v921_v60  ;;  %v889_v60 = vld [vmem:[#allocation6 + $0xd0] sm:$0xff] }
 0x245   :  { %1432 = vmatpush.msrb.mxu1 %v4277_v1  ;;  %1125 = vmatpush.msra.mxu0 %v910_v45  ;;  %v898_v1 = vld [vmem:[#allocation6 + $0x118] sm:$0xff] }
 0x246   :  { %1086 = vmatpush.msrb.mxu2 %v905_v57  ;;  %1472 = vmatpush.msrb.mxu3 %v917_v8  ;;  %v890_v8 = vld [vmem:[#allocation6 + $0xd8] sm:$0xff] }
 0x247   :  { %1433 = vmatpush.msrb.mxu1 %v4286_v36  ;;  %1126 = vmatpush.msra.mxu0 %v906_v16  ;;  %v894_v36 = vld [vmem:[#allocation6 + $0xf8] sm:$0xff] }
 0x248   :  { %1087 = vmatpush.msrb.mxu2 %v901_v55  ;;  %1473 = vmatpush.msrb.mxu3 %v913_v22  ;;  %v881_v22 = vld [vmem:[#allocation6 + $0x90] sm:$0xff] }
 0x249   :  { %1434 = vmatpush.msrb.mxu1 %v4293_v2  ;;  %1127 = vmatpush.msra.mxu0 %v902_v32  ;;  %v882_v2 = vld [vmem:[#allocation6 + $0x98] sm:$0xff] }
 0x24a   :  { %1088 = vmatpush.msrb.mxu2 %v897_v17  ;;  %1474 = vmatpush.msrb.mxu3 %v909_v54  ;;  %v886_v54 = vld [vmem:[#allocation6 + $0xb8] sm:$0xff] }
 0x24b   :  { %1435 = vmatpush.msrb.mxu1 %v4299_v7  ;;  %1128 = vmatpush.msra.mxu0 %v898_v1  ;;  %v870_v7 = vld [vmem:[#allocation6 + $0x38] sm:$0xff] }
 0x24c   :  { %1089 = vmatpush.msrb.mxu2 %v893_v24  ;;  %1475 = vmatpush.msrb.mxu3 %v905_v57  ;;  %v5719_v57 = vld [vmem:[#allocation39_spill] sm:$0xff] }
 0x24d   :  { %1436 = vmatpush.msrb.mxu1 %v4305_v15  ;;  %1129 = vmatpush.msra.mxu0 %v894_v36  ;;  %v865_v15 = vld [vmem:[#allocation6 + $0x10] sm:$0xff] }
 0x24e   :  { %1090 = vmatpush.msrb.mxu2 %v889_v60  ;;  %1476 = vmatpush.msrb.mxu3 %v901_v55  ;;  %v885_v55 = vld [vmem:[#allocation6 + $0xb0] sm:$0xff] }
 0x24f   :  { %1437 = vmatpush.msrb.mxu1 %v4311_v25  ;;  %1130 = vmatpush.msra.mxu0 %v890_v8  ;;  %v866_v25 = vld [vmem:[#allocation6 + $0x18] sm:$0xff] }
 0x250   :  { %1477 = vmatpush.msrb.mxu3 %v897_v17  ;;  %1091 = vmatpush.msrb.mxu2 %v885_v55 }
 0x251   :  { %1438 = vmatpush.msrb.mxu1 %v4317_v63  ;;  %1131 = vmatpush.msra.mxu0 %v886_v54  ;;  %v3242_v63 = vld [vmem:[%s5378_s4] ss:$0 sm:$0xff] }
 0x252   :  { %1478 = vmatpush.msrb.mxu3 %v893_v24  ;;  %1092 = vmatpush.msrb.mxu2 %v881_v22  ;;  %v5722_v24 = vld [vmem:[#allocation57_spill] sm:$0xff] }
 0x253   :  { %1439 = vmatpush.msrb.mxu1 %v4323_v56  ;;  %1132 = vmatpush.msra.mxu0 %v882_v2 }
 0x254   :  { %1479 = vmatpush.msrb.mxu3 %v889_v60 }
 0x255   :  { %1440 = vmatpush.msrb.mxu1 %v4329_v31 }
 0x256   :  { %1480 = vmatpush.msrb.mxu3 %v885_v55 }
 0x257   :  { %1441 = vmatpush.msrb.mxu1 %v4335_v29  ;;  %v4390_v29 = vld [vmem:[#allocation9 + $0x78] sm:$0xff] }
 0x258   :  { %1481 = vmatpush.msrb.mxu3 %v881_v22 }
 0x259   :  { %1442 = vmatpush.msrb.mxu1 %v4341_v12  ;;  %v4392_v12 = vld [vmem:[#allocation9 + $0x70] sm:$0xff] }
 0x25b   :  { %1443 = vmatpush.msrb.mxu1 %v4347_v40  ;;  %v4396_v40 = vld [vmem:[#allocation9 + $0x68] sm:$0xff] }
 0x25d   :  { %1444 = vmatpush.msrb.mxu1 %v4353_v11  ;;  %v4400_v11 = vld [vmem:[#allocation9 + $0x60] sm:$0xff] }
 0x25f   :  { %1445 = vmatpush.msrb.mxu1 %v4357_v20  ;;  %v877_v20 = vld [vmem:[#allocation6 + $0x70] sm:$0xff] }
 0x260   :  { %1093 = vmatpush.msrb.mxu2 %v877_v20  ;;  %1482 = vmatpush.msrb.mxu3 %v877_v20 }
 0x261   :  { %1510 = vmatpush.msra.mxu1 %v4361_v4  ;;  %v869_v4 = vld [vmem:[#allocation6 + $0x30] sm:$0xff] }
 0x263   :  { %1511 = vmatpush.msra.mxu1 %v4365_v28  ;;  %v878_v28 = vld [vmem:[#allocation6 + $0x78] sm:$0xff] }
 0x264   :  { %1133 = vmatpush.msra.mxu0 %v878_v28 }
 0x265   :  { %1512 = vmatpush.msra.mxu1 %v918_v51  ;;  %v5718_v51 = vld [vmem:[#allocation45_spill] sm:$0xff] }
 0x267   :  { %1513 = vmatpush.msra.mxu1 %v914_v18  ;;  %v874_v18 = vld [vmem:[#allocation6 + $0x58] sm:$0xff] }
 0x268   :  { %1134 = vmatpush.msra.mxu0 %v874_v18 }
 0x269   :  { %1514 = vmatpush.msra.mxu1 %v910_v45  ;;  %v873_v45 = vld [vmem:[#allocation6 + $0x50] sm:$0xff] }
 0x26a   :  { %1094 = vmatpush.msrb.mxu2 %v873_v45  ;;  %1483 = vmatpush.msrb.mxu3 %v873_v45 }
 0x26b   :  { %1515 = vmatpush.msra.mxu1 %v906_v16  ;;  %1135 = vmatpush.msra.mxu0 %v870_v7  ;;  %v5720_v16 = vld [vmem:[#allocation50_spill] sm:$0xff] }
 0x26c   :  { %1095 = vmatpush.msrb.mxu2 %v869_v4  ;;  %1484 = vmatpush.msrb.mxu3 %v869_v4 }
 0x26d   :  { %1516 = vmatpush.msra.mxu1 %v902_v32  ;;  %1136 = vmatpush.msra.mxu0 %v866_v25 }
 0x26e   :  { %1096 = vmatpush.msrb.mxu2 %v865_v15  ;;  %1485 = vmatpush.msrb.mxu3 %v865_v15 }
 0x26f   :  { %1517 = vmatpush.msra.mxu1 %v898_v1  ;;  %v5721_v1 = vld [vmem:[#allocation42_spill] sm:$0xff] }
 0x271   :  { %1518 = vmatpush.msra.mxu1 %v894_v36 }
 0x273   :  { %1519 = vmatpush.msra.mxu1 %v890_v8 }
 0x275   :  { %1520 = vmatpush.msra.mxu1 %v886_v54 }
 0x277   :  { %1521 = vmatpush.msra.mxu1 %v882_v2 }
 0x279   :  { %1522 = vmatpush.msra.mxu1 %v878_v28 }
 0x27b   :  { %1523 = vmatpush.msra.mxu1 %v874_v18 }
 0x27d   :  { %1524 = vmatpush.msra.mxu1 %v870_v7 }
 0x27f   :  { %1525 = vmatpush.msra.mxu1 %v866_v25 }
 0x29d   :  { %v854_v56 = vpop.f32.mrf.mxu1 }
 0x29e   :  { %v855_v31 = vadd.f32 %v3242_v63, %v854_v56 }
 0x2a0   :  { %860 = vst [vmem:[#allocation11 + $0x30] sm:$0xff] %v855_v31  ;;  %1017 = vmatmul.f32.vlgmr.msra.gmra.mxu2 %v855_v31  ;;  %1057 = vmatmul.f32.vlgmr.msrb.gmra.mxu0 %v855_v31 }
 0x2a1   :  { %1226 = vmatpush.msra.mxu2 %v4390_v29  ;;  %1410 = vmatpush.msrb.mxu0 %v4093_v41  ;;  %v4434_v41 = vld [vmem:[#allocation9 + $0x58] sm:$0xff] }
 0x2a3   :  { %1227 = vmatpush.msra.mxu2 %v4392_v12  ;;  %1411 = vmatpush.msrb.mxu0 %v4095_v42  ;;  %v4437_v42 = vld [vmem:[#allocation9 + $0x50] sm:$0xff] }
 0x2a5   :  { %1228 = vmatpush.msra.mxu2 %v4396_v40  ;;  %1412 = vmatpush.msrb.mxu0 %v4099_v9  ;;  %v4440_v9 = vld [vmem:[#allocation9 + $0x48] sm:$0xff] }
 0x2a7   :  { %1229 = vmatpush.msra.mxu2 %v4400_v11  ;;  %1413 = vmatpush.msrb.mxu0 %v4118_v27  ;;  %v4443_v27 = vld [vmem:[#allocation9 + $0x40] sm:$0xff] }
 0x2a8   :  { %1097 = vmatmul.f32.vlgmr.msrb.gmra.mxu2 %v855_v31  ;;  %1137 = vmatmul.f32.vlgmr.msra.gmra.mxu0 %v855_v31 }
 0x2a9   :  { %1414 = vmatpush.msrb.mxu0 %v4121_v39  ;;  %1230 = vmatpush.msra.mxu2 %v4434_v41  ;;  %v4446_v39 = vld [vmem:[#allocation9 + $0x38] sm:$0xff] }
 0x2ab   :  { %1415 = vmatpush.msrb.mxu0 %v4124_v62  ;;  %1231 = vmatpush.msra.mxu2 %v4437_v42  ;;  %v4449_v62 = vld [vmem:[#allocation9 + $0x30] sm:$0xff] }
 0x2ad   :  { %1416 = vmatpush.msrb.mxu0 %v4127_v38  ;;  %1232 = vmatpush.msra.mxu2 %v4440_v9  ;;  %v4452_v38 = vld [vmem:[#allocation9 + $0x28] sm:$0xff] }
 0x2af   :  { %1417 = vmatpush.msrb.mxu0 %v4130_v43  ;;  %1233 = vmatpush.msra.mxu2 %v4443_v27  ;;  %v4455_v43 = vld [vmem:[#allocation9 + $0x20] sm:$0xff] }
 0x2b1   :  { %1418 = vmatpush.msrb.mxu0 %v4133_v19  ;;  %1234 = vmatpush.msra.mxu2 %v4446_v39  ;;  %v4458_v19 = vld [vmem:[#allocation9 + $0x18] sm:$0xff] }
 0x2b3   :  { %1419 = vmatpush.msrb.mxu0 %v4136_v46  ;;  %1235 = vmatpush.msra.mxu2 %v4449_v62  ;;  %v4461_v46 = vld [vmem:[#allocation9 + $0x10] sm:$0xff] }
 0x2b5   :  { %1420 = vmatpush.msrb.mxu0 %v4139_v48  ;;  %1236 = vmatpush.msra.mxu2 %v4452_v38  ;;  %v4464_v48 = vld [vmem:[#allocation9 + $0x8] sm:$0xff] }
 0x2b7   :  { %1421 = vmatpush.msrb.mxu0 %v4142_v23  ;;  %1237 = vmatpush.msra.mxu2 %v4455_v43  ;;  %v4467_v23 = vld [vmem:[#allocation9] sm:$0xff] }
 0x2b9   :  { %1422 = vmatpush.msrb.mxu0 %v4148_v49  ;;  %1238 = vmatpush.msra.mxu2 %v4458_v19  ;;  %v991_v49 = vld [vmem:[#allocation8] sm:$0xf] }
 0x2ba   :  { %v996_v55 = vperm.slane %v991_v49, 3  ;;  %v995_v28 = vperm.slane %v991_v49, 2 }
 0x2bb   :  { %1423 = vmatpush.msrb.mxu0 %v4154_v50  ;;  %1239 = vmatpush.msra.mxu2 %v4461_v46  ;;  %v994_v50 = vperm.slane %v991_v49, 1 }
 0x2bd   :  { %1424 = vmatpush.msrb.mxu0 %v4160_v53  ;;  %1240 = vmatpush.msra.mxu2 %v4464_v48  ;;  %v5710_v53 = vld [vmem:[#allocation35_spill] sm:$0xff] }
 0x2bf   :  { %1425 = vmatpush.msrb.mxu0 %v4166_v44  ;;  %1241 = vmatpush.msra.mxu2 %v4467_v23 }
 0x2c1   :  { %1490 = vmatpush.msra.mxu0 %v4171_v47  ;;  %1450 = vmatpush.msrb.mxu2 %v4145_v13  ;;  %v5711_v47 = vld [vmem:[#allocation31_spill] sm:$0xff] }
 0x2c3   :  { %1491 = vmatpush.msra.mxu0 %v4179_v58  ;;  %1451 = vmatpush.msrb.mxu2 %v4151_v35 }
 0x2c5   :  { %1492 = vmatpush.msra.mxu0 %v4186_v61  ;;  %1452 = vmatpush.msrb.mxu2 %v4157_v52  ;;  %v1078_v61 = vpop.f32.mrf.mxu1  ;;  %v1038_v52 = vpop.f32.mrf.mxu3 }
 0x2c7   :  { %1493 = vmatpush.msra.mxu0 %v4192_v0  ;;  %1453 = vmatpush.msrb.mxu2 %v5710_v53  ;;  %v5712_v0 = vld [vmem:[#allocation43_spill] sm:$0xff] }
 0x2c9   :  { %1494 = vmatpush.msra.mxu0 %v4198_v3  ;;  %1454 = vmatpush.msrb.mxu2 %v5711_v47 }
 0x2cb   :  { %1495 = vmatpush.msra.mxu0 %v4205_v10  ;;  %1455 = vmatpush.msrb.mxu2 %v5712_v0  ;;  %v993_v10 = vperm.slane %v991_v49, 0 }
 0x2cd   :  { %1496 = vmatpush.msra.mxu0 %v4211_v14  ;;  %v5713_v14 = vld [vmem:[#allocation38_spill] sm:$0xff]  ;;  %v1158_v31 = vpop.f32.mrf.mxu1  ;;  %v1118_v47 = vpop.f32.mrf.mxu3 }
 0x2ce   :  { %1456 = vmatpush.msrb.mxu2 %v5713_v14 }
 0x2cf   :  { %1497 = vmatpush.msra.mxu0 %v4217_v21 }
 0x2d1   :  { %1498 = vmatpush.msra.mxu0 %v4223_v5  ;;  %v5714_v5 = vld [vmem:[#allocation33_spill] sm:$0xff] }
 0x2d2   :  { %1457 = vmatpush.msrb.mxu2 %v5714_v5 }
 0x2d3   :  { %1499 = vmatpush.msra.mxu0 %v4229_v26  ;;  %v5715_v26 = vld [vmem:[#allocation47_spill] sm:$0xff] }
 0x2d4   :  { %1458 = vmatpush.msrb.mxu2 %v5715_v26 }
 0x2d5   :  { %1500 = vmatpush.msra.mxu0 %v4235_v30 }
 0x2d7   :  { %1501 = vmatpush.msra.mxu0 %v4241_v33  ;;  %v5716_v33 = vld [vmem:[#allocation41_spill] sm:$0xff] }
 0x2d8   :  { %1459 = vmatpush.msrb.mxu2 %v5716_v33 }
 0x2d9   :  { %1502 = vmatpush.msra.mxu0 %v4245_v34 }
 0x2db   :  { %1503 = vmatpush.msra.mxu0 %v4248_v37  ;;  %v5717_v37 = vld [vmem:[#allocation36_spill] sm:$0xff] }
 0x2dc   :  { %1460 = vmatpush.msrb.mxu2 %v5717_v37  ;;  %v5724_v37 = vld [vmem:[#allocation46_spill] sm:$0xff] }
 0x2dd   :  { %1504 = vmatpush.msra.mxu0 %v4251_v59 }
 0x2de   :  { %1461 = vmatpush.msrb.mxu2 %v5718_v51  ;;  %v5727_v51 = vld [vmem:[#allocation49_spill] sm:$0xff] }
 0x2df   :  { %1505 = vmatpush.msra.mxu0 %v4255_v6 }
 0x2e0   :  { %1462 = vmatpush.msrb.mxu2 %v5719_v57  ;;  %v5728_v57 = vld [vmem:[#allocation65_spill] sm:$0xff] }
 0x2e2   :  { %1463 = vmatpush.msrb.mxu2 %v5720_v16  ;;  %v5729_v16 = vld [vmem:[#allocation59_spill] sm:$0xff] }
 0x2e4   :  { %1464 = vmatpush.msrb.mxu2 %v5721_v1  ;;  %v5732_v1 = vld [vmem:[#allocation63_spill] sm:$0xff] }
 0x2e6   :  { %1465 = vmatpush.msrb.mxu2 %v5722_v24  ;;  %v5733_v24 = vld [vmem:[#allocation56_spill] sm:$0xff] }
 0x31d   :  { %v1058_v44 = vpop.f32.mrf.mxu0 }
 0x31e   :  { %v1059_v58 = vadd.f32 %v1058_v44, %v994_v50 }
 0x320   :  { %v1079_v3 = vadd.f32 %v1078_v61, %v1059_v58 }
 0x322   :  { %v3220_v13 = vmul.f32 -1.442695, %v1079_v3 }
 0x323   :  { %v1018_v21 = vpop.f32.mrf.mxu2 }
 0x324   :  { %3269 = vpow2.f32 %v3220_v13  ;;  %v1019_v35 = vadd.f32 %v1018_v21, %v993_v10 }
 0x325   :  { %v1138_v2 = vpop.f32.mrf.mxu0 }
 0x326   :  { %v1039_v30 = vadd.f32 %v1038_v52, %v1019_v35  ;;  %v1139_v4 = vadd.f32 %v1138_v2, %v996_v55  ;;  %v5737_v55 = vld [vmem:[#allocation77_spill] sm:$0xff]  ;;  %v3243_v2 = vld [vmem:[%s5378_s4] ss:$0 sm:$0xff] }
 0x328   :  { %v3219_v34 = vmul.f32 -1.442695, %v1039_v30  ;;  %v1159_v53 = vadd.f32 %v1158_v31, %v1139_v4  ;;  %v5723_v30 = vld [vmem:[#allocation54_spill] sm:$0xff]  ;;  %v4582_v4 = vld [vmem:[#allocation6 + $0x220] sm:$0xff] }
 0x32a   :  { %v3270_v59 = vpop.eup %3269  ;;  %3271 = vpow2.f32 %v3219_v34 }
 0x32b   :  { %v1183_v6 = vadd.f32 1.0, %v3270_v59  ;;  %v1098_v18 = vpop.f32.mrf.mxu2  ;;  %v5725_v59 = vld [vmem:[#allocation61_spill] sm:$0xff] }
 0x32c   :  { %v1099_v56 = vadd.f32 %v1098_v18, %v995_v28  ;;  %v4579_v18 = vld [vmem:[#allocation6 + $0x3a8] sm:$0xff] }
 0x32d   :  { %3273 = vrcp.f32 %v1183_v6  ;;  %v1195_v61 = vand.u32 2147483648, %v1183_v6  ;;  %vm1189_vm5 = vweird.f32 %v1183_v6  ;;  %v1193_v10 = vand.u32 2147483647, %v1183_v6 }
 0x32e   :  { %v1119_v3 = vadd.f32 %v1118_v47, %v1099_v56  ;;  %v4594_v56 = vld [vmem:[#allocation6 + $0x3f0] sm:$0xff] }
 0x32f   :  { %v1196_v21 = vor.u32 1.1754944e-38, %v1195_v61  ;;  %vm1194_vm7 = vcmp.eq.f32.partialorder %v1193_v10, 8.507059e+37  ;;  %v4605_v61 = vld [vmem:[#allocation6 + $0x328] sm:$0xff] }
 0x330   :  { %v3272_v32 = vpop.eup %3271  ;;  %5743 = vst [vmem:[#allocation72_spill] sm:$0xff] %v4605_v61  ;;  %v4611_v10 = vld [vmem:[#allocation6 + $0x308] sm:$0xff] }
 0x331   :  { %v1164_v17 = vadd.f32 1.0, %v3272_v32  ;;  %v5730_v32 = vld [vmem:[#allocation52_spill] sm:$0xff]  ;;  %5744 = vst [vmem:[#allocation82_spill] sm:$0xff] %v4611_v10 }
 0x333   :  { %3275 = vrcp.f32 %v1164_v17  ;;  %v3274_v36 = vpop.eup %3273  ;;  %v1176_v45 = vand.u32 2147483648, %v1164_v17  ;;  %v1174_v15 = vand.u32 2147483647, %v1164_v17  ;;  %vm1170_vm1 = vweird.f32 %v1164_v17 }
 0x334   :  { %v1185_v60 = vmul.f32 %v3274_v36, %v1183_v6  ;;  %vm1190_vm4 = vweird.f32 %v3274_v36  ;;  %v5726_v6 = vld [vmem:[#allocation55_spill] sm:$0xff] }
 0x335   :  { %v1177_v50 = vor.u32 1.1754944e-38, %v1176_v45  ;;  %vm1175_vm3 = vcmp.eq.f32.partialorder %v1174_v15, 8.507059e+37  ;;  %vm1191_vm6 = vmor %vm1189_vm5, %vm1190_vm4  ;;  %v4576_v45 = vld [vmem:[#allocation6 + $0x240] sm:$0xff]  ;;  %v4586_v15 = vld [vmem:[#allocation6 + $0x388] sm:$0xff] }
 0x336   :  { %v1186_v22 = vsub.f32 1.0, %v1185_v60  ;;  %v5735_v60 = vld [vmem:[#allocation67_spill] sm:$0xff]  ;;  %5740 = vst [vmem:[#allocation75_spill] sm:$0xff] %v4586_v15 }
 0x338   :  { %v1187_v25 = vmul.f32 %v3274_v36, %v1186_v22  ;;  %v5739_v22 = vld [vmem:[#allocation64_spill] sm:$0xff] }
 0x339   :  { %v3276_v8 = vpop.eup %3275 }
 0x33a   :  { %v1166_v54 = vmul.f32 %v3276_v8, %v1164_v17  ;;  %vm1171_vm0 = vweird.f32 %v3276_v8  ;;  %v1188_v49 = vadd.f32 %v3274_v36, %v1187_v25  ;;  %v5731_v17 = vld [vmem:[#allocation69_spill] sm:$0xff]  ;;  %v4589_v25 = vld [vmem:[#allocation6 + $0x200] sm:$0xff] }
 0x33b   :  { %vm1172_vm2 = vmor %vm1170_vm1, %vm1171_vm0 }
 0x33c   :  { %v1167_v20 = vsub.f32 1.0, %v1166_v54  ;;  %v1192_v13 = vsel %vm1191_vm6, %v3274_v36, %v1188_v49  ;;  %v5734_v36 = vld [vmem:[#allocation73_spill] sm:$0xff]  ;;  %v5738_v54 = vld [vmem:[#allocation71_spill] sm:$0xff] }
 0x33d   :  { %v1197_v5 = vsel %vm1194_vm7, %v1196_v21, %v1192_v13 }
 0x33e   :  { %v1168_v7 = vmul.f32 %v3276_v8, %v1167_v20  ;;  %v1202_v35 = vsub.f32 1.0, %v1197_v5  ;;  %v1204_v33 = vmul.f32 %v1197_v5, %v5723_v30  ;;  %v4617_v5 = vld [vmem:[#allocation6 + $0x2e8] sm:$0xff] }
 0x33f   :  { %5745 = vst [vmem:[#allocation76_spill] sm:$0xff] %v4617_v5  ;;  %v4623_v30 = vld [vmem:[#allocation6 + $0x2c8] sm:$0xff] }
 0x340   :  { %v1169_v63 = vadd.f32 %v3276_v8, %v1168_v7  ;;  %5746 = vst [vmem:[#allocation80_spill] sm:$0xff] %v4623_v30 }
 0x342   :  { %v1173_v44 = vsel %vm1172_vm2, %v3276_v8, %v1169_v63  ;;  %v5736_v8 = vld [vmem:[#allocation60_spill] sm:$0xff] }
 0x343   :  { %v1178_v58 = vsel %vm1175_vm3, %v1177_v50, %v1173_v44  ;;  %v4592_v63 = vld [vmem:[#allocation6 + $0x368] sm:$0xff]  ;;  %v4600_v44 = vld [vmem:[#allocation6 + $0x3d0] sm:$0xff] }
 0x344   :  { %v1199_v0 = vmul.f32 %v1178_v58, %v1159_v53  ;;  %5741 = vst [vmem:[#allocation68_spill] sm:$0xff] %v4592_v63  ;;  %v4598_v53 = vld [vmem:[#allocation6 + $0x348] sm:$0xff] }
 0x345   :  { %5742 = vst [vmem:[#allocation79_spill] sm:$0xff] %v4598_v53 }
 0x346   :  { %v1200_v14 = vadd.f32 %v1199_v0, %v1119_v3  ;;  %v4607_v0 = vld [vmem:[#allocation6 + $0x3b0] sm:$0xff] }
 0x348   :  { %3277 = vtanh.f32 %v1200_v14  ;;  %v4613_v14 = vld [vmem:[#allocation6 + $0x390] sm:$0xff] }
 0x34e   :  { %v3278_v52 = vpop.eup %3277 }
 0x34f   :  { %v1203_v26 = vmul.f32 %v3278_v52, %v1202_v35  ;;  %v4619_v35 = vld [vmem:[#allocation6 + $0x370] sm:$0xff] }
 0x351   :  { %v4487_v34 = vadd.f32 %v1204_v33, %v1203_v26  ;;  %v4625_v33 = vld [vmem:[#allocation6 + $0x350] sm:$0xff] }
 0x353   :  { %1242 = vmatmul.f32.vlgmr.msra.gmra.mxu2 %v4487_v34  ;;  %1426 = vmatmul.f32.vlgmr.msrb.gmra.mxu0 %v4487_v34 }
 0x354   :  { %1530 = vmatpush.msra.mxu2 %v5724_v37 }
 0x356   :  { %1531 = vmatpush.msra.mxu2 %v5725_v59  ;;  %v4629_v59 = vld [vmem:[#allocation6 + $0x2a8] sm:$0xff] }
 0x357   :  { %5747 = vst [vmem:[#allocation83_spill] sm:$0xff] %v4629_v59 }
 0x358   :  { %1532 = vmatpush.msra.mxu2 %v5726_v6  ;;  %v4631_v6 = vld [vmem:[#allocation6 + $0x330] sm:$0xff] }
 0x35a   :  { %1533 = vmatpush.msra.mxu2 %v5727_v51 }
 0x35b   :  { %1466 = vmatmul.f32.vlgmr.msrb.gmra.mxu2 %v4487_v34  ;;  %1506 = vmatmul.f32.vlgmr.msra.gmra.mxu0 %v4487_v34 }
 0x35c   :  { %1534 = vmatpush.msra.mxu2 %v5728_v57  ;;  %v4635_v57 = vld [vmem:[#allocation6 + $0x288] sm:$0xff] }
 0x35d   :  { %5748 = vst [vmem:[#allocation16_spill] sm:$0xff] %v4635_v57 }
 0x35e   :  { %1535 = vmatpush.msra.mxu2 %v5729_v16  ;;  %v4637_v16 = vld [vmem:[#allocation6 + $0x310] sm:$0xff] }
 0x360   :  { %1536 = vmatpush.msra.mxu2 %v5730_v32 }
 0x362   :  { %1537 = vmatpush.msra.mxu2 %v5731_v17  ;;  %v4643_v17 = vld [vmem:[#allocation6 + $0x268] sm:$0xff] }
 0x363   :  { %5749 = vst [vmem:[#allocation17_spill] sm:$0xff] %v4643_v17 }
 0x364   :  { %1538 = vmatpush.msra.mxu2 %v5732_v1  ;;  %v4645_v1 = vld [vmem:[#allocation6 + $0x2f0] sm:$0xff] }
 0x366   :  { %1539 = vmatpush.msra.mxu2 %v5733_v24  ;;  %v4650_v24 = vld [vmem:[#allocation6 + $0x248] sm:$0xff] }
 0x367   :  { %5750 = vst [vmem:[#allocation18_spill] sm:$0xff] %v4650_v24 }
 0x368   :  { %1540 = vmatpush.msra.mxu2 %v5734_v36  ;;  %v4652_v36 = vld [vmem:[#allocation6 + $0x2d0] sm:$0xff] }
 0x36a   :  { %1541 = vmatpush.msra.mxu2 %v5735_v60 }
 0x36c   :  { %1542 = vmatpush.msra.mxu2 %v5736_v8  ;;  %v4656_v8 = vld [vmem:[#allocation6 + $0x228] sm:$0xff] }
 0x36d   :  { %5751 = vst [vmem:[#allocation19_spill] sm:$0xff] %v4656_v8 }
 0x36e   :  { %1543 = vmatpush.msra.mxu2 %v5737_v55  ;;  %v4658_v55 = vld [vmem:[#allocation6 + $0x2b0] sm:$0xff] }
 0x370   :  { %1544 = vmatpush.msra.mxu2 %v5738_v54 }
 0x372   :  { %1545 = vmatpush.msra.mxu2 %v5739_v22  ;;  %v4662_v22 = vld [vmem:[#allocation6 + $0x208] sm:$0xff] }
 0x373   :  { %1546 = vmatmul.f32.vlgmr.msra.gmra.mxu2 %v4487_v34  ;;  %5752 = vst [vmem:[#allocation20_spill] sm:$0xff] %v4662_v22 }
 0x3d0   :  { %v1427_v52 = vpop.f32.mrf.mxu0 }
 0x3d6   :  { %v1243_v20 = vpop.f32.mrf.mxu2 }
 0x3d7   :  { %v1244_v28 = vadd.f32 %v3243_v2, %v1243_v20  ;;  %v4664_v2 = vld [vmem:[#allocation6 + $0x290] sm:$0xff] }
 0x3d9   :  { %1249 = vst [vmem:[#allocation11 + $0x28] sm:$0xff] %v1244_v28  ;;  %1406 = vmatmul.f32.vlgmr.msra.gmra.mxu3 %v1244_v28  ;;  %1446 = vmatmul.f32.vlgmr.msrb.gmra.mxu1 %v1244_v28 }
 0x3da   :  { %1615 = vmatpush.msra.mxu3 %v4390_v29  ;;  %v4529_v29 = vld [vmem:[#allocation6 + $0x3e0] sm:$0xff] }
 0x3db   :  { %1799 = vmatpush.msrb.mxu1 %v4529_v29 }
 0x3dc   :  { %1616 = vmatpush.msra.mxu3 %v4392_v12  ;;  %v4532_v12 = vld [vmem:[#allocation6 + $0x3c0] sm:$0xff] }
 0x3dd   :  { %1800 = vmatpush.msrb.mxu1 %v4532_v12 }
 0x3de   :  { %1617 = vmatpush.msra.mxu3 %v4396_v40  ;;  %v4535_v40 = vld [vmem:[#allocation6 + $0x3a0] sm:$0xff]  ;;  %v1467_v47 = vpop.f32.mrf.mxu2 }
 0x3df   :  { %1801 = vmatpush.msrb.mxu1 %v4535_v40 }
 0x3e0   :  { %1618 = vmatpush.msra.mxu3 %v4400_v11  ;;  %v4538_v11 = vld [vmem:[#allocation6 + $0x380] sm:$0xff] }
 0x3e1   :  { %1486 = vmatmul.f32.vlgmr.msrb.gmra.mxu3 %v1244_v28  ;;  %1526 = vmatmul.f32.vlgmr.msra.gmra.mxu1 %v1244_v28  ;;  %v4668_v28 = vld [vmem:[#allocation6 + $0x270] sm:$0xff] }
 0x3e2   :  { %1619 = vmatpush.msra.mxu3 %v4434_v41  ;;  %1802 = vmatpush.msrb.mxu1 %v4538_v11  ;;  %v4541_v41 = vld [vmem:[#allocation6 + $0x360] sm:$0xff] }
 0x3e4   :  { %1620 = vmatpush.msra.mxu3 %v4437_v42  ;;  %1803 = vmatpush.msrb.mxu1 %v4541_v41  ;;  %v4544_v42 = vld [vmem:[#allocation6 + $0x340] sm:$0xff] }
 0x3e6   :  { %1621 = vmatpush.msra.mxu3 %v4440_v9  ;;  %1804 = vmatpush.msrb.mxu1 %v4544_v42  ;;  %v4547_v9 = vld [vmem:[#allocation6 + $0x320] sm:$0xff] }
 0x3e8   :  { %1622 = vmatpush.msra.mxu3 %v4443_v27  ;;  %1805 = vmatpush.msrb.mxu1 %v4547_v9  ;;  %v4550_v27 = vld [vmem:[#allocation6 + $0x300] sm:$0xff] }
 0x3ea   :  { %1623 = vmatpush.msra.mxu3 %v4446_v39  ;;  %1806 = vmatpush.msrb.mxu1 %v4550_v27  ;;  %v4553_v39 = vld [vmem:[#allocation6 + $0x2e0] sm:$0xff] }
 0x3ec   :  { %1624 = vmatpush.msra.mxu3 %v4449_v62  ;;  %1807 = vmatpush.msrb.mxu1 %v4553_v39  ;;  %v4556_v62 = vld [vmem:[#allocation6 + $0x2c0] sm:$0xff] }
 0x3ee   :  { %1625 = vmatpush.msra.mxu3 %v4452_v38  ;;  %1808 = vmatpush.msrb.mxu1 %v4556_v62  ;;  %v4559_v38 = vld [vmem:[#allocation6 + $0x2a0] sm:$0xff] }
 0x3f0   :  { %1626 = vmatpush.msra.mxu3 %v4455_v43  ;;  %1809 = vmatpush.msrb.mxu1 %v4559_v38  ;;  %v4562_v43 = vld [vmem:[#allocation6 + $0x280] sm:$0xff] }
 0x3f2   :  { %1627 = vmatpush.msra.mxu3 %v4458_v19  ;;  %1810 = vmatpush.msrb.mxu1 %v4562_v43  ;;  %v4565_v19 = vld [vmem:[#allocation6 + $0x3e8] sm:$0xff] }
 0x3f4   :  { %1628 = vmatpush.msra.mxu3 %v4461_v46  ;;  %v4568_v46 = vld [vmem:[#allocation6 + $0x260] sm:$0xff] }
 0x3f5   :  { %1811 = vmatpush.msrb.mxu1 %v4568_v46 }
 0x3f6   :  { %1629 = vmatpush.msra.mxu3 %v4464_v48  ;;  %v4571_v48 = vld [vmem:[#allocation6 + $0x3c8] sm:$0xff] }
 0x3f7   :  { %1812 = vmatpush.msrb.mxu1 %v4576_v45 }
 0x3f8   :  { %1630 = vmatpush.msra.mxu3 %v4467_v23  ;;  %v4573_v23 = vld [vmem:[#allocation8] sm:$0xf] }
 0x3f9   :  { %v1383_v7 = vperm.slane %v4573_v23, 1  ;;  %1813 = vmatpush.msrb.mxu1 %v4582_v4  ;;  %v1382_v49 = vperm.slane %v4573_v23, 0 }
 0x3fa   :  { %1839 = vmatpush.msrb.mxu3 %v4565_v19 }
 0x3fb   :  { %1814 = vmatpush.msrb.mxu1 %v4589_v25 }
 0x3fc   :  { %1840 = vmatpush.msrb.mxu3 %v4571_v48 }
 0x3fd   :  { %1879 = vmatpush.msra.mxu1 %v4594_v56 }
 0x3fe   :  { %1841 = vmatpush.msrb.mxu3 %v4579_v18 }
 0x3ff   :  { %1880 = vmatpush.msra.mxu1 %v4600_v44 }
 0x400   :  { %1842 = vmatpush.msrb.mxu3 %v4586_v15  ;;  %v1683_v15 = vld [vmem:[#allocation6 + $0x150] sm:$0xff] }
 0x401   :  { %1881 = vmatpush.msra.mxu1 %v4607_v0 }
 0x402   :  { %1843 = vmatpush.msrb.mxu3 %v4592_v63  ;;  %v1688_v63 = vld [vmem:[#allocation6 + $0x178] sm:$0xff] }
 0x403   :  { %1882 = vmatpush.msra.mxu1 %v4613_v14 }
 0x404   :  { %1844 = vmatpush.msrb.mxu3 %v4598_v53  ;;  %v1696_v53 = vld [vmem:[#allocation6 + $0x1b8] sm:$0xff] }
 0x405   :  { %1883 = vmatpush.msra.mxu1 %v4619_v35 }
 0x406   :  { %1845 = vmatpush.msrb.mxu3 %v4605_v61 }
 0x407   :  { %1884 = vmatpush.msra.mxu1 %v4625_v33 }
 0x408   :  { %1846 = vmatpush.msrb.mxu3 %v4611_v10  ;;  %v1507_v10 = vpop.f32.mrf.mxu0 }
 0x409   :  { %1885 = vmatpush.msra.mxu1 %v4631_v6 }
 0x40a   :  { %1847 = vmatpush.msrb.mxu3 %v4617_v5 }
 0x40b   :  { %1886 = vmatpush.msra.mxu1 %v4637_v16 }
 0x40c   :  { %1848 = vmatpush.msrb.mxu3 %v4623_v30 }
 0x40d   :  { %1887 = vmatpush.msra.mxu1 %v4645_v1 }
 0x40e   :  { %1849 = vmatpush.msrb.mxu3 %v4629_v59  ;;  %v1547_v59 = vpop.f32.mrf.mxu2 }
 0x40f   :  { %1888 = vmatpush.msra.mxu1 %v4652_v36 }
 0x410   :  { %1850 = vmatpush.msrb.mxu3 %v4635_v57 }
 0x411   :  { %1889 = vmatpush.msra.mxu1 %v4658_v55 }
 0x412   :  { %1851 = vmatpush.msrb.mxu3 %v4643_v17 }
 0x413   :  { %1890 = vmatpush.msra.mxu1 %v4664_v2 }
 0x414   :  { %1852 = vmatpush.msrb.mxu3 %v4650_v24 }
 0x415   :  { %1891 = vmatpush.msra.mxu1 %v4668_v28 }
 0x416   :  { %1853 = vmatpush.msrb.mxu3 %v4656_v8 }
 0x418   :  { %1854 = vmatpush.msrb.mxu3 %v4662_v22 }
 0x456   :  { %v1447_v31 = vpop.f32.mrf.mxu1 }
 0x457   :  { %v1448_v50 = vadd.f32 %v1447_v31, %v1383_v7  ;;  %v4671_v7 = vld [vmem:[#allocation6 + $0x250] sm:$0xff] }
 0x458   :  { %1892 = vmatpush.msra.mxu1 %v4671_v7 }
 0x459   :  { %v1468_v58 = vadd.f32 %v1467_v47, %v1448_v50  ;;  %v4675_v50 = vld [vmem:[#allocation6 + $0x230] sm:$0xff] }
 0x45a   :  { %1893 = vmatpush.msra.mxu1 %v4675_v50 }
 0x45b   :  { %v3222_v3 = vmul.f32 -1.442695, %v1468_v58  ;;  %v1385_v58 = vperm.slane %v4573_v23, 3 }
 0x45c   :  { %v1407_v13 = vpop.f32.mrf.mxu3 }
 0x45d   :  { %3279 = vpow2.f32 %v3222_v3  ;;  %v1408_v21 = vadd.f32 %v1407_v13, %v1382_v49  ;;  %v4679_v3 = vld [vmem:[#allocation6 + $0x210] sm:$0xff] }
 0x45e   :  { %1894 = vmatpush.msra.mxu1 %v4679_v3 }
 0x45f   :  { %v1428_v26 = vadd.f32 %v1427_v52, %v1408_v21  ;;  %v1527_v21 = vpop.f32.mrf.mxu1 }
 0x461   :  { %v3221_v37 = vmul.f32 -1.442695, %v1428_v26  ;;  %v1384_v26 = vperm.slane %v4573_v23, 2 }
 0x463   :  { %v3280_v51 = vpop.eup %3279  ;;  %3281 = vpow2.f32 %v3221_v37 }
 0x464   :  { %v4639_v32 = vadd.f32 1.0, %v3280_v51  ;;  %v1487_v51 = vpop.f32.mrf.mxu3 }
 0x465   :  { %v1488_v57 = vadd.f32 %v1487_v51, %v1384_v26  ;;  %v1693_v26 = vld [vmem:[#allocation6 + $0x1a0] sm:$0xff]  ;;  %v4706_v51 = vld [vmem:[#allocation6 + $0x398] sm:$0xff] }
 0x466   :  { %3283 = vrcp.f32 %v4639_v32  ;;  %v1584_v61 = vand.u32 2147483648, %v4639_v32  ;;  %vm1578_vm13 = vweird.f32 %v4639_v32  ;;  %5757 = vst [vmem:[#allocation25_spill] sm:$0xff] %v4706_v51 }
 0x469   :  { %v3282_v60 = vpop.eup %3281 }
 0x46a   :  { %v1553_v54 = vadd.f32 1.0, %v3282_v60  ;;  %v1528_v60 = vadd.f32 %v1527_v21, %v1385_v58  ;;  %v1508_v21 = vadd.f32 %v1507_v10, %v1488_v57  ;;  %v4691_v10 = vld [vmem:[#allocation6 + $0x3d8] sm:$0xff]  ;;  %v1701_v57 = vld [vmem:[#allocation6 + $0x1e0] sm:$0xff] }
 0x46b   :  { %5755 = vst [vmem:[#allocation23_spill] sm:$0xff] %v4691_v10  ;;  %1779 = vmatpush.msrb.mxu0 %v1701_v57 }
 0x46c   :  { %3285 = vrcp.f32 %v1553_v54  ;;  %v3284_v20 = vpop.eup %3283  ;;  %v1565_v37 = vand.u32 2147483648, %v1553_v54  ;;  %v1563_v8 = vand.u32 2147483647, %v1553_v54  ;;  %vm1559_vm9 = vweird.f32 %v1553_v54 }
 0x46d   :  { %v1574_v31 = vmul.f32 %v3284_v20, %v4639_v32  ;;  %vm1579_vm12 = vweird.f32 %v3284_v20 }
 0x46e   :  { %v1566_v30 = vor.u32 1.1754944e-38, %v1565_v37  ;;  %vm1564_vm11 = vcmp.eq.f32.partialorder %v1563_v8, 8.507059e+37  ;;  %vm1580_vm14 = vmor %vm1578_vm13, %vm1579_vm12  ;;  %v4704_v37 = vld [vmem:[#allocation6 + $0x1a8] sm:$0xff] }
 0x46f   :  { %v1575_v13 = vsub.f32 1.0, %v1574_v31  ;;  %v1548_v31 = vadd.f32 %v1547_v59, %v1528_v60  ;;  %v1689_v60 = vld [vmem:[#allocation6 + $0x180] sm:$0xff] }
 0x471   :  { %v1576_v24 = vmul.f32 %v3284_v20, %v1575_v13 }
 0x472   :  { %v3286_v47 = vpop.eup %3285 }
 0x473   :  { %v1555_v49 = vmul.f32 %v3286_v47, %v1553_v54  ;;  %vm1560_vm8 = vweird.f32 %v3286_v47  ;;  %v1577_v23 = vadd.f32 %v3284_v20, %v1576_v24  ;;  %v4689_v24 = vld [vmem:[#allocation6 + $0x3f8] sm:$0xff] }
 0x474   :  { %vm1561_vm10 = vmor %vm1559_vm9, %vm1560_vm8  ;;  %5754 = vst [vmem:[#allocation22_spill] sm:$0xff] %v4689_v24 }
 0x475   :  { %v1556_v52 = vsub.f32 1.0, %v1555_v49  ;;  %v1581_v13 = vsel %vm1580_vm14, %v3284_v20, %v1577_v23  ;;  %v4698_v20 = vld [vmem:[#allocation6 + $0x1c8] sm:$0xff]  ;;  %v1685_v23 = vld [vmem:[#allocation6 + $0x160] sm:$0xff] }
 0x477   :  { %v1557_v22 = vmul.f32 %v3286_v47, %v1556_v52  ;;  %v1585_v52 = vor.u32 1.1754944e-38, %v1584_v61  ;;  %v4695_v61 = vld [vmem:[#allocation6 + $0x1e8] sm:$0xff] }
 0x478   :  { %1819 = vmatpush.msrb.mxu2 %v4695_v61 }
 0x479   :  { %v1558_v17 = vadd.f32 %v3286_v47, %v1557_v22  ;;  %v1582_v22 = vand.u32 2147483647, %v4639_v32  ;;  %v1697_v32 = vld [vmem:[#allocation6 + $0x1c0] sm:$0xff] }
 0x47a   :  { %1780 = vmatpush.msrb.mxu0 %v1697_v32  ;;  %1820 = vmatpush.msrb.mxu2 %v4698_v20 }
 0x47b   :  { %v1562_v5 = vsel %vm1561_vm10, %v3286_v47, %v1558_v17  ;;  %vm1583_vm15 = vcmp.eq.f32.partialorder %v1582_v22, 8.507059e+37  ;;  %v1681_v22 = vld [vmem:[#allocation6 + $0x140] sm:$0xff] }
 0x47c   :  { %v1567_v49 = vsel %vm1564_vm11, %v1566_v30, %v1562_v5  ;;  %v1586_v59 = vsel %vm1583_vm15, %v1585_v52, %v1581_v13  ;;  %1781 = vmatpush.msrb.mxu0 %v1693_v26  ;;  %1821 = vmatpush.msrb.mxu2 %v4704_v37  ;;  %v4726_v13 = vld [vmem:[#allocation6 + $0x148] sm:$0xff]  ;;  %v1677_v52 = vld [vmem:[#allocation6 + $0x120] sm:$0xff] }
 0x47d   :  { %v1588_v58 = vmul.f32 %v1567_v49, %v1548_v31  ;;  %v1591_v17 = vsub.f32 1.0, %v1586_v59  ;;  %v1593_v5 = vmul.f32 %v1586_v59, %v4487_v34  ;;  %v4700_v34 = vld [vmem:[#allocation6 + $0x3b8] sm:$0xff]  ;;  %v4713_v49 = vld [vmem:[#allocation6 + $0x188] sm:$0xff] }
 0x47e   :  { %5756 = vst [vmem:[#allocation24_spill] sm:$0xff] %v4700_v34  ;;  %v4710_v31 = vld [vmem:[#allocation6 + $0x378] sm:$0xff]  ;;  %1782 = vmatpush.msrb.mxu0 %v1689_v60  ;;  %1822 = vmatpush.msrb.mxu2 %v4713_v49 }
 0x47f   :  { %v1589_v54 = vadd.f32 %v1588_v58, %v1508_v21  ;;  %5758 = vst [vmem:[#allocation26_spill] sm:$0xff] %v4710_v31  ;;  %v4718_v58 = vld [vmem:[#allocation6 + $0x358] sm:$0xff]  ;;  %v4720_v21 = vld [vmem:[#allocation6 + $0x168] sm:$0xff] }
 0x480   :  { %5759 = vst [vmem:[#allocation27_spill] sm:$0xff] %v4718_v58  ;;  %1783 = vmatpush.msrb.mxu0 %v1685_v23  ;;  %1823 = vmatpush.msrb.mxu2 %v4720_v21  ;;  %v4730_v59 = vld [vmem:[#allocation6 + $0x318] sm:$0xff] }
 0x481   :  { %3287 = vtanh.f32 %v1589_v54  ;;  %v4724_v54 = vld [vmem:[#allocation6 + $0x338] sm:$0xff]  ;;  %5761 = vst [vmem:[#allocation29_spill] sm:$0xff] %v4730_v59 }
 0x482   :  { %5760 = vst [vmem:[#allocation28_spill] sm:$0xff] %v4724_v54  ;;  %1784 = vmatpush.msrb.mxu0 %v1681_v22  ;;  %1824 = vmatpush.msrb.mxu2 %v4726_v13 }
 0x484   :  { %1785 = vmatpush.msrb.mxu0 %v1677_v52 }
 0x487   :  { %v3288_v8 = vpop.eup %3287 }
 0x488   :  { %v1592_v47 = vmul.f32 %v3288_v8, %v1591_v17  ;;  %v4732_v17 = vld [vmem:[#allocation6 + $0x128] sm:$0xff]  ;;  %v1673_v8 = vld [vmem:[#allocation6 + $0x100] sm:$0xff] }
 0x489   :  { %1825 = vmatpush.msrb.mxu2 %v4732_v17  ;;  %1786 = vmatpush.msrb.mxu0 %v1673_v8 }
 0x48a   :  { %v4687_v30 = vadd.f32 %v1593_v5, %v1592_v47  ;;  %v4736_v47 = vld [vmem:[#allocation6 + $0x2f8] sm:$0xff]  ;;  %v4738_v5 = vld [vmem:[#allocation6 + $0x108] sm:$0xff] }
 0x48b   :  { %5762 = vst [vmem:[#allocation30_spill] sm:$0xff] %v4736_v47  ;;  %1826 = vmatpush.msrb.mxu2 %v4738_v5 }
 0x48c   :  { %5753 = vst [vmem:[#allocation21_spill] sm:$0xff] %v4687_v30  ;;  %1631 = vmatmul.f32.vlgmr.msra.gmra.mxu3 %v4687_v30  ;;  %1815 = vmatmul.f32.vlgmr.msrb.gmra.mxu1 %v4687_v30 }
 0x48d   :  { %1919 = vmatpush.msra.mxu3 %v4689_v24  ;;  %2168 = vmatpush.msrb.mxu1 %v1701_v57  ;;  %v1669_v57 = vld [vmem:[#allocation6 + $0xe0] sm:$0xff]  ;;  %v1703_v24 = vld [vmem:[#allocation6 + $0x1f0] sm:$0xff] }
 0x48e   :  { %1787 = vmatpush.msrb.mxu0 %v1669_v57 }
 0x48f   :  { %1920 = vmatpush.msra.mxu3 %v4691_v10  ;;  %2169 = vmatpush.msrb.mxu1 %v1697_v32  ;;  %v4742_v32 = vld [vmem:[#allocation6 + $0x2d8] sm:$0xff]  ;;  %v1642_v10 = vld [vmem:[#allocation6 + $0x8] sm:$0xff] }
 0x490   :  { %5763 = vst [vmem:[#allocation32_spill] sm:$0xff] %v4742_v32 }
 0x491   :  { %1921 = vmatpush.msra.mxu3 %v4700_v34  ;;  %2170 = vmatpush.msrb.mxu1 %v1693_v26  ;;  %v4744_v26 = vld [vmem:[#allocation6 + $0xe8] sm:$0xff]  ;;  %v4778_v34 = vld [vmem:[#allocation6 + $0x218] sm:$0xff] }
 0x492   :  { %1827 = vmatpush.msrb.mxu2 %v4744_v26  ;;  %5769 = vst [vmem:[#allocation51_spill] sm:$0xff] %v4778_v34 }
 0x493   :  { %1922 = vmatpush.msra.mxu3 %v4706_v51  ;;  %2171 = vmatpush.msrb.mxu1 %v1689_v60  ;;  %v1665_v60 = vld [vmem:[#allocation6 + $0xc0] sm:$0xff]  ;;  %v4772_v51 = vld [vmem:[#allocation6 + $0x238] sm:$0xff] }
 0x494   :  { %1855 = vmatmul.f32.vlgmr.msrb.gmra.mxu3 %v4687_v30  ;;  %1895 = vmatmul.f32.vlgmr.msra.gmra.mxu1 %v4687_v30  ;;  %5768 = vst [vmem:[#allocation48_spill] sm:$0xff] %v4772_v51 }
 0x495   :  { %1923 = vmatpush.msra.mxu3 %v4710_v31  ;;  %2172 = vmatpush.msrb.mxu1 %v1685_v23  ;;  %v4748_v23 = vld [vmem:[#allocation6 + $0x2b8] sm:$0xff] }
 0x496   :  { %5764 = vst [vmem:[#allocation34_spill] sm:$0xff] %v4748_v23  ;;  %1788 = vmatpush.msrb.mxu0 %v1665_v60  ;;  %v4766_v31 = vld [vmem:[#allocation6 + $0x258] sm:$0xff] }
 0x497   :  { %1924 = vmatpush.msra.mxu3 %v4718_v58  ;;  %2173 = vmatpush.msrb.mxu1 %v1681_v22  ;;  %v4750_v22 = vld [vmem:[#allocation6 + $0xc8] sm:$0xff]  ;;  %v4760_v58 = vld [vmem:[#allocation6 + $0x278] sm:$0xff]  ;;  %5767 = vst [vmem:[#allocation44_spill] sm:$0xff] %v4766_v31 }
 0x498   :  { %1828 = vmatpush.msrb.mxu2 %v4750_v22  ;;  %5766 = vst [vmem:[#allocation40_spill] sm:$0xff] %v4760_v58 }
 0x499   :  { %1925 = vmatpush.msra.mxu3 %v4724_v54  ;;  %2174 = vmatpush.msrb.mxu1 %v1677_v52  ;;  %v4754_v54 = vld [vmem:[#allocation6 + $0x298] sm:$0xff]  ;;  %v4756_v52 = vld [vmem:[#allocation6 + $0xa8] sm:$0xff] }
 0x49a   :  { %5765 = vst [vmem:[#allocation37_spill] sm:$0xff] %v4754_v54  ;;  %1829 = vmatpush.msrb.mxu2 %v4756_v52 }
 0x49b   :  { %1926 = vmatpush.msra.mxu3 %v4730_v59  ;;  %2175 = vmatpush.msrb.mxu1 %v1673_v8  ;;  %v1661_v59 = vld [vmem:[#allocation6 + $0xa0] sm:$0xff]  ;;  %v4762_v8 = vld [vmem:[#allocation6 + $0x88] sm:$0xff] }
 0x49c   :  { %1789 = vmatpush.msrb.mxu0 %v1661_v59  ;;  %1830 = vmatpush.msrb.mxu2 %v4762_v8 }
 0x49d   :  { %1927 = vmatpush.msra.mxu3 %v4736_v47  ;;  %2176 = vmatpush.msrb.mxu1 %v1669_v57  ;;  %v1657_v47 = vld [vmem:[#allocation6 + $0x80] sm:$0xff]  ;;  %v4768_v57 = vld [vmem:[#allocation6 + $0x68] sm:$0xff] }
 0x49e   :  { %1790 = vmatpush.msrb.mxu0 %v1657_v47  ;;  %1831 = vmatpush.msrb.mxu2 %v4768_v57 }
 0x49f   :  { %1928 = vmatpush.msra.mxu3 %v4742_v32  ;;  %2177 = vmatpush.msrb.mxu1 %v1665_v60  ;;  %v1653_v32 = vld [vmem:[#allocation6 + $0x60] sm:$0xff]  ;;  %v4774_v60 = vld [vmem:[#allocation6 + $0x48] sm:$0xff] }
 0x4a0   :  { %1791 = vmatpush.msrb.mxu0 %v1653_v32  ;;  %1832 = vmatpush.msrb.mxu2 %v4774_v60 }
 0x4a1   :  { %1929 = vmatpush.msra.mxu3 %v4748_v23  ;;  %2178 = vmatpush.msrb.mxu1 %v1661_v59  ;;  %v1649_v23 = vld [vmem:[#allocation6 + $0x40] sm:$0xff]  ;;  %v4780_v59 = vld [vmem:[#allocation6 + $0x28] sm:$0xff] }
 0x4a2   :  { %1792 = vmatpush.msrb.mxu0 %v1649_v23  ;;  %1833 = vmatpush.msrb.mxu2 %v4780_v59 }
 0x4a3   :  { %1930 = vmatpush.msra.mxu3 %v4754_v54  ;;  %2179 = vmatpush.msrb.mxu1 %v1657_v47  ;;  %v1645_v54 = vld [vmem:[#allocation6 + $0x20] sm:$0xff]  ;;  %v1704_v47 = vld [vmem:[#allocation6 + $0x1f8] sm:$0xff] }
 0x4a4   :  { %1793 = vmatpush.msrb.mxu0 %v1645_v54  ;;  %1834 = vmatpush.msrb.mxu2 %v1642_v10 }
 0x4a5   :  { %1931 = vmatpush.msra.mxu3 %v4760_v58  ;;  %2180 = vmatpush.msrb.mxu1 %v1653_v32  ;;  %v1641_v58 = vld [vmem:[#allocation6] sm:$0xff]  ;;  %v1700_v32 = vld [vmem:[#allocation6 + $0x1d8] sm:$0xff] }
 0x4a6   :  { %1794 = vmatpush.msrb.mxu0 %v1641_v58  ;;  %1899 = vmatpush.msra.mxu2 %v1704_v47 }
 0x4a7   :  { %1932 = vmatpush.msra.mxu3 %v4766_v31  ;;  %2181 = vmatpush.msrb.mxu1 %v1649_v23  ;;  %v1699_v31 = vld [vmem:[#allocation6 + $0x1d0] sm:$0xff] }
 0x4a8   :  { %1859 = vmatpush.msra.mxu0 %v1703_v24  ;;  %1900 = vmatpush.msra.mxu2 %v1700_v32  ;;  %v1691_v23 = vld [vmem:[#allocation6 + $0x190] sm:$0xff] }
 0x4a9   :  { %1933 = vmatpush.msra.mxu3 %v4772_v51  ;;  %v1695_v51 = vld [vmem:[#allocation6 + $0x1b0] sm:$0xff]  ;;  %2182 = vmatpush.msrb.mxu1 %v1645_v54 }
 0x4aa   :  { %1860 = vmatpush.msra.mxu0 %v1699_v31  ;;  %1901 = vmatpush.msra.mxu2 %v1696_v53  ;;  %v1679_v54 = vld [vmem:[#allocation6 + $0x130] sm:$0xff] }
 0x4ab   :  { %1934 = vmatpush.msra.mxu3 %v4778_v34  ;;  %v1692_v34 = vld [vmem:[#allocation6 + $0x198] sm:$0xff]  ;;  %2183 = vmatpush.msrb.mxu1 %v1641_v58 }
 0x4ac   :  { %1935 = vmatmul.f32.vlgmr.msra.gmra.mxu3 %v4687_v30  ;;  %1861 = vmatpush.msra.mxu0 %v1695_v51  ;;  %v1687_v30 = vld [vmem:[#allocation6 + $0x170] sm:$0xff]  ;;  %v1656_v58 = vld [vmem:[#allocation6 + $0x78] sm:$0xff] }
 0x4ad   :  { %2208 = vmatpush.msrb.mxu3 %v4695_v61  ;;  %2248 = vmatpush.msra.mxu1 %v1703_v24  ;;  %v1684_v61 = vld [vmem:[#allocation6 + $0x158] sm:$0xff]  ;;  %v1671_v24 = vld [vmem:[#allocation6 + $0xf0] sm:$0xff] }
 0x4ae   :  { %1862 = vmatpush.msra.mxu0 %v1691_v23  ;;  %1902 = vmatpush.msra.mxu2 %v1692_v34 }
 0x4af   :  { %2209 = vmatpush.msrb.mxu3 %v4698_v20  ;;  %2249 = vmatpush.msra.mxu1 %v1699_v31  ;;  %v1680_v20 = vld [vmem:[#allocation6 + $0x138] sm:$0xff] }
 0x4b0   :  { %1863 = vmatpush.msra.mxu0 %v1687_v30  ;;  %1903 = vmatpush.msra.mxu2 %v1688_v63  ;;  %v1668_v31 = vld [vmem:[#allocation6 + $0xd8] sm:$0xff] }
 0x4b1   :  { %2210 = vmatpush.msrb.mxu3 %v4704_v37  ;;  %2250 = vmatpush.msra.mxu1 %v1695_v51  ;;  %v1672_v37 = vld [vmem:[#allocation6 + $0xf8] sm:$0xff]  ;;  %v1667_v51 = vld [vmem:[#allocation6 + $0xd0] sm:$0xff] }
 0x4b2   :  { %1864 = vmatpush.msra.mxu0 %v1683_v15  ;;  %1904 = vmatpush.msra.mxu2 %v1684_v61 }
 0x4b3   :  { %2211 = vmatpush.msrb.mxu3 %v4713_v49  ;;  %2251 = vmatpush.msra.mxu1 %v1691_v23  ;;  %v1655_v49 = vld [vmem:[#allocation6 + $0x70] sm:$0xff]  ;;  %v4819_v23 = vld [vmem:[#allocation9 + $0x58] sm:$0xff] }
 0x4b4   :  { %1865 = vmatpush.msra.mxu0 %v1679_v54  ;;  %1905 = vmatpush.msra.mxu2 %v1680_v20 }
 0x4b5   :  { %2212 = vmatpush.msrb.mxu3 %v4720_v21  ;;  %2252 = vmatpush.msra.mxu1 %v1687_v30  ;;  %v1676_v30 = vld [vmem:[#allocation6 + $0x118] sm:$0xff]  ;;  %v1651_v21 = vld [vmem:[#allocation6 + $0x50] sm:$0xff] }
 0x4b6   :  { %1906 = vmatpush.msra.mxu2 %v1676_v30 }
 0x4b7   :  { %2213 = vmatpush.msrb.mxu3 %v4726_v13  ;;  %2253 = vmatpush.msra.mxu1 %v1683_v15  ;;  %v1675_v15 = vld [vmem:[#allocation6 + $0x110] sm:$0xff]  ;;  %v1652_v13 = vld [vmem:[#allocation6 + $0x58] sm:$0xff] }
 0x4b8   :  { %1866 = vmatpush.msra.mxu0 %v1675_v15  ;;  %1907 = vmatpush.msra.mxu2 %v1672_v37 }
 0x4b9   :  { %2214 = vmatpush.msrb.mxu3 %v4732_v17  ;;  %2254 = vmatpush.msra.mxu1 %v1679_v54  ;;  %v1647_v17 = vld [vmem:[#allocation6 + $0x30] sm:$0xff] }
 0x4ba   :  { %1867 = vmatpush.msra.mxu0 %v1671_v24  ;;  %1908 = vmatpush.msra.mxu2 %v1668_v31 }
 0x4bb   :  { %2215 = vmatpush.msrb.mxu3 %v4738_v5  ;;  %2255 = vmatpush.msra.mxu1 %v1675_v15  ;;  %v1648_v5 = vld [vmem:[#allocation6 + $0x38] sm:$0xff]  ;;  %v5782_v15 = vld [vmem:[#allocation20_spill] sm:$0xff] }
 0x4bc   :  { %1868 = vmatpush.msra.mxu0 %v1667_v51 }
 0x4bd   :  { %2216 = vmatpush.msrb.mxu3 %v4744_v26  ;;  %2256 = vmatpush.msra.mxu1 %v1671_v24  ;;  %v1643_v26 = vld [vmem:[#allocation6 + $0x10] sm:$0xff] }
 0x4bf   :  { %2217 = vmatpush.msrb.mxu3 %v4750_v22  ;;  %2257 = vmatpush.msra.mxu1 %v1667_v51  ;;  %v1644_v22 = vld [vmem:[#allocation6 + $0x18] sm:$0xff] }
 0x4c1   :  { %2218 = vmatpush.msrb.mxu3 %v4756_v52  ;;  %v3244_v52 = vld [vmem:[%s5378_s4] ss:$0 sm:$0xff] }
 0x4c3   :  { %2219 = vmatpush.msrb.mxu3 %v4762_v8 }
 0x4c5   :  { %2220 = vmatpush.msrb.mxu3 %v4768_v57 }
 0x4c7   :  { %2221 = vmatpush.msrb.mxu3 %v4774_v60  ;;  %v4805_v60 = vld [vmem:[#allocation9 + $0x78] sm:$0xff] }
 0x4c9   :  { %2222 = vmatpush.msrb.mxu3 %v4780_v59  ;;  %v4807_v59 = vld [vmem:[#allocation9 + $0x70] sm:$0xff] }
 0x4cb   :  { %2223 = vmatpush.msrb.mxu3 %v1642_v10  ;;  %v1659_v10 = vld [vmem:[#allocation6 + $0x90] sm:$0xff] }
 0x4cd   :  { %2288 = vmatpush.msra.mxu3 %v1704_v47  ;;  %v4811_v47 = vld [vmem:[#allocation9 + $0x68] sm:$0xff] }
 0x4cf   :  { %2289 = vmatpush.msra.mxu3 %v1700_v32  ;;  %v4815_v32 = vld [vmem:[#allocation9 + $0x60] sm:$0xff] }
 0x4d1   :  { %2290 = vmatpush.msra.mxu3 %v1696_v53  ;;  %v1663_v53 = vld [vmem:[#allocation6 + $0xb0] sm:$0xff] }
 0x4d2   :  { %1869 = vmatpush.msra.mxu0 %v1663_v53  ;;  %2258 = vmatpush.msra.mxu1 %v1663_v53 }
 0x4d3   :  { %2291 = vmatpush.msra.mxu3 %v1692_v34  ;;  %v1660_v34 = vld [vmem:[#allocation6 + $0x98] sm:$0xff] }
 0x4d4   :  { %1870 = vmatpush.msra.mxu0 %v1659_v10  ;;  %2259 = vmatpush.msra.mxu1 %v1659_v10 }
 0x4d5   :  { %2292 = vmatpush.msra.mxu3 %v1688_v63  ;;  %v1664_v63 = vld [vmem:[#allocation6 + $0xb8] sm:$0xff] }
 0x4d6   :  { %1909 = vmatpush.msra.mxu2 %v1664_v63  ;;  %1871 = vmatpush.msra.mxu0 %v1655_v49 }
 0x4d7   :  { %2293 = vmatpush.msra.mxu3 %v1684_v61  ;;  %2260 = vmatpush.msra.mxu1 %v1655_v49 }
 0x4d8   :  { %1910 = vmatpush.msra.mxu2 %v1660_v34  ;;  %1872 = vmatpush.msra.mxu0 %v1651_v21 }
 0x4d9   :  { %2294 = vmatpush.msra.mxu3 %v1680_v20  ;;  %2261 = vmatpush.msra.mxu1 %v1651_v21  ;;  %v5781_v20 = vld [vmem:[#allocation19_spill] sm:$0xff] }
 0x4da   :  { %1911 = vmatpush.msra.mxu2 %v1656_v58  ;;  %1873 = vmatpush.msra.mxu0 %v1647_v17 }
 0x4db   :  { %2295 = vmatpush.msra.mxu3 %v1676_v30  ;;  %2262 = vmatpush.msra.mxu1 %v1647_v17 }
 0x4dc   :  { %1912 = vmatpush.msra.mxu2 %v1652_v13  ;;  %1874 = vmatpush.msra.mxu0 %v1643_v26 }
 0x4dd   :  { %2296 = vmatpush.msra.mxu3 %v1672_v37  ;;  %2263 = vmatpush.msra.mxu1 %v1643_v26 }
 0x4de   :  { %1913 = vmatpush.msra.mxu2 %v1648_v5 }
 0x4df   :  { %2297 = vmatpush.msra.mxu3 %v1668_v31 }
 0x4e0   :  { %1914 = vmatpush.msra.mxu2 %v1644_v22 }
 0x4e1   :  { %2298 = vmatpush.msra.mxu3 %v1664_v63 }
 0x4e3   :  { %2299 = vmatpush.msra.mxu3 %v1660_v34 }
 0x4e5   :  { %2300 = vmatpush.msra.mxu3 %v1656_v58 }
 0x4e7   :  { %2301 = vmatpush.msra.mxu3 %v1652_v13 }
 0x4e9   :  { %2302 = vmatpush.msra.mxu3 %v1648_v5 }
 0x4eb   :  { %2303 = vmatpush.msra.mxu3 %v1644_v22 }
 0x50f   :  { %v1632_v8 = vpop.f32.mrf.mxu3 }
 0x510   :  { %v1633_v57 = vadd.f32 %v3244_v52, %v1632_v8 }
 0x512   :  { %1638 = vst [vmem:[#allocation11 + $0x20] sm:$0xff] %v1633_v57  ;;  %1795 = vmatmul.f32.vlgmr.msrb.gmra.mxu0 %v1633_v57  ;;  %1835 = vmatmul.f32.vlgmr.msrb.gmra.mxu2 %v1633_v57 }
 0x513   :  { %2004 = vmatpush.msrb.mxu0 %v4805_v60  ;;  %2188 = vmatpush.msrb.mxu2 %v4529_v29  ;;  %v4823_v29 = vld [vmem:[#allocation9 + $0x50] sm:$0xff] }
 0x515   :  { %2005 = vmatpush.msrb.mxu0 %v4807_v59  ;;  %2189 = vmatpush.msrb.mxu2 %v4532_v12  ;;  %v4827_v12 = vld [vmem:[#allocation9 + $0x48] sm:$0xff] }
 0x517   :  { %2006 = vmatpush.msrb.mxu0 %v4811_v47  ;;  %2190 = vmatpush.msrb.mxu2 %v4535_v40  ;;  %v4858_v40 = vld [vmem:[#allocation9 + $0x40] sm:$0xff] }
 0x519   :  { %2007 = vmatpush.msrb.mxu0 %v4815_v32  ;;  %2191 = vmatpush.msrb.mxu2 %v4538_v11  ;;  %v4861_v11 = vld [vmem:[#allocation9 + $0x38] sm:$0xff] }
 0x51a   :  { %1875 = vmatmul.f32.vlgmr.msra.gmra.mxu0 %v1633_v57  ;;  %1915 = vmatmul.f32.vlgmr.msra.gmra.mxu2 %v1633_v57 }
 0x51b   :  { %2008 = vmatpush.msrb.mxu0 %v4819_v23  ;;  %2192 = vmatpush.msrb.mxu2 %v4541_v41  ;;  %v4864_v41 = vld [vmem:[#allocation9 + $0x30] sm:$0xff] }
 0x51d   :  { %2009 = vmatpush.msrb.mxu0 %v4823_v29  ;;  %2193 = vmatpush.msrb.mxu2 %v4544_v42  ;;  %v4867_v42 = vld [vmem:[#allocation9 + $0x28] sm:$0xff] }
 0x51f   :  { %2010 = vmatpush.msrb.mxu0 %v4827_v12  ;;  %2194 = vmatpush.msrb.mxu2 %v4547_v9  ;;  %v4870_v9 = vld [vmem:[#allocation9 + $0x20] sm:$0xff] }
 0x521   :  { %2195 = vmatpush.msrb.mxu2 %v4550_v27  ;;  %2011 = vmatpush.msrb.mxu0 %v4858_v40  ;;  %v4873_v27 = vld [vmem:[#allocation9 + $0x18] sm:$0xff] }
 0x523   :  { %2196 = vmatpush.msrb.mxu2 %v4553_v39  ;;  %2012 = vmatpush.msrb.mxu0 %v4861_v11  ;;  %v4876_v39 = vld [vmem:[#allocation9 + $0x10] sm:$0xff] }
 0x525   :  { %2197 = vmatpush.msrb.mxu2 %v4556_v62  ;;  %2013 = vmatpush.msrb.mxu0 %v4864_v41  ;;  %v4879_v62 = vld [vmem:[#allocation9 + $0x8] sm:$0xff] }
 0x527   :  { %2198 = vmatpush.msrb.mxu2 %v4559_v38  ;;  %2014 = vmatpush.msrb.mxu0 %v4867_v42  ;;  %v4882_v38 = vld [vmem:[#allocation9] sm:$0xff] }
 0x529   :  { %2199 = vmatpush.msrb.mxu2 %v4562_v43  ;;  %2015 = vmatpush.msrb.mxu0 %v4870_v9  ;;  %v5770_v43 = vld [vmem:[#allocation75_spill] sm:$0xff] }
 0x52b   :  { %2200 = vmatpush.msrb.mxu2 %v4568_v46  ;;  %2016 = vmatpush.msrb.mxu0 %v4873_v27  ;;  %v1769_v46 = vld [vmem:[#allocation8] sm:$0xf] }
 0x52c   :  { %v1774_v51 = vperm.slane %v1769_v46, 3  ;;  %v1773_v53 = vperm.slane %v1769_v46, 2 }
 0x52d   :  { %2201 = vmatpush.msrb.mxu2 %v4576_v45  ;;  %2017 = vmatpush.msrb.mxu0 %v4876_v39  ;;  %v5771_v45 = vld [vmem:[#allocation68_spill] sm:$0xff] }
 0x52f   :  { %2202 = vmatpush.msrb.mxu2 %v4582_v4  ;;  %2018 = vmatpush.msrb.mxu0 %v4879_v62  ;;  %v5772_v4 = vld [vmem:[#allocation79_spill] sm:$0xff] }
 0x531   :  { %2203 = vmatpush.msrb.mxu2 %v4589_v25  ;;  %2019 = vmatpush.msrb.mxu0 %v4882_v38  ;;  %v1771_v25 = vperm.slane %v1769_v46, 0 }
 0x533   :  { %2268 = vmatpush.msra.mxu2 %v4594_v56  ;;  %2228 = vmatpush.msra.mxu0 %v4565_v19  ;;  %v5773_v56 = vld [vmem:[#allocation72_spill] sm:$0xff] }
 0x534   :  { %v5775_v19 = vld [vmem:[#allocation76_spill] sm:$0xff] }
 0x535   :  { %2269 = vmatpush.msra.mxu2 %v4600_v44  ;;  %2229 = vmatpush.msra.mxu0 %v4571_v48 }
 0x537   :  { %2270 = vmatpush.msra.mxu2 %v4607_v0  ;;  %2230 = vmatpush.msra.mxu0 %v4579_v18  ;;  %v5774_v0 = vld [vmem:[#allocation82_spill] sm:$0xff]  ;;  %v5776_v18 = vld [vmem:[#allocation80_spill] sm:$0xff] }
 0x539   :  { %2271 = vmatpush.msra.mxu2 %v4613_v14  ;;  %2231 = vmatpush.msra.mxu0 %v5770_v43 }
 0x53b   :  { %2272 = vmatpush.msra.mxu2 %v4619_v35  ;;  %2232 = vmatpush.msra.mxu0 %v5771_v45  ;;  %v1816_v35 = vpop.f32.mrf.mxu1 }
 0x53d   :  { %2273 = vmatpush.msra.mxu2 %v4625_v33  ;;  %2233 = vmatpush.msra.mxu0 %v5772_v4  ;;  %v1772_v33 = vperm.slane %v1769_v46, 1 }
 0x53f   :  { %2274 = vmatpush.msra.mxu2 %v4631_v6  ;;  %2234 = vmatpush.msra.mxu0 %v5773_v56 }
 0x541   :  { %2275 = vmatpush.msra.mxu2 %v4637_v16  ;;  %2235 = vmatpush.msra.mxu0 %v5774_v0 }
 0x543   :  { %2276 = vmatpush.msra.mxu2 %v4645_v1  ;;  %2236 = vmatpush.msra.mxu0 %v5775_v19  ;;  %v5777_v1 = vld [vmem:[#allocation83_spill] sm:$0xff]  ;;  %v1896_v57 = vpop.f32.mrf.mxu1 }
 0x545   :  { %2277 = vmatpush.msra.mxu2 %v4652_v36  ;;  %2237 = vmatpush.msra.mxu0 %v5776_v18 }
 0x547   :  { %2278 = vmatpush.msra.mxu2 %v4658_v55  ;;  %2238 = vmatpush.msra.mxu0 %v5777_v1  ;;  %v1856_v55 = vpop.f32.mrf.mxu3 }
 0x549   :  { %2279 = vmatpush.msra.mxu2 %v4664_v2  ;;  %v5778_v2 = vld [vmem:[#allocation16_spill] sm:$0xff] }
 0x54a   :  { %2239 = vmatpush.msra.mxu0 %v5778_v2 }
 0x54b   :  { %2280 = vmatpush.msra.mxu2 %v4668_v28 }
 0x54d   :  { %2281 = vmatpush.msra.mxu2 %v4671_v7  ;;  %v5779_v7 = vld [vmem:[#allocation17_spill] sm:$0xff] }
 0x54e   :  { %2240 = vmatpush.msra.mxu0 %v5779_v7  ;;  %v5785_v7 = vld [vmem:[#allocation23_spill] sm:$0xff] }
 0x54f   :  { %2282 = vmatpush.msra.mxu2 %v4675_v50  ;;  %v1936_v52 = vpop.f32.mrf.mxu3 }
 0x551   :  { %2283 = vmatpush.msra.mxu2 %v4679_v3  ;;  %v5780_v3 = vld [vmem:[#allocation18_spill] sm:$0xff] }
 0x552   :  { %2241 = vmatpush.msra.mxu0 %v5780_v3  ;;  %v5787_v3 = vld [vmem:[#allocation25_spill] sm:$0xff] }
 0x554   :  { %2242 = vmatpush.msra.mxu0 %v5781_v20  ;;  %v5790_v20 = vld [vmem:[#allocation28_spill] sm:$0xff] }
 0x556   :  { %2243 = vmatpush.msra.mxu0 %v5782_v15  ;;  %v5791_v15 = vld [vmem:[#allocation29_spill] sm:$0xff] }
 0x58f   :  { %v1796_v44 = vpop.f32.mrf.mxu0 }
 0x590   :  { %v1797_v14 = vadd.f32 %v1796_v44, %v1771_v25 }
 0x592   :  { %v1817_v48 = vadd.f32 %v1816_v35, %v1797_v14 }
 0x594   :  { %v3223_v6 = vmul.f32 -1.442695, %v1817_v48 }
 0x595   :  { %v1836_v16 = vpop.f32.mrf.mxu2 }
 0x596   :  { %3289 = vpow2.f32 %v3223_v6  ;;  %v1837_v36 = vadd.f32 %v1836_v16, %v1772_v33 }
 0x597   :  { %v1876_v10 = vpop.f32.mrf.mxu0 }
 0x598   :  { %v1857_v28 = vadd.f32 %v1856_v55, %v1837_v36  ;;  %v1877_v5 = vadd.f32 %v1876_v10, %v1773_v53  ;;  %v5783_v36 = vld [vmem:[#allocation21_spill] sm:$0xff]  ;;  %v5797_v53 = vld [vmem:[#allocation44_spill] sm:$0xff]  ;;  %v5799_v10 = vld [vmem:[#allocation51_spill] sm:$0xff] }
 0x59a   :  { %v3224_v50 = vmul.f32 -1.442695, %v1857_v28  ;;  %v1897_v4 = vadd.f32 %v1896_v57, %v1877_v5  ;;  %v5784_v28 = vld [vmem:[#allocation22_spill] sm:$0xff]  ;;  %v5001_v5 = vld [vmem:[#allocation6 + $0x200] sm:$0xff] }
 0x59b   :  { %v5014_v57 = vld [vmem:[#allocation6 + $0x3d0] sm:$0xff] }
 0x59c   :  { %v3290_v61 = vpop.eup %3289  ;;  %3291 = vpow2.f32 %v3224_v50  ;;  %v5786_v50 = vld [vmem:[#allocation24_spill] sm:$0xff] }
 0x59d   :  { %v1942_v54 = vadd.f32 1.0, %v3290_v61  ;;  %v1916_v63 = vpop.f32.mrf.mxu2  ;;  %v5788_v61 = vld [vmem:[#allocation26_spill] sm:$0xff] }
 0x59e   :  { %v1917_v58 = vadd.f32 %v1916_v63, %v1774_v51  ;;  %v5795_v51 = vld [vmem:[#allocation37_spill] sm:$0xff]  ;;  %v5798_v63 = vld [vmem:[#allocation48_spill] sm:$0xff] }
 0x59f   :  { %3293 = vrcp.f32 %v1942_v54  ;;  %v1954_v49 = vand.u32 2147483648, %v1942_v54  ;;  %v1952_v13 = vand.u32 2147483647, %v1942_v54  ;;  %vm1948_vm1 = vweird.f32 %v1942_v54 }
 0x5a0   :  { %v1937_v45 = vadd.f32 %v1936_v52, %v1917_v58  ;;  %v5008_v52 = vld [vmem:[#allocation8] sm:$0xf] }
 0x5a1   :  { %v1955_v8 = vor.u32 1.1754944e-38, %v1954_v49  ;;  %vm1953_vm3 = vcmp.eq.f32.partialorder %v1952_v13, 8.507059e+37  ;;  %v4930_v13 = vld [vmem:[#allocation6 + $0x3c0] sm:$0xff] }
 0x5a2   :  { %v3292_v30 = vpop.eup %3291 }
 0x5a3   :  { %v1961_v24 = vadd.f32 1.0, %v3292_v30  ;;  %v5792_v30 = vld [vmem:[#allocation30_spill] sm:$0xff] }
 0x5a5   :  { %v3294_v37 = vpop.eup %3293  ;;  %3295 = vrcp.f32 %v1961_v24  ;;  %v1973_v44 = vand.u32 2147483648, %v1961_v24  ;;  %v1971_v14 = vand.u32 2147483647, %v1961_v24  ;;  %vm1967_vm5 = vweird.f32 %v1961_v24 }
 0x5a6   :  { %v1944_v31 = vmul.f32 %v3294_v37, %v1942_v54  ;;  %vm1949_vm0 = vweird.f32 %v3294_v37  ;;  %v5789_v54 = vld [vmem:[#allocation27_spill] sm:$0xff] }
 0x5a7   :  { %vm1950_vm2 = vmor %vm1948_vm1, %vm1949_vm0  ;;  %v1974_v48 = vor.u32 1.1754944e-38, %v1973_v44  ;;  %vm1972_vm7 = vcmp.eq.f32.partialorder %v1971_v14, 8.507059e+37  ;;  %v5033_v14 = vld [vmem:[#allocation6 + $0x370] sm:$0xff] }
 0x5a8   :  { %v1945_v34 = vsub.f32 1.0, %v1944_v31  ;;  %v5796_v31 = vld [vmem:[#allocation40_spill] sm:$0xff] }
 0x5aa   :  { %v1946_v21 = vmul.f32 %v3294_v37, %v1945_v34  ;;  %v3245_v34 = vld [vmem:[%s5378_s4] ss:$0 sm:$0xff] }
 0x5ab   :  { %v3296_v17 = vpop.eup %3295 }
 0x5ac   :  { %v1963_v26 = vmul.f32 %v3296_v17, %v1961_v24  ;;  %v1947_v22 = vadd.f32 %v3294_v37, %v1946_v21  ;;  %vm1968_vm4 = vweird.f32 %v3296_v17  ;;  %v5793_v24 = vld [vmem:[#allocation32_spill] sm:$0xff] }
 0x5ad   :  { %vm1969_vm6 = vmor %vm1967_vm5, %vm1968_vm4  ;;  %v4928_v21 = vld [vmem:[#allocation6 + $0x3e0] sm:$0xff] }
 0x5ae   :  { %v1964_v43 = vsub.f32 1.0, %v1963_v26  ;;  %v1951_v46 = vsel %vm1950_vm2, %v3294_v37, %v1947_v22  ;;  %v5794_v37 = vld [vmem:[#allocation34_spill] sm:$0xff]  ;;  %v5004_v26 = vld [vmem:[#allocation6 + $0x368] sm:$0xff] }
 0x5af   :  { %v1956_v25 = vsel %vm1953_vm3, %v1955_v8, %v1951_v46  ;;  %5801 = vst [vmem:[#allocation58_spill] sm:$0xff] %v5004_v26  ;;  %v5006_v22 = vld [vmem:[#allocation6 + $0x3f0] sm:$0xff]  ;;  %v5012_v8 = vld [vmem:[#allocation6 + $0x348] sm:$0xff] }
 0x5b0   :  { %v1965_v56 = vmul.f32 %v3296_v17, %v1964_v43  ;;  %v1977_v0 = vmul.f32 %v1956_v25, %v1937_v45  ;;  %5802 = vst [vmem:[#allocation62_spill] sm:$0xff] %v5012_v8  ;;  %v2160_v43 = vperm.slane %v5008_v52, 0  ;;  %v5019_v45 = vld [vmem:[#allocation6 + $0x328] sm:$0xff]  ;;  %v5021_v46 = vld [vmem:[#allocation6 + $0x3b0] sm:$0xff] }
 0x5b1   :  { %5803 = vst [vmem:[#allocation66_spill] sm:$0xff] %v5019_v45  ;;  %v5027_v25 = vld [vmem:[#allocation6 + $0x390] sm:$0xff] }
 0x5b2   :  { %v1966_v35 = vadd.f32 %v3296_v17, %v1965_v56  ;;  %v1978_v19 = vadd.f32 %v1977_v0, %v1897_v4  ;;  %v5025_v4 = vld [vmem:[#allocation6 + $0x308] sm:$0xff] }
 0x5b3   :  { %5804 = vst [vmem:[#allocation70_spill] sm:$0xff] %v5025_v4  ;;  %v5031_v0 = vld [vmem:[#allocation6 + $0x2e8] sm:$0xff] }
 0x5b4   :  { %v1970_v33 = vsel %vm1969_vm6, %v3296_v17, %v1966_v35  ;;  %3297 = vtanh.f32 %v1978_v19  ;;  %v4934_v17 = vld [vmem:[#allocation6 + $0x3a0] sm:$0xff]  ;;  %5805 = vst [vmem:[#allocation74_spill] sm:$0xff] %v5031_v0 }
 0x5b5   :  { %v1975_v18 = vsel %vm1972_vm7, %v1974_v48, %v1970_v33  ;;  %v2161_v48 = vperm.slane %v5008_v52, 1  ;;  %v5038_v33 = vld [vmem:[#allocation6 + $0x2c8] sm:$0xff] }
 0x5b6   :  { %v1980_v6 = vsub.f32 1.0, %v1975_v18  ;;  %v1982_v55 = vmul.f32 %v1975_v18, %v5783_v36  ;;  %5806 = vst [vmem:[#allocation78_spill] sm:$0xff] %v5038_v33  ;;  %v5040_v18 = vld [vmem:[#allocation6 + $0x350] sm:$0xff] }
 0x5ba   :  { %v3298_v16 = vpop.eup %3297 }
 0x5bb   :  { %v1981_v1 = vmul.f32 %v3298_v16, %v1980_v6  ;;  %v5044_v16 = vld [vmem:[#allocation6 + $0x2a8] sm:$0xff] }
 0x5bc   :  { %5807 = vst [vmem:[#allocation81_spill] sm:$0xff] %v5044_v16 }
 0x5bd   :  { %v4902_v2 = vadd.f32 %v1982_v55, %v1981_v1  ;;  %v5046_v1 = vld [vmem:[#allocation6 + $0x330] sm:$0xff] }
 0x5bf   :  { %2020 = vmatmul.f32.vlgmr.msrb.gmra.mxu0 %v4902_v2  ;;  %2204 = vmatmul.f32.vlgmr.msrb.gmra.mxu2 %v4902_v2 }
 0x5c0   :  { %2308 = vmatpush.msrb.mxu0 %v5784_v28  ;;  %v5050_v28 = vld [vmem:[#allocation6 + $0x288] sm:$0xff] }
 0x5c1   :  { %5808 = vst [vmem:[#allocation84_spill] sm:$0xff] %v5050_v28 }
 0x5c2   :  { %2309 = vmatpush.msrb.mxu0 %v5785_v7  ;;  %v5052_v7 = vld [vmem:[#allocation6 + $0x310] sm:$0xff] }
 0x5c4   :  { %2310 = vmatpush.msrb.mxu0 %v5786_v50 }
 0x5c6   :  { %2311 = vmatpush.msrb.mxu0 %v5787_v3 }
 0x5c7   :  { %2244 = vmatmul.f32.vlgmr.msra.gmra.mxu0 %v4902_v2  ;;  %2284 = vmatmul.f32.vlgmr.msra.gmra.mxu2 %v4902_v2 }
 0x5c8   :  { %2312 = vmatpush.msrb.mxu0 %v5788_v61  ;;  %v5056_v61 = vld [vmem:[#allocation6 + $0x268] sm:$0xff] }
 0x5c9   :  { %5809 = vst [vmem:[#allocation35_spill] sm:$0xff] %v5056_v61 }
 0x5ca   :  { %2313 = vmatpush.msrb.mxu0 %v5789_v54  ;;  %v5058_v54 = vld [vmem:[#allocation6 + $0x2f0] sm:$0xff] }
 0x5cc   :  { %2314 = vmatpush.msrb.mxu0 %v5790_v20 }
 0x5ce   :  { %2315 = vmatpush.msrb.mxu0 %v5791_v15  ;;  %v5062_v15 = vld [vmem:[#allocation6 + $0x248] sm:$0xff] }
 0x5cf   :  { %5810 = vst [vmem:[#allocation31_spill] sm:$0xff] %v5062_v15 }
 0x5d0   :  { %2316 = vmatpush.msrb.mxu0 %v5792_v30  ;;  %v5064_v30 = vld [vmem:[#allocation6 + $0x2d0] sm:$0xff] }
 0x5d2   :  { %2317 = vmatpush.msrb.mxu0 %v5793_v24 }
 0x5d4   :  { %2318 = vmatpush.msrb.mxu0 %v5794_v37  ;;  %v5068_v37 = vld [vmem:[#allocation6 + $0x228] sm:$0xff] }
 0x5d5   :  { %5811 = vst [vmem:[#allocation43_spill] sm:$0xff] %v5068_v37 }
 0x5d6   :  { %2319 = vmatpush.msrb.mxu0 %v5795_v51  ;;  %v5070_v51 = vld [vmem:[#allocation6 + $0x2b0] sm:$0xff] }
 0x5d8   :  { %2320 = vmatpush.msrb.mxu0 %v5796_v31 }
 0x5da   :  { %2321 = vmatpush.msrb.mxu0 %v5797_v53  ;;  %v5074_v53 = vld [vmem:[#allocation6 + $0x208] sm:$0xff] }
 0x5db   :  { %5812 = vst [vmem:[#allocation38_spill] sm:$0xff] %v5074_v53 }
 0x5dc   :  { %2322 = vmatpush.msrb.mxu0 %v5798_v63  ;;  %v5076_v63 = vld [vmem:[#allocation6 + $0x290] sm:$0xff] }
 0x5de   :  { %2323 = vmatpush.msrb.mxu0 %v5799_v10  ;;  %v5080_v10 = vld [vmem:[#allocation6 + $0x270] sm:$0xff] }
 0x5df   :  { %2324 = vmatmul.f32.vlgmr.msrb.gmra.mxu0 %v4902_v2 }
 0x63c   :  { %v2021_v49 = vpop.f32.mrf.mxu0 }
 0x63d   :  { %v2022_v58 = vadd.f32 %v3245_v34, %v2021_v49  ;;  %v5083_v49 = vld [vmem:[#allocation6 + $0x250] sm:$0xff] }
 0x63f   :  { %2027 = vst [vmem:[#allocation11 + $0x18] sm:$0xff] %v2022_v58  ;;  %2184 = vmatmul.f32.vlgmr.msrb.gmra.mxu1 %v2022_v58  ;;  %2224 = vmatmul.f32.vlgmr.msrb.gmra.mxu3 %v2022_v58 }
 0x640   :  { %2393 = vmatpush.msrb.mxu1 %v4805_v60  ;;  %2577 = vmatpush.msrb.mxu3 %v4928_v21  ;;  %v4953_v60 = vld [vmem:[#allocation6 + $0x380] sm:$0xff] }
 0x642   :  { %2394 = vmatpush.msrb.mxu1 %v4807_v59  ;;  %2578 = vmatpush.msrb.mxu3 %v4930_v13  ;;  %v4956_v59 = vld [vmem:[#allocation6 + $0x360] sm:$0xff]  ;;  %v2205_v35 = vpop.f32.mrf.mxu2 }
 0x644   :  { %2395 = vmatpush.msrb.mxu1 %v4811_v47  ;;  %2579 = vmatpush.msrb.mxu3 %v4934_v17  ;;  %v4959_v47 = vld [vmem:[#allocation6 + $0x340] sm:$0xff]  ;;  %v2245_v50 = vpop.f32.mrf.mxu0 }
 0x646   :  { %2396 = vmatpush.msrb.mxu1 %v4815_v32  ;;  %2580 = vmatpush.msrb.mxu3 %v4953_v60  ;;  %v4962_v32 = vld [vmem:[#allocation6 + $0x320] sm:$0xff] }
 0x647   :  { %2264 = vmatmul.f32.vlgmr.msra.gmra.mxu1 %v2022_v58  ;;  %2304 = vmatmul.f32.vlgmr.msra.gmra.mxu3 %v2022_v58 }
 0x648   :  { %2397 = vmatpush.msrb.mxu1 %v4819_v23  ;;  %2581 = vmatpush.msrb.mxu3 %v4956_v59  ;;  %v4965_v23 = vld [vmem:[#allocation6 + $0x300] sm:$0xff] }
 0x64a   :  { %2398 = vmatpush.msrb.mxu1 %v4823_v29  ;;  %2582 = vmatpush.msrb.mxu3 %v4959_v47  ;;  %v4968_v29 = vld [vmem:[#allocation6 + $0x2e0] sm:$0xff] }
 0x64c   :  { %2399 = vmatpush.msrb.mxu1 %v4827_v12  ;;  %2583 = vmatpush.msrb.mxu3 %v4962_v32  ;;  %v4971_v12 = vld [vmem:[#allocation6 + $0x2c0] sm:$0xff] }
 0x64e   :  { %2400 = vmatpush.msrb.mxu1 %v4858_v40  ;;  %2584 = vmatpush.msrb.mxu3 %v4965_v23  ;;  %v4974_v40 = vld [vmem:[#allocation6 + $0x2a0] sm:$0xff] }
 0x650   :  { %2401 = vmatpush.msrb.mxu1 %v4861_v11  ;;  %2585 = vmatpush.msrb.mxu3 %v4968_v29  ;;  %v4977_v11 = vld [vmem:[#allocation6 + $0x280] sm:$0xff] }
 0x652   :  { %2402 = vmatpush.msrb.mxu1 %v4864_v41  ;;  %2586 = vmatpush.msrb.mxu3 %v4971_v12  ;;  %v4980_v41 = vld [vmem:[#allocation6 + $0x3e8] sm:$0xff] }
 0x654   :  { %2403 = vmatpush.msrb.mxu1 %v4867_v42  ;;  %2587 = vmatpush.msrb.mxu3 %v4974_v40  ;;  %v4983_v42 = vld [vmem:[#allocation6 + $0x260] sm:$0xff] }
 0x656   :  { %2404 = vmatpush.msrb.mxu1 %v4870_v9  ;;  %2588 = vmatpush.msrb.mxu3 %v4977_v11  ;;  %v4986_v9 = vld [vmem:[#allocation6 + $0x3c8] sm:$0xff] }
 0x658   :  { %2405 = vmatpush.msrb.mxu1 %v4873_v27  ;;  %2589 = vmatpush.msrb.mxu3 %v4983_v42  ;;  %v4989_v27 = vld [vmem:[#allocation6 + $0x240] sm:$0xff] }
 0x65a   :  { %2406 = vmatpush.msrb.mxu1 %v4876_v39  ;;  %2590 = vmatpush.msrb.mxu3 %v4989_v27  ;;  %v4992_v39 = vld [vmem:[#allocation6 + $0x3a8] sm:$0xff] }
 0x65c   :  { %2407 = vmatpush.msrb.mxu1 %v4879_v62  ;;  %v4995_v62 = vld [vmem:[#allocation6 + $0x220] sm:$0xff] }
 0x65d   :  { %2591 = vmatpush.msrb.mxu3 %v4995_v62 }
 0x65e   :  { %2408 = vmatpush.msrb.mxu1 %v4882_v38  ;;  %v4998_v38 = vld [vmem:[#allocation6 + $0x388] sm:$0xff] }
 0x65f   :  { %5800 = vst [vmem:[#allocation53_spill] sm:$0xff] %v4998_v38  ;;  %2592 = vmatpush.msrb.mxu3 %v5001_v5 }
 0x660   :  { %2617 = vmatpush.msra.mxu1 %v4980_v41 }
 0x661   :  { %2657 = vmatpush.msra.mxu3 %v5006_v22 }
 0x662   :  { %2618 = vmatpush.msra.mxu1 %v4986_v9 }
 0x663   :  { %2658 = vmatpush.msra.mxu3 %v5014_v57 }
 0x664   :  { %2619 = vmatpush.msra.mxu1 %v4992_v39 }
 0x665   :  { %2659 = vmatpush.msra.mxu3 %v5021_v46 }
 0x666   :  { %2620 = vmatpush.msra.mxu1 %v4998_v38  ;;  %v2457_v38 = vld [vmem:[#allocation6 + $0x130] sm:$0xff] }
 0x667   :  { %2660 = vmatpush.msra.mxu3 %v5027_v25 }
 0x668   :  { %2621 = vmatpush.msra.mxu1 %v5004_v26  ;;  %v2466_v26 = vld [vmem:[#allocation6 + $0x178] sm:$0xff] }
 0x669   :  { %2661 = vmatpush.msra.mxu3 %v5033_v14 }
 0x66a   :  { %2622 = vmatpush.msra.mxu1 %v5012_v8 }
 0x66b   :  { %2662 = vmatpush.msra.mxu3 %v5040_v18 }
 0x66c   :  { %2623 = vmatpush.msra.mxu1 %v5019_v45 }
 0x66d   :  { %2663 = vmatpush.msra.mxu3 %v5046_v1 }
 0x66e   :  { %2624 = vmatpush.msra.mxu1 %v5025_v4 }
 0x66f   :  { %2664 = vmatpush.msra.mxu3 %v5052_v7 }
 0x670   :  { %2625 = vmatpush.msra.mxu1 %v5031_v0 }
 0x671   :  { %2665 = vmatpush.msra.mxu3 %v5058_v54 }
 0x672   :  { %2626 = vmatpush.msra.mxu1 %v5038_v33 }
 0x673   :  { %2666 = vmatpush.msra.mxu3 %v5064_v30 }
 0x674   :  { %2627 = vmatpush.msra.mxu1 %v5044_v16  ;;  %v2285_v16 = vpop.f32.mrf.mxu2 }
 0x675   :  { %2667 = vmatpush.msra.mxu3 %v5070_v51 }
 0x676   :  { %2628 = vmatpush.msra.mxu1 %v5050_v28 }
 0x677   :  { %2668 = vmatpush.msra.mxu3 %v5076_v63 }
 0x678   :  { %2629 = vmatpush.msra.mxu1 %v5056_v61  ;;  %v2325_v61 = vpop.f32.mrf.mxu0 }
 0x679   :  { %2669 = vmatpush.msra.mxu3 %v5080_v10 }
 0x67a   :  { %2630 = vmatpush.msra.mxu1 %v5062_v15 }
 0x67b   :  { %2670 = vmatpush.msra.mxu3 %v5083_v49 }
 0x67c   :  { %2631 = vmatpush.msra.mxu1 %v5068_v37 }
 0x67e   :  { %2632 = vmatpush.msra.mxu1 %v5074_v53 }
 0x6bc   :  { %v2185_v56 = vpop.f32.mrf.mxu1 }
 0x6bd   :  { %v2186_v44 = vadd.f32 %v2185_v56, %v2160_v43  ;;  %v5086_v43 = vld [vmem:[#allocation6 + $0x230] sm:$0xff] }
 0x6be   :  { %2671 = vmatpush.msra.mxu3 %v5086_v43 }
 0x6bf   :  { %v2206_v19 = vadd.f32 %v2205_v35, %v2186_v44  ;;  %v2163_v44 = vperm.slane %v5008_v52, 3 }
 0x6c1   :  { %v3225_v6 = vmul.f32 -1.442695, %v2206_v19  ;;  %v5090_v19 = vld [vmem:[#allocation6 + $0x210] sm:$0xff] }
 0x6c2   :  { %v2225_v36 = vpop.f32.mrf.mxu3  ;;  %2672 = vmatpush.msra.mxu3 %v5090_v19 }
 0x6c3   :  { %3299 = vpow2.f32 %v3225_v6  ;;  %v2226_v55 = vadd.f32 %v2225_v36, %v2161_v48  ;;  %v2162_v48 = vperm.slane %v5008_v52, 2 }
 0x6c4   :  { %v2265_v36 = vpop.f32.mrf.mxu1 }
 0x6c5   :  { %v2246_v3 = vadd.f32 %v2245_v50, %v2226_v55  ;;  %v2266_v53 = vadd.f32 %v2265_v36, %v2162_v48 }
 0x6c7   :  { %v3226_v20 = vmul.f32 -1.442695, %v2246_v3  ;;  %v2286_v4 = vadd.f32 %v2285_v16, %v2266_v53  ;;  %v5106_v53 = vld [vmem:[#allocation6 + $0x1c8] sm:$0xff] }
 0x6c9   :  { %v3300_v24 = vpop.eup %3299  ;;  %3301 = vpow2.f32 %v3226_v20 }
 0x6ca   :  { %v2331_v31 = vadd.f32 1.0, %v3300_v24  ;;  %v2305_v6 = vpop.f32.mrf.mxu3 }
 0x6cb   :  { %v2306_v3 = vadd.f32 %v2305_v6, %v2163_v44 }
 0x6cc   :  { %3303 = vrcp.f32 %v2331_v31  ;;  %v2343_v50 = vand.u32 2147483648, %v2331_v31  ;;  %v2341_v24 = vand.u32 2147483647, %v2331_v31  ;;  %vm2337_vm9 = vweird.f32 %v2331_v31 }
 0x6cd   :  { %v2326_v33 = vadd.f32 %v2325_v61, %v2306_v3  ;;  %v5114_v3 = vld [vmem:[#allocation6 + $0x398] sm:$0xff] }
 0x6ce   :  { %v2344_v28 = vor.u32 1.1754944e-38, %v2343_v50  ;;  %vm2342_vm11 = vcmp.eq.f32.partialorder %v2341_v24, 8.507059e+37  ;;  %5817 = vst [vmem:[#allocation45_spill] sm:$0xff] %v5114_v3  ;;  %v5118_v24 = vld [vmem:[#allocation6 + $0x378] sm:$0xff] }
 0x6cf   :  { %v3302_v34 = vpop.eup %3301  ;;  %5818 = vst [vmem:[#allocation39_spill] sm:$0xff] %v5118_v24 }
 0x6d0   :  { %v2350_v58 = vadd.f32 1.0, %v3302_v34 }
 0x6d2   :  { %v3304_v56 = vpop.eup %3303  ;;  %3305 = vrcp.f32 %v2350_v58  ;;  %v2362_v44 = vand.u32 2147483648, %v2350_v58  ;;  %vm2356_vm13 = vweird.f32 %v2350_v58 }
 0x6d3   :  { %v2333_v35 = vmul.f32 %v3304_v56, %v2331_v31  ;;  %vm2338_vm8 = vweird.f32 %v3304_v56 }
 0x6d4   :  { %vm2339_vm10 = vmor %vm2337_vm9, %vm2338_vm8  ;;  %v2363_v31 = vor.u32 1.1754944e-38, %v2362_v44  ;;  %v5128_v44 = vld [vmem:[#allocation6 + $0x168] sm:$0xff] }
 0x6d5   :  { %v2334_v55 = vsub.f32 1.0, %v2333_v35 }
 0x6d7   :  { %v2335_v20 = vmul.f32 %v3304_v56, %v2334_v55  ;;  %v2360_v55 = vand.u32 2147483647, %v2350_v58 }
 0x6d8   :  { %v3306_v34 = vpop.eup %3305 }
 0x6d9   :  { %v2352_v37 = vmul.f32 %v3306_v34, %v2350_v58  ;;  %v2336_v15 = vadd.f32 %v3304_v56, %v2335_v20  ;;  %vm2357_vm12 = vweird.f32 %v3306_v34  ;;  %vm2361_vm15 = vcmp.eq.f32.partialorder %v2360_v55, 8.507059e+37  ;;  %v2471_v58 = vld [vmem:[#allocation6 + $0x1a0] sm:$0xff]  ;;  %v5132_v55 = vld [vmem:[#allocation6 + $0x338] sm:$0xff] }
 0x6da   :  { %vm2358_vm14 = vmor %vm2356_vm13, %vm2357_vm12  ;;  %v2467_v20 = vld [vmem:[#allocation6 + $0x180] sm:$0xff]  ;;  %5820 = vst [vmem:[#allocation42_spill] sm:$0xff] %v5132_v55 }
 0x6db   :  { %v2353_v52 = vsub.f32 1.0, %v2352_v37  ;;  %v2340_v0 = vsel %vm2339_vm10, %v3304_v56, %v2336_v15  ;;  %v5112_v56 = vld [vmem:[#allocation6 + $0x1a8] sm:$0xff] }
 0x6dc   :  { %v2345_v35 = vsel %vm2342_vm11, %v2344_v28, %v2340_v0  ;;  %v5097_v28 = vld [vmem:[#allocation6 + $0x3f8] sm:$0xff] }
 0x6dd   :  { %v2354_v45 = vmul.f32 %v3306_v34, %v2353_v52  ;;  %v2366_v6 = vmul.f32 %v2345_v35, %v2326_v33  ;;  %5814 = vst [vmem:[#allocation47_spill] sm:$0xff] %v5097_v28  ;;  %v5099_v33 = vld [vmem:[#allocation6 + $0x3d8] sm:$0xff]  ;;  %v2463_v52 = vld [vmem:[#allocation6 + $0x160] sm:$0xff] }
 0x6de   :  { %5815 = vst [vmem:[#allocation41_spill] sm:$0xff] %v5099_v33  ;;  %v5126_v35 = vld [vmem:[#allocation6 + $0x358] sm:$0xff] }
 0x6df   :  { %v2355_v8 = vadd.f32 %v3306_v34, %v2354_v45  ;;  %v2367_v48 = vadd.f32 %v2366_v6, %v2286_v4  ;;  %v2479_v45 = vld [vmem:[#allocation6 + $0x1e0] sm:$0xff]  ;;  %5819 = vst [vmem:[#allocation50_spill] sm:$0xff] %v5126_v35 }
 0x6e0   :  { %v2475_v4 = vld [vmem:[#allocation6 + $0x1c0] sm:$0xff]  ;;  %2557 = vmatpush.msrb.mxu2 %v2479_v45 }
 0x6e1   :  { %v2359_v36 = vsel %vm2358_vm14, %v3306_v34, %v2355_v8  ;;  %3307 = vtanh.f32 %v2367_v48  ;;  %v5103_v8 = vld [vmem:[#allocation6 + $0x1e8] sm:$0xff]  ;;  %v2459_v6 = vld [vmem:[#allocation6 + $0x140] sm:$0xff] }
 0x6e2   :  { %v2364_v50 = vsel %vm2361_vm15, %v2363_v31, %v2359_v36  ;;  %2597 = vmatpush.msra.mxu0 %v5103_v8  ;;  %2558 = vmatpush.msrb.mxu2 %v2475_v4  ;;  %v5121_v34 = vld [vmem:[#allocation6 + $0x188] sm:$0xff]  ;;  %v2455_v31 = vld [vmem:[#allocation6 + $0x120] sm:$0xff]  ;;  %v5138_v36 = vld [vmem:[#allocation6 + $0x318] sm:$0xff] }
 0x6e3   :  { %v2369_v37 = vsub.f32 1.0, %v2364_v50  ;;  %v2371_v16 = vmul.f32 %v2364_v50, %v4902_v2  ;;  %v5108_v2 = vld [vmem:[#allocation6 + $0x3b8] sm:$0xff]  ;;  %v5134_v48 = vld [vmem:[#allocation6 + $0x148] sm:$0xff]  ;;  %5821 = vst [vmem:[#allocation57_spill] sm:$0xff] %v5138_v36 }
 0x6e4   :  { %5816 = vst [vmem:[#allocation36_spill] sm:$0xff] %v5108_v2  ;;  %2598 = vmatpush.msra.mxu0 %v5106_v53  ;;  %2559 = vmatpush.msrb.mxu2 %v2471_v58  ;;  %v5140_v50 = vld [vmem:[#allocation6 + $0x128] sm:$0xff] }
 0x6e6   :  { %2599 = vmatpush.msra.mxu0 %v5112_v56  ;;  %2560 = vmatpush.msrb.mxu2 %v2467_v20 }
 0x6e7   :  { %v3308_v61 = vpop.eup %3307 }
 0x6e8   :  { %v2370_v15 = vmul.f32 %v3308_v61, %v2369_v37  ;;  %2600 = vmatpush.msra.mxu0 %v5121_v34  ;;  %2561 = vmatpush.msrb.mxu2 %v2463_v52  ;;  %v2451_v37 = vld [vmem:[#allocation6 + $0x100] sm:$0xff]  ;;  %v5144_v61 = vld [vmem:[#allocation6 + $0x2f8] sm:$0xff] }
 0x6e9   :  { %5822 = vst [vmem:[#allocation54_spill] sm:$0xff] %v5144_v61 }
 0x6ea   :  { %v5095_v0 = vadd.f32 %v2371_v16, %v2370_v15  ;;  %2601 = vmatpush.msra.mxu0 %v5128_v44  ;;  %2562 = vmatpush.msrb.mxu2 %v2459_v6  ;;  %v5146_v15 = vld [vmem:[#allocation6 + $0x108] sm:$0xff]  ;;  %v2447_v16 = vld [vmem:[#allocation6 + $0xe0] sm:$0xff] }
 0x6ec   :  { %5813 = vst [vmem:[#allocation33_spill] sm:$0xff] %v5095_v0  ;;  %2409 = vmatmul.f32.vlgmr.msrb.gmra.mxu1 %v5095_v0  ;;  %2593 = vmatmul.f32.vlgmr.msrb.gmra.mxu3 %v5095_v0 }
 0x6ed   :  { %2697 = vmatpush.msrb.mxu1 %v5097_v28  ;;  %2946 = vmatpush.msrb.mxu3 %v2479_v45  ;;  %v5150_v45 = vld [vmem:[#allocation6 + $0x2d8] sm:$0xff] }
 0x6ee   :  { %2602 = vmatpush.msra.mxu0 %v5134_v48  ;;  %2563 = vmatpush.msrb.mxu2 %v2455_v31  ;;  %5823 = vst [vmem:[#allocation46_spill] sm:$0xff] %v5150_v45  ;;  %v2470_v28 = vld [vmem:[#allocation6 + $0x198] sm:$0xff] }
 0x6ef   :  { %2698 = vmatpush.msrb.mxu1 %v5099_v33  ;;  %2947 = vmatpush.msrb.mxu3 %v2475_v4  ;;  %v5152_v4 = vld [vmem:[#allocation6 + $0xe8] sm:$0xff]  ;;  %v2473_v33 = vld [vmem:[#allocation6 + $0x1b0] sm:$0xff] }
 0x6f0   :  { %2603 = vmatpush.msra.mxu0 %v5140_v50  ;;  %2564 = vmatpush.msrb.mxu2 %v2451_v37 }
 0x6f1   :  { %2699 = vmatpush.msrb.mxu1 %v5108_v2  ;;  %2948 = vmatpush.msrb.mxu3 %v2471_v58  ;;  %v2443_v58 = vld [vmem:[#allocation6 + $0xc0] sm:$0xff]  ;;  %v5192_v2 = vld [vmem:[#allocation6 + $0x8] sm:$0xff] }
 0x6f2   :  { %2604 = vmatpush.msra.mxu0 %v5146_v15  ;;  %2565 = vmatpush.msrb.mxu2 %v2447_v16 }
 0x6f3   :  { %2700 = vmatpush.msrb.mxu1 %v5114_v3  ;;  %2949 = vmatpush.msrb.mxu3 %v2467_v20  ;;  %v5156_v20 = vld [vmem:[#allocation6 + $0x2b8] sm:$0xff] }
 0x6f4   :  { %2633 = vmatmul.f32.vlgmr.msra.gmra.mxu1 %v5095_v0  ;;  %2673 = vmatmul.f32.vlgmr.msra.gmra.mxu3 %v5095_v0  ;;  %5824 = vst [vmem:[#allocation61_spill] sm:$0xff] %v5156_v20  ;;  %v5186_v3 = vld [vmem:[#allocation6 + $0x218] sm:$0xff] }
 0x6f5   :  { %2701 = vmatpush.msrb.mxu1 %v5118_v24  ;;  %2950 = vmatpush.msrb.mxu3 %v2463_v52  ;;  %v5158_v52 = vld [vmem:[#allocation6 + $0xc8] sm:$0xff]  ;;  %v5180_v24 = vld [vmem:[#allocation6 + $0x238] sm:$0xff]  ;;  %5829 = vst [vmem:[#allocation52_spill] sm:$0xff] %v5186_v3 }
 0x6f6   :  { %2605 = vmatpush.msra.mxu0 %v5152_v4  ;;  %2566 = vmatpush.msrb.mxu2 %v2443_v58  ;;  %5828 = vst [vmem:[#allocation59_spill] sm:$0xff] %v5180_v24 }
 0x6f7   :  { %2702 = vmatpush.msrb.mxu1 %v5126_v35  ;;  %2951 = vmatpush.msrb.mxu3 %v2459_v6  ;;  %v2439_v6 = vld [vmem:[#allocation6 + $0xa0] sm:$0xff]  ;;  %v5174_v35 = vld [vmem:[#allocation6 + $0x258] sm:$0xff] }
 0x6f8   :  { %2606 = vmatpush.msra.mxu0 %v5158_v52  ;;  %2567 = vmatpush.msrb.mxu2 %v2439_v6  ;;  %5827 = vst [vmem:[#allocation65_spill] sm:$0xff] %v5174_v35 }
 0x6f9   :  { %2703 = vmatpush.msrb.mxu1 %v5132_v55  ;;  %2952 = vmatpush.msrb.mxu3 %v2455_v31  ;;  %v5164_v31 = vld [vmem:[#allocation6 + $0xa8] sm:$0xff]  ;;  %v5168_v55 = vld [vmem:[#allocation6 + $0x278] sm:$0xff] }
 0x6fa   :  { %5826 = vst [vmem:[#allocation49_spill] sm:$0xff] %v5168_v55  ;;  %2607 = vmatpush.msra.mxu0 %v5164_v31 }
 0x6fb   :  { %2704 = vmatpush.msrb.mxu1 %v5138_v36  ;;  %2953 = vmatpush.msrb.mxu3 %v2451_v37  ;;  %v5162_v36 = vld [vmem:[#allocation6 + $0x298] sm:$0xff]  ;;  %v5170_v37 = vld [vmem:[#allocation6 + $0x88] sm:$0xff] }
 0x6fc   :  { %5825 = vst [vmem:[#allocation55_spill] sm:$0xff] %v5162_v36  ;;  %2608 = vmatpush.msra.mxu0 %v5170_v37 }
 0x6fd   :  { %2705 = vmatpush.msrb.mxu1 %v5144_v61  ;;  %2954 = vmatpush.msrb.mxu3 %v2447_v16  ;;  %v2435_v61 = vld [vmem:[#allocation6 + $0x80] sm:$0xff]  ;;  %v5176_v16 = vld [vmem:[#allocation6 + $0x68] sm:$0xff] }
 0x6fe   :  { %2568 = vmatpush.msrb.mxu2 %v2435_v61  ;;  %2609 = vmatpush.msra.mxu0 %v5176_v16 }
 0x6ff   :  { %2706 = vmatpush.msrb.mxu1 %v5150_v45  ;;  %2955 = vmatpush.msrb.mxu3 %v2443_v58  ;;  %v2431_v45 = vld [vmem:[#allocation6 + $0x60] sm:$0xff]  ;;  %v5182_v58 = vld [vmem:[#allocation6 + $0x48] sm:$0xff] }
 0x700   :  { %2569 = vmatpush.msrb.mxu2 %v2431_v45  ;;  %2610 = vmatpush.msra.mxu0 %v5182_v58 }
 0x701   :  { %2707 = vmatpush.msrb.mxu1 %v5156_v20  ;;  %2956 = vmatpush.msrb.mxu3 %v2439_v6  ;;  %v2427_v20 = vld [vmem:[#allocation6 + $0x40] sm:$0xff]  ;;  %v5188_v6 = vld [vmem:[#allocation6 + $0x28] sm:$0xff] }
 0x702   :  { %2570 = vmatpush.msrb.mxu2 %v2427_v20  ;;  %2611 = vmatpush.msra.mxu0 %v5188_v6 }
 0x703   :  { %2708 = vmatpush.msrb.mxu1 %v5162_v36  ;;  %2957 = vmatpush.msrb.mxu3 %v2435_v61  ;;  %v2423_v36 = vld [vmem:[#allocation6 + $0x20] sm:$0xff]  ;;  %v2481_v61 = vld [vmem:[#allocation6 + $0x1f0] sm:$0xff] }
 0x704   :  { %2571 = vmatpush.msrb.mxu2 %v2423_v36  ;;  %2612 = vmatpush.msra.mxu0 %v5192_v2 }
 0x705   :  { %2709 = vmatpush.msrb.mxu1 %v5168_v55  ;;  %2958 = vmatpush.msrb.mxu3 %v2431_v45  ;;  %v2419_v55 = vld [vmem:[#allocation6] sm:$0xff]  ;;  %v2477_v45 = vld [vmem:[#allocation6 + $0x1d0] sm:$0xff] }
 0x706   :  { %2572 = vmatpush.msrb.mxu2 %v2419_v55 }
 0x707   :  { %2710 = vmatpush.msrb.mxu1 %v5174_v35  ;;  %2959 = vmatpush.msrb.mxu3 %v2427_v20  ;;  %v5196_v35 = vld [vmem:[#allocation6 + $0x1f8] sm:$0xff] }
 0x708   :  { %2637 = vmatpush.msra.mxu2 %v2481_v61  ;;  %2677 = vmatpush.msrb.mxu0 %v5196_v35  ;;  %v2474_v20 = vld [vmem:[#allocation6 + $0x1b8] sm:$0xff] }
 0x709   :  { %2711 = vmatpush.msrb.mxu1 %v5180_v24  ;;  %v5200_v24 = vld [vmem:[#allocation6 + $0x1d8] sm:$0xff]  ;;  %2960 = vmatpush.msrb.mxu3 %v2423_v36 }
 0x70a   :  { %2638 = vmatpush.msra.mxu2 %v2477_v45  ;;  %2678 = vmatpush.msrb.mxu0 %v5200_v24  ;;  %v2462_v36 = vld [vmem:[#allocation6 + $0x158] sm:$0xff] }
 0x70b   :  { %2712 = vmatpush.msrb.mxu1 %v5186_v3  ;;  %v2469_v3 = vld [vmem:[#allocation6 + $0x190] sm:$0xff]  ;;  %2961 = vmatpush.msrb.mxu3 %v2419_v55 }
 0x70c   :  { %2713 = vmatmul.f32.vlgmr.msrb.gmra.mxu1 %v5095_v0  ;;  %2639 = vmatpush.msra.mxu2 %v2473_v33  ;;  %v2465_v0 = vld [vmem:[#allocation6 + $0x170] sm:$0xff] }
 0x70d   :  { %2986 = vmatpush.msra.mxu1 %v5103_v8  ;;  %2679 = vmatpush.msrb.mxu0 %v2474_v20  ;;  %v2461_v8 = vld [vmem:[#allocation6 + $0x150] sm:$0xff] }
 0x70e   :  { %2640 = vmatpush.msra.mxu2 %v2469_v3  ;;  %3026 = vmatpush.msra.mxu3 %v2481_v61  ;;  %v2453_v55 = vld [vmem:[#allocation6 + $0x110] sm:$0xff] }
 0x70f   :  { %2987 = vmatpush.msra.mxu1 %v5106_v53  ;;  %2680 = vmatpush.msrb.mxu0 %v2470_v28  ;;  %v2458_v53 = vld [vmem:[#allocation6 + $0x138] sm:$0xff]  ;;  %v2449_v61 = vld [vmem:[#allocation6 + $0xf0] sm:$0xff] }
 0x710   :  { %2641 = vmatpush.msra.mxu2 %v2465_v0  ;;  %3027 = vmatpush.msra.mxu3 %v2477_v45  ;;  %v2445_v45 = vld [vmem:[#allocation6 + $0xd0] sm:$0xff] }
 0x711   :  { %2988 = vmatpush.msra.mxu1 %v5112_v56  ;;  %2681 = vmatpush.msrb.mxu0 %v2466_v26  ;;  %v2454_v56 = vld [vmem:[#allocation6 + $0x118] sm:$0xff] }
 0x712   :  { %2642 = vmatpush.msra.mxu2 %v2461_v8  ;;  %3028 = vmatpush.msra.mxu3 %v2473_v33  ;;  %v2446_v33 = vld [vmem:[#allocation6 + $0xd8] sm:$0xff] }
 0x713   :  { %2989 = vmatpush.msra.mxu1 %v5121_v34  ;;  %2682 = vmatpush.msrb.mxu0 %v2462_v36  ;;  %v2450_v34 = vld [vmem:[#allocation6 + $0xf8] sm:$0xff] }
 0x714   :  { %2643 = vmatpush.msra.mxu2 %v2457_v38  ;;  %3029 = vmatpush.msra.mxu3 %v2469_v3  ;;  %v2437_v3 = vld [vmem:[#allocation6 + $0x90] sm:$0xff] }
 0x715   :  { %2990 = vmatpush.msra.mxu1 %v5128_v44  ;;  %2683 = vmatpush.msrb.mxu0 %v2458_v53  ;;  %v2438_v44 = vld [vmem:[#allocation6 + $0x98] sm:$0xff] }
 0x716   :  { %2644 = vmatpush.msra.mxu2 %v2453_v55  ;;  %3030 = vmatpush.msra.mxu3 %v2465_v0  ;;  %v2442_v0 = vld [vmem:[#allocation6 + $0xb8] sm:$0xff] }
 0x717   :  { %2991 = vmatpush.msra.mxu1 %v5134_v48  ;;  %2684 = vmatpush.msrb.mxu0 %v2454_v56  ;;  %v2426_v48 = vld [vmem:[#allocation6 + $0x38] sm:$0xff] }
 0x718   :  { %2645 = vmatpush.msra.mxu2 %v2449_v61  ;;  %3031 = vmatpush.msra.mxu3 %v2461_v8  ;;  %v5839_v8 = vld [vmem:[#allocation35_spill] sm:$0xff] }
 0x719   :  { %2992 = vmatpush.msra.mxu1 %v5140_v50  ;;  %2685 = vmatpush.msrb.mxu0 %v2450_v34  ;;  %v2421_v50 = vld [vmem:[#allocation6 + $0x10] sm:$0xff] }
 0x71a   :  { %2646 = vmatpush.msra.mxu2 %v2445_v45  ;;  %3032 = vmatpush.msra.mxu3 %v2457_v38  ;;  %v2441_v38 = vld [vmem:[#allocation6 + $0xb0] sm:$0xff] }
 0x71b   :  { %2993 = vmatpush.msra.mxu1 %v5146_v15  ;;  %2686 = vmatpush.msrb.mxu0 %v2446_v33  ;;  %v2422_v15 = vld [vmem:[#allocation6 + $0x18] sm:$0xff] }
 0x71c   :  { %3033 = vmatpush.msra.mxu3 %v2453_v55  ;;  %2647 = vmatpush.msra.mxu2 %v2441_v38 }
 0x71d   :  { %2994 = vmatpush.msra.mxu1 %v5152_v4  ;;  %2687 = vmatpush.msrb.mxu0 %v2442_v0  ;;  %v3246_v4 = vld [vmem:[%s5378_s4] ss:$0 sm:$0xff] }
 0x71e   :  { %3034 = vmatpush.msra.mxu3 %v2449_v61  ;;  %2648 = vmatpush.msra.mxu2 %v2437_v3  ;;  %v5842_v61 = vld [vmem:[#allocation38_spill] sm:$0xff] }
 0x71f   :  { %2995 = vmatpush.msra.mxu1 %v5158_v52  ;;  %2688 = vmatpush.msrb.mxu0 %v2438_v44 }
 0x720   :  { %3035 = vmatpush.msra.mxu3 %v2445_v45 }
 0x721   :  { %2996 = vmatpush.msra.mxu1 %v5164_v31 }
 0x722   :  { %3036 = vmatpush.msra.mxu3 %v2441_v38 }
 0x723   :  { %2997 = vmatpush.msra.mxu1 %v5170_v37  ;;  %v5225_v37 = vld [vmem:[#allocation9 + $0x78] sm:$0xff] }
 0x724   :  { %3037 = vmatpush.msra.mxu3 %v2437_v3 }
 0x725   :  { %2998 = vmatpush.msra.mxu1 %v5176_v16  ;;  %v5227_v16 = vld [vmem:[#allocation9 + $0x70] sm:$0xff] }
 0x727   :  { %2999 = vmatpush.msra.mxu1 %v5182_v58  ;;  %v5231_v58 = vld [vmem:[#allocation9 + $0x68] sm:$0xff] }
 0x729   :  { %3000 = vmatpush.msra.mxu1 %v5188_v6  ;;  %v5235_v6 = vld [vmem:[#allocation9 + $0x60] sm:$0xff] }
 0x72b   :  { %3001 = vmatpush.msra.mxu1 %v5192_v2  ;;  %v2433_v2 = vld [vmem:[#allocation6 + $0x70] sm:$0xff] }
 0x72c   :  { %2649 = vmatpush.msra.mxu2 %v2433_v2  ;;  %3038 = vmatpush.msra.mxu3 %v2433_v2 }
 0x72d   :  { %3066 = vmatpush.msrb.mxu1 %v5196_v35  ;;  %v2425_v35 = vld [vmem:[#allocation6 + $0x30] sm:$0xff] }
 0x72f   :  { %3067 = vmatpush.msrb.mxu1 %v5200_v24  ;;  %v2434_v24 = vld [vmem:[#allocation6 + $0x78] sm:$0xff] }
 0x730   :  { %2689 = vmatpush.msrb.mxu0 %v2434_v24 }
 0x731   :  { %3068 = vmatpush.msrb.mxu1 %v2474_v20  ;;  %v5838_v20 = vld [vmem:[#allocation84_spill] sm:$0xff] }
 0x733   :  { %3069 = vmatpush.msrb.mxu1 %v2470_v28  ;;  %v2430_v28 = vld [vmem:[#allocation6 + $0x58] sm:$0xff] }
 0x734   :  { %2690 = vmatpush.msrb.mxu0 %v2430_v28 }
 0x735   :  { %3070 = vmatpush.msrb.mxu1 %v2466_v26  ;;  %v2429_v26 = vld [vmem:[#allocation6 + $0x50] sm:$0xff] }
 0x736   :  { %2650 = vmatpush.msra.mxu2 %v2429_v26  ;;  %3039 = vmatpush.msra.mxu3 %v2429_v26 }
 0x737   :  { %3071 = vmatpush.msrb.mxu1 %v2462_v36  ;;  %2691 = vmatpush.msrb.mxu0 %v2426_v48  ;;  %v5840_v36 = vld [vmem:[#allocation31_spill] sm:$0xff] }
 0x738   :  { %2651 = vmatpush.msra.mxu2 %v2425_v35  ;;  %3040 = vmatpush.msra.mxu3 %v2425_v35 }
 0x739   :  { %3072 = vmatpush.msrb.mxu1 %v2458_v53  ;;  %2692 = vmatpush.msrb.mxu0 %v2422_v15 }
 0x73a   :  { %2652 = vmatpush.msra.mxu2 %v2421_v50  ;;  %3041 = vmatpush.msra.mxu3 %v2421_v50 }
 0x73b   :  { %3073 = vmatpush.msrb.mxu1 %v2454_v56  ;;  %v5841_v56 = vld [vmem:[#allocation43_spill] sm:$0xff] }
 0x73d   :  { %3074 = vmatpush.msrb.mxu1 %v2450_v34 }
 0x73f   :  { %3075 = vmatpush.msrb.mxu1 %v2446_v33 }
 0x741   :  { %3076 = vmatpush.msrb.mxu1 %v2442_v0 }
 0x743   :  { %3077 = vmatpush.msrb.mxu1 %v2438_v44 }
 0x745   :  { %3078 = vmatpush.msrb.mxu1 %v2434_v24 }
 0x747   :  { %3079 = vmatpush.msrb.mxu1 %v2430_v28 }
 0x749   :  { %3080 = vmatpush.msrb.mxu1 %v2426_v48 }
 0x74b   :  { %3081 = vmatpush.msrb.mxu1 %v2422_v15 }
 0x769   :  { %v2410_v52 = vpop.f32.mrf.mxu1 }
 0x76a   :  { %v2411_v31 = vadd.f32 %v3246_v4, %v2410_v52 }
 0x76c   :  { %2416 = vst [vmem:[#allocation11 + $0x10] sm:$0xff] %v2411_v31  ;;  %2573 = vmatmul.f32.vlgmr.msrb.gmra.mxu2 %v2411_v31  ;;  %2613 = vmatmul.f32.vlgmr.msra.gmra.mxu0 %v2411_v31 }
 0x76d   :  { %2782 = vmatpush.msrb.mxu2 %v5225_v37  ;;  %2966 = vmatpush.msra.mxu0 %v4928_v21  ;;  %v5269_v21 = vld [vmem:[#allocation9 + $0x58] sm:$0xff] }
 0x76f   :  { %2783 = vmatpush.msrb.mxu2 %v5227_v16  ;;  %2967 = vmatpush.msra.mxu0 %v4930_v13  ;;  %v5272_v13 = vld [vmem:[#allocation9 + $0x50] sm:$0xff] }
 0x771   :  { %2784 = vmatpush.msrb.mxu2 %v5231_v58  ;;  %2968 = vmatpush.msra.mxu0 %v4934_v17  ;;  %v5275_v17 = vld [vmem:[#allocation9 + $0x48] sm:$0xff] }
 0x773   :  { %2785 = vmatpush.msrb.mxu2 %v5235_v6  ;;  %2969 = vmatpush.msra.mxu0 %v4953_v60  ;;  %v5278_v60 = vld [vmem:[#allocation9 + $0x40] sm:$0xff] }
 0x774   :  { %2653 = vmatmul.f32.vlgmr.msra.gmra.mxu2 %v2411_v31  ;;  %2693 = vmatmul.f32.vlgmr.msrb.gmra.mxu0 %v2411_v31 }
 0x775   :  { %2970 = vmatpush.msra.mxu0 %v4956_v59  ;;  %2786 = vmatpush.msrb.mxu2 %v5269_v21  ;;  %v5281_v59 = vld [vmem:[#allocation9 + $0x38] sm:$0xff] }
 0x777   :  { %2971 = vmatpush.msra.mxu0 %v4959_v47  ;;  %2787 = vmatpush.msrb.mxu2 %v5272_v13  ;;  %v5284_v47 = vld [vmem:[#allocation9 + $0x30] sm:$0xff] }
 0x779   :  { %2972 = vmatpush.msra.mxu0 %v4962_v32  ;;  %2788 = vmatpush.msrb.mxu2 %v5275_v17  ;;  %v5287_v32 = vld [vmem:[#allocation9 + $0x28] sm:$0xff] }
 0x77b   :  { %2973 = vmatpush.msra.mxu0 %v4965_v23  ;;  %2789 = vmatpush.msrb.mxu2 %v5278_v60  ;;  %v5290_v23 = vld [vmem:[#allocation9 + $0x20] sm:$0xff] }
 0x77d   :  { %2974 = vmatpush.msra.mxu0 %v4968_v29  ;;  %2790 = vmatpush.msrb.mxu2 %v5281_v59  ;;  %v5293_v29 = vld [vmem:[#allocation9 + $0x18] sm:$0xff] }
 0x77f   :  { %2975 = vmatpush.msra.mxu0 %v4971_v12  ;;  %2791 = vmatpush.msrb.mxu2 %v5284_v47  ;;  %v5296_v12 = vld [vmem:[#allocation9 + $0x10] sm:$0xff] }
 0x781   :  { %2976 = vmatpush.msra.mxu0 %v4974_v40  ;;  %2792 = vmatpush.msrb.mxu2 %v5287_v32  ;;  %v5299_v40 = vld [vmem:[#allocation9 + $0x8] sm:$0xff] }
 0x783   :  { %2977 = vmatpush.msra.mxu0 %v4977_v11  ;;  %2793 = vmatpush.msrb.mxu2 %v5290_v23  ;;  %v5302_v11 = vld [vmem:[#allocation9] sm:$0xff] }
 0x785   :  { %2978 = vmatpush.msra.mxu0 %v4983_v42  ;;  %2794 = vmatpush.msrb.mxu2 %v5293_v29  ;;  %v2547_v42 = vld [vmem:[#allocation8] sm:$0xf] }
 0x786   :  { %v2552_v38 = vperm.slane %v2547_v42, 3  ;;  %v2551_v24 = vperm.slane %v2547_v42, 2 }
 0x787   :  { %2979 = vmatpush.msra.mxu0 %v4989_v27  ;;  %2795 = vmatpush.msrb.mxu2 %v5296_v12  ;;  %v2550_v27 = vperm.slane %v2547_v42, 1 }
 0x789   :  { %2980 = vmatpush.msra.mxu0 %v4995_v62  ;;  %2796 = vmatpush.msrb.mxu2 %v5299_v40  ;;  %v5830_v62 = vld [vmem:[#allocation53_spill] sm:$0xff] }
 0x78b   :  { %2981 = vmatpush.msra.mxu0 %v5001_v5  ;;  %2797 = vmatpush.msrb.mxu2 %v5302_v11 }
 0x78d   :  { %3046 = vmatpush.msrb.mxu0 %v5006_v22  ;;  %3006 = vmatpush.msra.mxu2 %v4980_v41  ;;  %v5831_v22 = vld [vmem:[#allocation58_spill] sm:$0xff] }
 0x78f   :  { %3047 = vmatpush.msrb.mxu0 %v5014_v57  ;;  %3007 = vmatpush.msra.mxu2 %v4986_v9 }
 0x791   :  { %3048 = vmatpush.msrb.mxu0 %v5021_v46  ;;  %3008 = vmatpush.msra.mxu2 %v4992_v39  ;;  %v2634_v46 = vpop.f32.mrf.mxu1  ;;  %v2594_v39 = vpop.f32.mrf.mxu3 }
 0x793   :  { %3049 = vmatpush.msrb.mxu0 %v5027_v25  ;;  %3009 = vmatpush.msra.mxu2 %v5830_v62  ;;  %v5832_v25 = vld [vmem:[#allocation62_spill] sm:$0xff] }
 0x795   :  { %3050 = vmatpush.msrb.mxu0 %v5033_v14  ;;  %3010 = vmatpush.msra.mxu2 %v5831_v22 }
 0x797   :  { %3051 = vmatpush.msrb.mxu0 %v5040_v18  ;;  %3011 = vmatpush.msra.mxu2 %v5832_v25  ;;  %v2549_v18 = vperm.slane %v2547_v42, 0 }
 0x799   :  { %3052 = vmatpush.msrb.mxu0 %v5046_v1  ;;  %v5833_v1 = vld [vmem:[#allocation66_spill] sm:$0xff]  ;;  %v2714_v31 = vpop.f32.mrf.mxu1  ;;  %v2674_v22 = vpop.f32.mrf.mxu3 }
 0x79a   :  { %3012 = vmatpush.msra.mxu2 %v5833_v1 }
 0x79b   :  { %3053 = vmatpush.msrb.mxu0 %v5052_v7 }
 0x79d   :  { %3054 = vmatpush.msrb.mxu0 %v5058_v54  ;;  %v5834_v54 = vld [vmem:[#allocation70_spill] sm:$0xff] }
 0x79e   :  { %3013 = vmatpush.msra.mxu2 %v5834_v54 }
 0x79f   :  { %3055 = vmatpush.msrb.mxu0 %v5064_v30  ;;  %v5835_v30 = vld [vmem:[#allocation74_spill] sm:$0xff] }
 0x7a0   :  { %3014 = vmatpush.msra.mxu2 %v5835_v30 }
 0x7a1   :  { %3056 = vmatpush.msrb.mxu0 %v5070_v51 }
 0x7a3   :  { %3057 = vmatpush.msrb.mxu0 %v5076_v63  ;;  %v5836_v63 = vld [vmem:[#allocation78_spill] sm:$0xff] }
 0x7a4   :  { %3015 = vmatpush.msra.mxu2 %v5836_v63 }
 0x7a5   :  { %3058 = vmatpush.msrb.mxu0 %v5080_v10 }
 0x7a7   :  { %3059 = vmatpush.msrb.mxu0 %v5083_v49  ;;  %v5837_v49 = vld [vmem:[#allocation81_spill] sm:$0xff] }
 0x7a8   :  { %3016 = vmatpush.msra.mxu2 %v5837_v49  ;;  %v5844_v49 = vld [vmem:[#allocation47_spill] sm:$0xff] }
 0x7a9   :  { %3060 = vmatpush.msrb.mxu0 %v5086_v43 }
 0x7aa   :  { %3017 = vmatpush.msra.mxu2 %v5838_v20  ;;  %v5847_v20 = vld [vmem:[#allocation45_spill] sm:$0xff] }
 0x7ab   :  { %3061 = vmatpush.msrb.mxu0 %v5090_v19 }
 0x7ac   :  { %3018 = vmatpush.msra.mxu2 %v5839_v8  ;;  %v5848_v8 = vld [vmem:[#allocation39_spill] sm:$0xff] }
 0x7ae   :  { %3019 = vmatpush.msra.mxu2 %v5840_v36  ;;  %v5849_v36 = vld [vmem:[#allocation50_spill] sm:$0xff] }
 0x7b0   :  { %3020 = vmatpush.msra.mxu2 %v5841_v56  ;;  %v5852_v56 = vld [vmem:[#allocation54_spill] sm:$0xff] }
 0x7b2   :  { %3021 = vmatpush.msra.mxu2 %v5842_v61  ;;  %v5853_v61 = vld [vmem:[#allocation46_spill] sm:$0xff] }
 0x7e9   :  { %v2614_v5 = vpop.f32.mrf.mxu0 }
 0x7ea   :  { %v2615_v57 = vadd.f32 %v2614_v5, %v2550_v27 }
 0x7ec   :  { %v2635_v14 = vadd.f32 %v2634_v46, %v2615_v57 }
 0x7ee   :  { %v3228_v41 = vmul.f32 -1.442695, %v2635_v14 }
 0x7ef   :  { %v2574_v7 = vpop.f32.mrf.mxu2 }
 0x7f0   :  { %3309 = vpow2.f32 %v3228_v41  ;;  %v2575_v9 = vadd.f32 %v2574_v7, %v2549_v18 }
 0x7f1   :  { %v2694_v44 = vpop.f32.mrf.mxu0 }
 0x7f2   :  { %v2595_v51 = vadd.f32 %v2594_v39, %v2575_v9  ;;  %v2695_v35 = vadd.f32 %v2694_v44, %v2552_v38  ;;  %v5857_v38 = vld [vmem:[#allocation65_spill] sm:$0xff]  ;;  %v3247_v44 = vld [vmem:[%s5378_s4] ss:$0 sm:$0xff] }
 0x7f4   :  { %v3227_v10 = vmul.f32 -1.442695, %v2595_v51  ;;  %v2715_v62 = vadd.f32 %v2714_v31, %v2695_v35  ;;  %v5843_v51 = vld [vmem:[#allocation33_spill] sm:$0xff] }
 0x7f6   :  { %v3310_v43 = vpop.eup %3309  ;;  %3311 = vpow2.f32 %v3227_v10 }
 0x7f7   :  { %v2739_v19 = vadd.f32 1.0, %v3310_v43  ;;  %v2654_v28 = vpop.f32.mrf.mxu2  ;;  %v5845_v43 = vld [vmem:[#allocation41_spill] sm:$0xff] }
 0x7f8   :  { %v2655_v52 = vadd.f32 %v2654_v28, %v2551_v24 }
 0x7f9   :  { %3313 = vrcp.f32 %v2739_v19  ;;  %v2751_v46 = vand.u32 2147483648, %v2739_v19  ;;  %vm2745_vm5 = vweird.f32 %v2739_v19  ;;  %v2749_v18 = vand.u32 2147483647, %v2739_v19 }
 0x7fa   :  { %v2675_v14 = vadd.f32 %v2674_v22, %v2655_v52 }
 0x7fb   :  { %v2752_v7 = vor.u32 1.1754944e-38, %v2751_v46  ;;  %vm2750_vm7 = vcmp.eq.f32.partialorder %v2749_v18, 8.507059e+37 }
 0x7fc   :  { %v3312_v53 = vpop.eup %3311 }
 0x7fd   :  { %v2720_v55 = vadd.f32 1.0, %v3312_v53  ;;  %v5850_v53 = vld [vmem:[#allocation42_spill] sm:$0xff] }
 0x7ff   :  { %3315 = vrcp.f32 %v2720_v55  ;;  %v3314_v34 = vpop.eup %3313  ;;  %v2732_v26 = vand.u32 2147483648, %v2720_v55  ;;  %v2730_v50 = vand.u32 2147483647, %v2720_v55  ;;  %vm2726_vm1 = vweird.f32 %v2720_v55 }
 0x800   :  { %v2741_v45 = vmul.f32 %v3314_v34, %v2739_v19  ;;  %vm2746_vm4 = vweird.f32 %v3314_v34  ;;  %v5846_v19 = vld [vmem:[#allocation36_spill] sm:$0xff] }
 0x801   :  { %v2733_v27 = vor.u32 1.1754944e-38, %v2732_v26  ;;  %vm2731_vm3 = vcmp.eq.f32.partialorder %v2730_v50, 8.507059e+37  ;;  %vm2747_vm6 = vmor %vm2745_vm5, %vm2746_vm4 }
 0x802   :  { %v2742_v3 = vsub.f32 1.0, %v2741_v45  ;;  %v5855_v45 = vld [vmem:[#allocation55_spill] sm:$0xff] }
 0x804   :  { %v2743_v15 = vmul.f32 %v3314_v34, %v2742_v3  ;;  %v5859_v3 = vld [vmem:[#allocation52_spill] sm:$0xff] }
 0x805   :  { %v3316_v33 = vpop.eup %3315 }
 0x806   :  { %v2722_v0 = vmul.f32 %v3316_v33, %v2720_v55  ;;  %vm2727_vm0 = vweird.f32 %v3316_v33  ;;  %v2744_v42 = vadd.f32 %v3314_v34, %v2743_v15  ;;  %v5851_v55 = vld [vmem:[#allocation57_spill] sm:$0xff] }
 0x807   :  { %vm2728_vm2 = vmor %vm2726_vm1, %vm2727_vm0 }
 0x808   :  { %v2723_v2 = vsub.f32 1.0, %v2722_v0  ;;  %v2748_v41 = vsel %vm2747_vm6, %v3314_v34, %v2744_v42  ;;  %v5854_v34 = vld [vmem:[#allocation61_spill] sm:$0xff]  ;;  %v5858_v0 = vld [vmem:[#allocation59_spill] sm:$0xff] }
 0x809   :  { %v2753_v54 = vsel %vm2750_vm7, %v2752_v7, %v2748_v41 }
 0x80a   :  { %v2724_v48 = vmul.f32 %v3316_v33, %v2723_v2  ;;  %v2758_v9 = vsub.f32 1.0, %v2753_v54  ;;  %v2760_v63 = vmul.f32 %v2753_v54, %v5843_v51 }
 0x80c   :  { %v2725_v4 = vadd.f32 %v3316_v33, %v2724_v48 }
 0x80e   :  { %v2729_v5 = vsel %vm2728_vm2, %v3316_v33, %v2725_v4  ;;  %v5856_v33 = vld [vmem:[#allocation49_spill] sm:$0xff] }
 0x80f   :  { %v2734_v57 = vsel %vm2731_vm3, %v2733_v27, %v2729_v5 }
 0x810   :  { %v2755_v25 = vmul.f32 %v2734_v57, %v2715_v62 }
 0x812   :  { %v2756_v1 = vadd.f32 %v2755_v25, %v2675_v14 }
 0x814   :  { %3317 = vtanh.f32 %v2756_v1 }
 0x81a   :  { %v3318_v39 = vpop.eup %3317 }
 0x81b   :  { %v2759_v30 = vmul.f32 %v3318_v39, %v2758_v9 }
 0x81d   :  { %v5322_v10 = vadd.f32 %v2760_v63, %v2759_v30 }
 0x81f   :  { %2798 = vmatmul.f32.vlgmr.msrb.gmra.mxu2 %v5322_v10  ;;  %2982 = vmatmul.f32.vlgmr.msra.gmra.mxu0 %v5322_v10 }
 0x820   :  { %3086 = vmatpush.msrb.mxu2 %v5844_v49 }
 0x822   :  { %3087 = vmatpush.msrb.mxu2 %v5845_v43 }
 0x824   :  { %3088 = vmatpush.msrb.mxu2 %v5846_v19 }
 0x826   :  { %3089 = vmatpush.msrb.mxu2 %v5847_v20 }
 0x827   :  { %3022 = vmatmul.f32.vlgmr.msra.gmra.mxu2 %v5322_v10  ;;  %3062 = vmatmul.f32.vlgmr.msrb.gmra.mxu0 %v5322_v10 }
 0x828   :  { %3090 = vmatpush.msrb.mxu2 %v5848_v8 }
 0x82a   :  { %3091 = vmatpush.msrb.mxu2 %v5849_v36 }
 0x82c   :  { %3092 = vmatpush.msrb.mxu2 %v5850_v53 }
 0x82e   :  { %3093 = vmatpush.msrb.mxu2 %v5851_v55 }
 0x830   :  { %3094 = vmatpush.msrb.mxu2 %v5852_v56 }
 0x832   :  { %3095 = vmatpush.msrb.mxu2 %v5853_v61 }
 0x834   :  { %3096 = vmatpush.msrb.mxu2 %v5854_v34  ;;  %v3248_v34 = vld [vmem:[%s5378_s4] ss:$0 sm:$0xff] }
 0x836   :  { %3097 = vmatpush.msrb.mxu2 %v5855_v45 }
 0x838   :  { %3098 = vmatpush.msrb.mxu2 %v5856_v33 }
 0x83a   :  { %3099 = vmatpush.msrb.mxu2 %v5857_v38 }
 0x83c   :  { %3100 = vmatpush.msrb.mxu2 %v5858_v0 }
 0x83e   :  { %3101 = vmatpush.msrb.mxu2 %v5859_v3 }
 0x83f   :  { %3102 = vmatmul.f32.vlgmr.msrb.gmra.mxu2 %v5322_v10 }
 0x8a2   :  { %v2799_v2 = vpop.f32.mrf.mxu2 }
 0x8a3   :  { %v2800_v24 = vadd.f32 %v3247_v44, %v2799_v2 }
 0x8a5   :  { %2805 = vst [vmem:[#allocation11 + $0x8] sm:$0xff] %v2800_v24  ;;  %2962 = vmatmul.f32.vlgmr.msrb.gmra.mxu3 %v2800_v24  ;;  %3002 = vmatmul.f32.vlgmr.msra.gmra.mxu1 %v2800_v24 }
 0x8a6   :  { %3171 = vmatpush.msrb.mxu3 %v5225_v37  ;;  %v2936_v37 = vld [vmem:[#allocation8] sm:$0xf] }
 0x8a7   :  { %v2941_v50 = vperm.slane %v2936_v37, 3  ;;  %v2940_v27 = vperm.slane %v2936_v37, 2 }
 0x8a8   :  { %3172 = vmatpush.msrb.mxu3 %v5227_v16  ;;  %v2939_v16 = vperm.slane %v2936_v37, 1 }
 0x8aa   :  { %3173 = vmatpush.msrb.mxu3 %v5231_v58 }
 0x8ac   :  { %3174 = vmatpush.msrb.mxu3 %v5235_v6 }
 0x8ad   :  { %3042 = vmatmul.f32.vlgmr.msra.gmra.mxu3 %v2800_v24  ;;  %3082 = vmatmul.f32.vlgmr.msrb.gmra.mxu1 %v2800_v24 }
 0x8ae   :  { %3175 = vmatpush.msrb.mxu3 %v5269_v21  ;;  %v3023_v21 = vpop.f32.mrf.mxu2 }
 0x8b0   :  { %3176 = vmatpush.msrb.mxu3 %v5272_v13 }
 0x8b2   :  { %3177 = vmatpush.msrb.mxu3 %v5275_v17  ;;  %v2938_v17 = vperm.slane %v2936_v37, 0 }
 0x8b4   :  { %3178 = vmatpush.msrb.mxu3 %v5278_v60 }
 0x8b6   :  { %3179 = vmatpush.msrb.mxu3 %v5281_v59 }
 0x8b8   :  { %3180 = vmatpush.msrb.mxu3 %v5284_v47 }
 0x8ba   :  { %3181 = vmatpush.msrb.mxu3 %v5287_v32  ;;  %v2983_v32 = vpop.f32.mrf.mxu0 }
 0x8bc   :  { %3182 = vmatpush.msrb.mxu3 %v5290_v23 }
 0x8be   :  { %3183 = vmatpush.msrb.mxu3 %v5293_v29 }
 0x8c0   :  { %3184 = vmatpush.msrb.mxu3 %v5296_v12 }
 0x8c2   :  { %3185 = vmatpush.msrb.mxu3 %v5299_v40  ;;  %v3103_v18 = vpop.f32.mrf.mxu2  ;;  %v3063_v54 = vpop.f32.mrf.mxu0 }
 0x8c4   :  { %3186 = vmatpush.msrb.mxu3 %v5302_v11 }
 0x922   :  { %v3003_v58 = vpop.f32.mrf.mxu1 }
 0x923   :  { %v3004_v6 = vadd.f32 %v3003_v58, %v2939_v16 }
 0x925   :  { %v3024_v13 = vadd.f32 %v3023_v21, %v3004_v6 }
 0x927   :  { %v3230_v60 = vmul.f32 -1.442695, %v3024_v13 }
 0x928   :  { %v2963_v59 = vpop.f32.mrf.mxu3 }
 0x929   :  { %3319 = vpow2.f32 %v3230_v60  ;;  %v2964_v47 = vadd.f32 %v2963_v59, %v2938_v17 }
 0x92a   :  { %v3083_v52 = vpop.f32.mrf.mxu1 }
 0x92b   :  { %v2984_v23 = vadd.f32 %v2983_v32, %v2964_v47  ;;  %v3084_v22 = vadd.f32 %v3083_v52, %v2941_v50 }
 0x92d   :  { %v3229_v29 = vmul.f32 -1.442695, %v2984_v23  ;;  %v3104_v41 = vadd.f32 %v3103_v18, %v3084_v22 }
 0x92f   :  { %v3320_v26 = vpop.eup %3319  ;;  %3321 = vpow2.f32 %v3229_v29 }
 0x930   :  { %v3128_v12 = vadd.f32 1.0, %v3320_v26  ;;  %v3043_v5 = vpop.f32.mrf.mxu3 }
 0x931   :  { %v3044_v14 = vadd.f32 %v3043_v5, %v2940_v27 }
 0x932   :  { %3323 = vrcp.f32 %v3128_v12  ;;  %v3140_v63 = vand.u32 2147483648, %v3128_v12  ;;  %vm3134_vm13 = vweird.f32 %v3128_v12  ;;  %v3138_v49 = vand.u32 2147483647, %v3128_v12 }
 0x933   :  { %v3064_v51 = vadd.f32 %v3063_v54, %v3044_v14 }
 0x934   :  { %v3141_v20 = vor.u32 1.1754944e-38, %v3140_v63  ;;  %vm3139_vm15 = vcmp.eq.f32.partialorder %v3138_v49, 8.507059e+37 }
 0x935   :  { %v3322_v40 = vpop.eup %3321 }
 0x936   :  { %v3109_v11 = vadd.f32 1.0, %v3322_v40 }
 0x938   :  { %3325 = vrcp.f32 %v3109_v11  ;;  %v3324_v28 = vpop.eup %3323  ;;  %v3121_v62 = vand.u32 2147483648, %v3109_v11  ;;  %v3119_v42 = vand.u32 2147483647, %v3109_v11  ;;  %vm3115_vm9 = vweird.f32 %v3109_v11 }
 0x939   :  { %v3130_v35 = vmul.f32 %v3324_v28, %v3128_v12  ;;  %vm3135_vm12 = vweird.f32 %v3324_v28 }
 0x93a   :  { %v3122_v1 = vor.u32 1.1754944e-38, %v3121_v62  ;;  %vm3120_vm11 = vcmp.eq.f32.partialorder %v3119_v42, 8.507059e+37  ;;  %vm3136_vm14 = vmor %vm3134_vm13, %vm3135_vm12 }
 0x93b   :  { %v3131_v4 = vsub.f32 1.0, %v3130_v35 }
 0x93d   :  { %v3132_v46 = vmul.f32 %v3324_v28, %v3131_v4 }
 0x93e   :  { %v3326_v48 = vpop.eup %3325 }
 0x93f   :  { %v3111_v15 = vmul.f32 %v3326_v48, %v3109_v11  ;;  %vm3116_vm8 = vweird.f32 %v3326_v48  ;;  %v3133_v39 = vadd.f32 %v3324_v28, %v3132_v46 }
 0x940   :  { %vm3117_vm10 = vmor %vm3115_vm9, %vm3116_vm8 }
 0x941   :  { %v3112_v31 = vsub.f32 1.0, %v3111_v15  ;;  %v3137_v19 = vsel %vm3136_vm14, %v3324_v28, %v3133_v39 }
 0x942   :  { %v3142_v8 = vsel %vm3139_vm15, %v3141_v20, %v3137_v19 }
 0x943   :  { %v3113_v57 = vmul.f32 %v3326_v48, %v3112_v31  ;;  %v3147_v36 = vsub.f32 1.0, %v3142_v8  ;;  %v3149_v56 = vmul.f32 %v3142_v8, %v5322_v10 }
 0x945   :  { %v3114_v25 = vadd.f32 %v3326_v48, %v3113_v57 }
 0x947   :  { %v3118_v7 = vsel %vm3117_vm10, %v3326_v48, %v3114_v25 }
 0x948   :  { %v3123_v9 = vsel %vm3120_vm11, %v3122_v1, %v3118_v7 }
 0x949   :  { %v3144_v30 = vmul.f32 %v3123_v9, %v3104_v41 }
 0x94b   :  { %v3145_v43 = vadd.f32 %v3144_v30, %v3064_v51 }
 0x94d   :  { %3327 = vtanh.f32 %v3145_v43 }
 0x953   :  { %v3328_v53 = vpop.eup %3327 }
 0x954   :  { %v3148_v55 = vmul.f32 %v3328_v53, %v3147_v36 }
 0x956   :  { %v3150_v61 = vadd.f32 %v3149_v56, %v3148_v55 }
 0x958   :  { %3187 = vmatmul.f32.vlgmr.msrb.gmra.mxu3 %v3150_v61 }
 0x9db   :  { %v3188_v45 = vpop.f32.mrf.mxu3 }
 0x9dc   :  { %v3189_v33 = vadd.f32 %v3248_v34, %v3188_v45 }
 0x9de   :  { %3193 = vst [vmem:[#allocation11] sm:$0xff] %v3189_v33 }
 0x9df   :  { %3206 = dma.vmem_to_hbm [thread:$0]  %s3199_s30, 1024, %s3201_s1, [#allocation5], %s3463_s13, %s3463_s13, %s3464_s14  }
 0x9e0   :  { %3455 = dma.done.wait [#allocation5], 1024  }
 0x9e1   :  { %3456 = vsyncadd [#allocation5], 4294966272 }
 0x9e2   :  { %3211 = vsyncpa [#allocation4], 1 }
 0x9e3   :  { %3212 = vsyncpa [#allocation7], 1 }
 0x9e4   :  { %3213 = vsyncpa [#allocation10], 1 }
 0x9e5   :  { %3214 = vsyncpa [#allocation5], 1 }

</bundles_post_ra>
